<compile_context>
chip_gen: v7x
topology: tpu7x:2x2x1
jax: 0.10.0
libtpu: 0.0.40
codegen_flags: <defaults>
</compile_context>

<pallas_src>
import functools

import jax
import jax.numpy as jnp
from jax.experimental import pallas as pl
from jax.experimental.pallas import tpu as pltpu

L = 512       # instance feature dim (resnet18 penultimate features)
D = 128       # attention hidden dim
K = 1         # number of attention heads (pooling path below assumes K == 1)
C_HID = 128
C_OUT = 2

NEG_INF = -1e30   # large-negative finite mask value (avoids inf-inf NaN paths)


def _cdiv(a, b):
    return -(-a // b)


def mil_pool_kernel(h_ref,                                   # (tn, L) f32 tile of features
                    wa1t_ref, ba1_ref, wa2_ref, ba2_ref,     # resident attention weights
                    m_out, l_out, acc_out,                   # per-split partials
                    m_sc, l_sc, acc_sc,                      # VMEM scratch accumulators
                    *, n_valid, tn, tiles_per_split, num_blocks):
    i = pl.program_id(0)   # split index ("parallel": one per TensorCore on v7x)
    j = pl.program_id(1)   # tile index within the split (streaming reduction)

    @pl.when(j == 0)
    def _init():
        m_sc[...] = jnp.full_like(m_sc, NEG_INF)
        l_sc[...] = jnp.zeros_like(l_sc)
        acc_sc[...] = jnp.zeros_like(acc_sc)

    # ---- attention MLP: tanh(H @ Wa1^T + ba1); bf16 MXU feed, f32 accumulate ----
    h_bf16 = h_ref[...].astype(jnp.bfloat16)
    a_hidden = jnp.tanh(
        jnp.dot(h_bf16, wa1t_ref[...], preferred_element_type=jnp.float32)
        + ba1_ref[...]
    )                                                        # (tn, D) f32

    # ---- attention logits: VPU reduce (a 1-lane-wide MXU output would be wasted) ----
    # TODO(synk): v7x micro-opt — keep the logit/softmax column lane-dense
    # ((1, tn) transposed formulation) instead of the narrow (tn, 1) column.
    logits = (jnp.sum(a_hidden * wa2_ref[...], axis=-1, keepdims=True)
              + ba2_ref[...])                                # (tn, 1)

    # ---- mask rows outside the true bag (ragged tail / dead clamped tiles) ----
    local = jax.lax.broadcasted_iota(jnp.int32, (tn, 1), 0)
    grid_tile = i * tiles_per_split + j
    g_row = grid_tile * tn + local
    logits = jnp.where(g_row < n_valid, logits, NEG_INF)

    # ---- streaming (online) softmax over the instance axis ----
    m_tile = jnp.max(logits, axis=0, keepdims=True)          # (1, 1)
    m_new = jnp.maximum(m_sc[...], m_tile)
    alpha = jnp.exp(m_sc[...] - m_new)
    p = jnp.exp(logits - m_new)                              # (tn, 1) f32
    l_sc[...] = alpha * l_sc[...] + jnp.sum(p, axis=0, keepdims=True)
    m_sc[...] = m_new

    # ---- attention pooling on the MXU: acc += p^T @ H, f32 accumulation ----
    def pool(h_tile):
        acc_sc[...] = alpha * acc_sc[...] + jax.lax.dot_general(
            p, h_tile, (((0,), (0,)), ((), ())),
            preferred_element_type=jnp.float32)

    # The DMA'd block (index clamped to num_blocks-1) can run past the true N;
    # rows past N may hold stale-VMEM garbage and p == 0 does NOT protect the
    # accumulator (0 * NaN = NaN), so zero them — but only on the (at most one)
    # partial block; full blocks skip the full-tile select entirely.
    clamped_blk = jnp.minimum(grid_tile, num_blocks - 1)
    block_is_partial = clamped_blk * tn + tn > n_valid
    buf_row = clamped_blk * tn + local

    @pl.when(jnp.logical_not(block_is_partial))
    def _pool_full():
        pool(h_ref[...])

    @pl.when(block_is_partial)
    def _pool_ragged():
        pool(jnp.where(buf_row < n_valid, h_ref[...], 0.0))

    # ---- emit this split's online-softmax partials once ----
    @pl.when(j == tiles_per_split - 1)
    def _finalize():
        m_out[...] = m_sc[...].reshape(m_out.shape)
        l_out[...] = l_sc[...].reshape(l_out.shape)
        acc_out[...] = acc_sc[...].reshape(acc_out.shape)


def mil_attention_forward(H, params, *, tn=1024, num_splits=2, vmem_limit_bytes=None):
    """H: (N, 512) float32 instance features. Returns Y_prob of shape (1, 2).

    The H stream is memory-bound, so bigger tiles are better (per-grid-step
    overhead ~0.35us). Guidance:
      * v7x : tn ~ 2048-4096, vmem_limit_bytes ~ 48-56 MiB (64 MiB physical VMEM).
      * v6e : tn ~ 4096-8192, vmem_limit_bytes ~ 64-96 MiB (default scoped 32 MiB).
      * v5e : tn ~ 4096-8192, vmem_limit_bytes ~ 64 MiB   (default scoped 16 MiB).
    The default tn=1024 fits every chip's default scoped-VMEM limit.
    num_splits=2 shards the instance axis over both v7x TensorCores (the extra
    split is harmless sequential work on single-core chips).
    """
    wa1, ba1, wa2, ba2, wc1, bc1, wc2, bc2 = params
    N = H.shape[0]
    assert H.shape[1] == L and N >= 1

    # Keep the tile a multiple of 8 sublanes and never (much) larger than the bag.
    tn = min(tn, _cdiv(N, 8) * 8)
    tn = max(8, (tn // 8) * 8)
    num_blocks = _cdiv(N, tn)                      # real H blocks
    tiles_per_split = _cdiv(num_blocks, num_splits)

    wa1t = wa1.T.astype(jnp.bfloat16)              # (L, D) resident bf16 MXU feed

    rows = num_splits * tiles_per_split * tn
    cost = pl.CostEstimate(
        flops=2 * rows * (L * D + D + L),
        transcendentals=rows * (D + 1),
        bytes_accessed=N * L * 4 + L * D * 2 + (2 * D + 1) * 4
        + num_splits * (L + 2) * 4,
    )

    kernel = functools.partial(
        mil_pool_kernel, n_valid=N, tn=tn,
        tiles_per_split=tiles_per_split, num_blocks=num_blocks)

    def h_index(i, j):
        # Clamp so dead trailing tiles re-read the last real block (stays in
        # bounds); their rows are masked out inside the kernel.
        return (jnp.minimum(i * tiles_per_split + j, num_blocks - 1), 0)

    def resident(shape):  # weights/biases: fetched once, stay resident across steps
        return pl.BlockSpec(shape, lambda i, j: (0, 0))

    m_part, l_part, acc_part = pl.pallas_call(
        kernel,
        out_shape=(
            jax.ShapeDtypeStruct((num_splits, 1, 1), jnp.float32),
            jax.ShapeDtypeStruct((num_splits, 1, 1), jnp.float32),
            jax.ShapeDtypeStruct((num_splits, 1, L), jnp.float32),
        ),
        grid=(num_splits, tiles_per_split),
        in_specs=[
            pl.BlockSpec((tn, L), h_index),        # H: streamed / double-buffered
            resident((L, D)),                      # wa1t (bf16)
            resident((1, D)),                      # ba1
            resident((K, D)),                      # wa2
            resident((1, K)),                      # ba2
        ],
        out_specs=(
            pl.BlockSpec((1, 1, 1), lambda i, j: (i, 0, 0)),
            pl.BlockSpec((1, 1, 1), lambda i, j: (i, 0, 0)),
            pl.BlockSpec((1, 1, L), lambda i, j: (i, 0, 0)),
        ),
        scratch_shapes=[
            pltpu.VMEM((1, 1), jnp.float32),       # running max m
            pltpu.VMEM((1, 1), jnp.float32),       # running denom l
            pltpu.VMEM((1, L), jnp.float32),       # pooled-feature accumulator
        ],
        compiler_params=pltpu.CompilerParams(
            dimension_semantics=("parallel", "arbitrary"),
            vmem_limit_bytes=vmem_limit_bytes,
        ),
        cost_estimate=cost,
    )(H, wa1t, ba1, wa2, ba2)

    # ---- O(1) merge of per-split online-softmax partials (exact f32 divide) ----
    m = jnp.max(m_part, axis=0)                    # (1, 1)
    w = jnp.exp(m_part - m)                        # (S, 1, 1); dead splits -> 0
    l = jnp.sum(w * l_part, axis=0)                # (1, 1)
    pooled = jnp.sum(w * acc_part, axis=0) / l     # (1, L) == softmax(A) @ H

    # ---- classifier head + final softmax (O(1); plain f32 JAX epilogue) ----
    c_hidden = jax.nn.relu(pooled @ wc1.T + bc1)   # (1, C_HID)
    return jax.nn.softmax(c_hidden @ wc2.T + bc2, axis=1)   # (1, C_OUT)


def init_params(key):
    """PyTorch-nn.Linear-style shapes (out_features, in_features); small normal init."""
    ks = jax.random.split(key, 8)
    wa1 = jax.random.normal(ks[0], (D, L), jnp.float32) * 0.02
    ba1 = jax.random.normal(ks[1], (1, D), jnp.float32) * 0.02
    wa2 = jax.random.normal(ks[2], (K, D), jnp.float32) * 0.02
    ba2 = jax.random.normal(ks[3], (1, K), jnp.float32) * 0.02
    wc1 = jax.random.normal(ks[4], (C_HID, L * K), jnp.float32) * 0.02
    bc1 = jax.random.normal(ks[5], (1, C_HID), jnp.float32) * 0.02
    wc2 = jax.random.normal(ks[6], (C_OUT, C_HID), jnp.float32) * 0.02
    bc2 = jax.random.normal(ks[7], (1, C_OUT), jnp.float32) * 0.02
    return (wa1, ba1, wa2, ba2, wc1, bc1, wc2, bc2)


def reference_forward(H, params):
    """Pure-JAX reference mirroring the kernel's precision (bf16 attention-MLP feed,
    f32 pooling/classifier). A strict-f32 torch forward differs only in that feed."""
    wa1, ba1, wa2, ba2, wc1, bc1, wc2, bc2 = params
    a_hidden = jnp.tanh(
        jnp.dot(H.astype(jnp.bfloat16), wa1.T.astype(jnp.bfloat16),
                preferred_element_type=jnp.float32) + ba1)
    a = a_hidden @ wa2.T + ba2                     # (N, 1)
    w = jax.nn.softmax(a.T, axis=1)                # (1, N)
    M = w @ H                                      # (1, 512) f32 pooling
    c = jax.nn.relu(M @ wc1.T + bc1)
    return jax.nn.softmax(c @ wc2.T + bc2, axis=1)   # (1, 2)


if __name__ == "__main__":
    key = jax.random.PRNGKey(0)
    k_h, k_p = jax.random.split(key)

    # Bag of N instances after the backbone + view(-1, 512). N chosen so that
    # the small-tile config exercises full tiles, a ragged tail tile and a dead
    # (clamped) tile on the second split, while the default config exercises the
    # single-block + fully-dead-split path.
    N = 600
    H = jax.random.normal(k_h, (N, L), jnp.float32)
    params = init_params(k_p)

    y_ref = reference_forward(H, params)

    y_small = mil_attention_forward(H, params, tn=256)   # grid (2, 2) + ragged tail
    y_default = mil_attention_forward(H, params)         # default (large) tile
    jax.block_until_ready((y_small, y_default))

    for y in (y_small, y_default):
        assert y.shape == (1, C_OUT)
        assert bool(jnp.all(jnp.isfinite(y)))
        assert jnp.allclose(jnp.sum(y, axis=1), 1.0, atol=1e-5)
        assert jnp.allclose(y, y_ref, atol=2e-3, rtol=2e-3), (y, y_ref)

    print("KERNEL_OK")
</pallas_src>

<mosaic_0001>
module attributes {stable_mosaic.version = 11 : i64} {
  func.func @mil_pool_kernel(%arg0: i32, %arg1: i32, %arg2: memref<256x512xf32, #tpu.memory_space<vmem>>, %arg3: memref<512x128xbf16, #tpu.memory_space<vmem>>, %arg4: memref<1x128xf32, #tpu.memory_space<vmem>>, %arg5: memref<1x128xf32, #tpu.memory_space<vmem>>, %arg6: memref<1x1xf32, #tpu.memory_space<vmem>>, %arg7: memref<1x1x1xf32, #tpu.memory_space<vmem>>, %arg8: memref<1x1x1xf32, #tpu.memory_space<vmem>>, %arg9: memref<1x1x512xf32, #tpu.memory_space<vmem>>, %arg10: memref<1x1xf32, #tpu.memory_space<vmem>>, %arg11: memref<1x1xf32, #tpu.memory_space<vmem>>, %arg12: memref<1x512xf32, #tpu.memory_space<vmem>>) attributes {dimension_semantics = [#tpu.dimension_semantics<parallel>, #tpu.dimension_semantics<arbitrary>], iteration_bounds = array<i64: 2, 2>, scalar_prefetch = 0 : i64, scratch_operands = 3 : i64, tpu.core_type = #tpu.core_type<tc>, window_params = [{transform_indices = @transform_0, window_bounds = array<i64: 256, 512>}, {pipeline_mode = #tpu.pipeline_mode<synchronous>, transform_indices = @transform_1, window_bounds = array<i64: 512, 128>}, {pipeline_mode = #tpu.pipeline_mode<synchronous>, transform_indices = @transform_2, window_bounds = array<i64: 1, 128>}, {pipeline_mode = #tpu.pipeline_mode<synchronous>, transform_indices = @transform_3, window_bounds = array<i64: 1, 128>}, {pipeline_mode = #tpu.pipeline_mode<synchronous>, transform_indices = @transform_4, window_bounds = array<i64: 1, 1>}, {transform_indices = @transform_5, window_bounds = array<i64: 1, 1, 1>}, {transform_indices = @transform_6, window_bounds = array<i64: 1, 1, 1>}, {transform_indices = @transform_7, window_bounds = array<i64: 1, 1, 512>}]} {
    %c0_i32 = arith.constant 0 : i32
    %0 = arith.cmpi eq, %arg1, %c0_i32 : i32
    %1 = arith.extui %0 : i1 to i32
    %c0_i32_0 = arith.constant 0 : i32
    %2 = arith.cmpi ne, %1, %c0_i32_0 : i32
    scf.if %2 {
      %cst_32 = arith.constant -1.000000e+30 : f32
      %61 = vector.broadcast %cst_32 : f32 to vector<1x1xf32>
      %c0_33 = arith.constant 0 : index
      %c0_34 = arith.constant 0 : index
      %62 = vector.load %arg10[%c0_33, %c0_34] : memref<1x1xf32, #tpu.memory_space<vmem>>, vector<1x1xf32>
      tpu.vector_store %arg10[%c0_33, %c0_34], %61 {strides = array<i32>} : memref<1x1xf32, #tpu.memory_space<vmem>>, vector<1x1xf32>,
      %cst_35 = arith.constant 0.000000e+00 : f32
      %63 = vector.broadcast %cst_35 : f32 to vector<1x1xf32>
      %c0_36 = arith.constant 0 : index
      %c0_37 = arith.constant 0 : index
      %64 = vector.load %arg11[%c0_36, %c0_37] : memref<1x1xf32, #tpu.memory_space<vmem>>, vector<1x1xf32>
      tpu.vector_store %arg11[%c0_36, %c0_37], %63 {strides = array<i32>} : memref<1x1xf32, #tpu.memory_space<vmem>>, vector<1x1xf32>,
      %cst_38 = arith.constant 0.000000e+00 : f32
      %65 = vector.broadcast %cst_38 : f32 to vector<1x512xf32>
      %c0_39 = arith.constant 0 : index
      %c0_40 = arith.constant 0 : index
      %66 = vector.load %arg12[%c0_39, %c0_40] : memref<1x512xf32, #tpu.memory_space<vmem>>, vector<1x512xf32>
      tpu.vector_store %arg12[%c0_39, %c0_40], %65 {strides = array<i32>} : memref<1x512xf32, #tpu.memory_space<vmem>>, vector<1x512xf32>,
    } else {
    }
    %c0 = arith.constant 0 : index
    %c0_1 = arith.constant 0 : index
    %3 = vector.load %arg2[%c0, %c0_1] : memref<256x512xf32, #tpu.memory_space<vmem>>, vector<256x512xf32>
    %4 = arith.truncf %3 : vector<256x512xf32> to vector<256x512xbf16>
    %c0_2 = arith.constant 0 : index
    %c0_3 = arith.constant 0 : index
    %5 = vector.load %arg3[%c0_2, %c0_3] : memref<512x128xbf16, #tpu.memory_space<vmem>>, vector<512x128xbf16>
    %cst = arith.constant dense<0.000000e+00> : vector<256x128xf32>
    %6 = tpu.matmul %4, %5, %cst {dimension_numbers = #tpu.dot_dimension_numbers<[1], [0], [0], [1], [0, 0, 1, 1], [], []>} : vector<256x512xbf16>, vector<512x128xbf16>, vector<256x128xf32> -> vector<256x128xf32>
    %c0_4 = arith.constant 0 : index
    %c0_5 = arith.constant 0 : index
    %7 = vector.load %arg4[%c0_4, %c0_5] : memref<1x128xf32, #tpu.memory_space<vmem>>, vector<1x128xf32>
    %8 = vector.broadcast %7 : vector<1x128xf32> to vector<256x128xf32>
    %9 = arith.addf %6, %8 : vector<256x128xf32>
    %10 = math.tanh %9 : vector<256x128xf32>
    %c0_6 = arith.constant 0 : index
    %c0_7 = arith.constant 0 : index
    %11 = vector.load %arg5[%c0_6, %c0_7] : memref<1x128xf32, #tpu.memory_space<vmem>>, vector<1x128xf32>
    %12 = vector.broadcast %11 : vector<1x128xf32> to vector<256x128xf32>
    %13 = arith.mulf %10, %12 : vector<256x128xf32>
    %cst_8 = arith.constant dense<0.000000e+00> : vector<256xf32>
    %14 = vector.multi_reduction <add>, %13, %cst_8 [1] : vector<256x128xf32> to vector<256xf32>
    %15 = vector.shape_cast %14 : vector<256xf32> to vector<256x1xf32>
    %c0_9 = arith.constant 0 : index
    %c0_10 = arith.constant 0 : index
    %16 = vector.load %arg6[%c0_9, %c0_10] : memref<1x1xf32, #tpu.memory_space<vmem>>, vector<1x1xf32>
    %17 = vector.broadcast %16 : vector<1x1xf32> to vector<256x1xf32>
    %18 = arith.addf %15, %17 : vector<256x1xf32>
    %19 = tpu.iota {dimensions = array<i32: 0>} : vector<256x1xi32>
    %c2_i32 = arith.constant 2 : i32
    %20 = arith.muli %arg0, %c2_i32 : i32
    %21 = arith.addi %20, %arg1 : i32
    %c256_i32 = arith.constant 256 : i32
    %22 = arith.muli %21, %c256_i32 : i32
    %23 = vector.broadcast %22 : i32 to vector<256x1xi32>
    %24 = arith.addi %23, %19 : vector<256x1xi32>
    %c600_i32 = arith.constant 600 : i32
    %25 = vector.broadcast %c600_i32 : i32 to vector<256x1xi32>
    %26 = arith.cmpi slt, %24, %25 : vector<256x1xi32>
    %cst_11 = arith.constant -1.000000e+30 : f32
    %27 = vector.broadcast %cst_11 : f32 to vector<256x1xf32>
    %28 = arith.select %26, %18, %27 : vector<256x1xi1>, vector<256x1xf32>
    %cst_12 = arith.constant dense<0xFF800000> : vector<1xf32>
    %29 = vector.multi_reduction <maximumf>, %28, %cst_12 [0] : vector<256x1xf32> to vector<1xf32>
    %30 = vector.shape_cast %29 : vector<1xf32> to vector<1x1xf32>
    %c0_13 = arith.constant 0 : index
    %c0_14 = arith.constant 0 : index
    %31 = vector.load %arg10[%c0_13, %c0_14] : memref<1x1xf32, #tpu.memory_space<vmem>>, vector<1x1xf32>
    %32 = arith.maximumf %31, %30 : vector<1x1xf32>
    %c0_15 = arith.constant 0 : index
    %c0_16 = arith.constant 0 : index
    %33 = vector.load %arg10[%c0_15, %c0_16] : memref<1x1xf32, #tpu.memory_space<vmem>>, vector<1x1xf32>
    %34 = arith.subf %33, %32 : vector<1x1xf32>
    %35 = math.exp %34 : vector<1x1xf32>
    %36 = vector.broadcast %32 : vector<1x1xf32> to vector<256x1xf32>
    %37 = arith.subf %28, %36 : vector<256x1xf32>
    %38 = math.exp %37 : vector<256x1xf32>
    %c0_17 = arith.constant 0 : index
    %c0_18 = arith.constant 0 : index
    %39 = vector.load %arg11[%c0_17, %c0_18] : memref<1x1xf32, #tpu.memory_space<vmem>>, vector<1x1xf32>
    %40 = arith.mulf %35, %39 : vector<1x1xf32>
    %cst_19 = arith.constant dense<0.000000e+00> : vector<1xf32>
    %41 = vector.multi_reduction <add>, %38, %cst_19 [0] : vector<256x1xf32> to vector<1xf32>
    %42 = vector.shape_cast %41 : vector<1xf32> to vector<1x1xf32>
    %43 = arith.addf %40, %42 : vector<1x1xf32>
    %c0_20 = arith.constant 0 : index
    %c0_21 = arith.constant 0 : index
    %44 = vector.load %arg11[%c0_20, %c0_21] : memref<1x1xf32, #tpu.memory_space<vmem>>, vector<1x1xf32>
    tpu.vector_store %arg11[%c0_20, %c0_21], %43 {strides = array<i32>} : memref<1x1xf32, #tpu.memory_space<vmem>>, vector<1x1xf32>,
    %c0_22 = arith.constant 0 : index
    %c0_23 = arith.constant 0 : index
    %45 = vector.load %arg10[%c0_22, %c0_23] : memref<1x1xf32, #tpu.memory_space<vmem>>, vector<1x1xf32>
    tpu.vector_store %arg10[%c0_22, %c0_23], %32 {strides = array<i32>} : memref<1x1xf32, #tpu.memory_space<vmem>>, vector<1x1xf32>,
    %c2_i32_24 = arith.constant 2 : i32
    %46 = arith.minsi %21, %c2_i32_24 : i32
    %c256_i32_25 = arith.constant 256 : i32
    %47 = arith.muli %46, %c256_i32_25 : i32
    %c256_i32_26 = arith.constant 256 : i32
    %48 = arith.addi %47, %c256_i32_26 : i32
    %c600_i32_27 = arith.constant 600 : i32
    %49 = arith.cmpi sgt, %48, %c600_i32_27 : i32
    %c256_i32_28 = arith.constant 256 : i32
    %50 = arith.muli %46, %c256_i32_28 : i32
    %51 = vector.broadcast %50 : i32 to vector<256x1xi32>
    %52 = arith.addi %51, %19 : vector<256x1xi32>
    %true = arith.constant true
    %53 = arith.xori %49, %true : i1
    %54 = arith.extui %53 : i1 to i32
    %c0_i32_29 = arith.constant 0 : i32
    %55 = arith.cmpi ne, %54, %c0_i32_29 : i32
    scf.if %55 {
      %c0_32 = arith.constant 0 : index
      %c0_33 = arith.constant 0 : index
      %61 = vector.load %arg2[%c0_32, %c0_33] : memref<256x512xf32, #tpu.memory_space<vmem>>, vector<256x512xf32>
      %c0_34 = arith.constant 0 : index
      %c0_35 = arith.constant 0 : index
      %62 = vector.load %arg12[%c0_34, %c0_35] : memref<1x512xf32, #tpu.memory_space<vmem>>, vector<1x512xf32>
      %63 = vector.broadcast %35 : vector<1x1xf32> to vector<1x512xf32>
      %64 = arith.mulf %63, %62 : vector<1x512xf32>
      %cst_36 = arith.constant dense<0.000000e+00> : vector<1x512xf32>
      %65 = tpu.matmul %38, %61, %cst_36 {dimension_numbers = #tpu.dot_dimension_numbers<[0], [0], [1], [1], [0, 1, 1, 1], [], []>} : vector<256x1xf32>, vector<256x512xf32>, vector<1x512xf32> -> vector<1x512xf32>
      %66 = arith.addf %64, %65 : vector<1x512xf32>
      %c0_37 = arith.constant 0 : index
      %c0_38 = arith.constant 0 : index
      %67 = vector.load %arg12[%c0_37, %c0_38] : memref<1x512xf32, #tpu.memory_space<vmem>>, vector<1x512xf32>
      tpu.vector_store %arg12[%c0_37, %c0_38], %66 {strides = array<i32>} : memref<1x512xf32, #tpu.memory_space<vmem>>, vector<1x512xf32>,
    } else {
    }
    %56 = arith.extui %49 : i1 to i32
    %c0_i32_30 = arith.constant 0 : i32
    %57 = arith.cmpi ne, %56, %c0_i32_30 : i32
    scf.if %57 {
      %c600_i32_32 = arith.constant 600 : i32
      %61 = vector.broadcast %c600_i32_32 : i32 to vector<256x1xi32>
      %62 = arith.cmpi slt, %52, %61 : vector<256x1xi32>
      %c0_33 = arith.constant 0 : index
      %c0_34 = arith.constant 0 : index
      %63 = vector.load %arg2[%c0_33, %c0_34] : memref<256x512xf32, #tpu.memory_space<vmem>>, vector<256x512xf32>
      %cst_35 = arith.constant 0.000000e+00 : f32
      %64 = vector.shape_cast %62 : vector<256x1xi1> to vector<256x1xi1>
      %65 = vector.broadcast %64 : vector<256x1xi1> to vector<256x512xi1>
      %66 = vector.broadcast %cst_35 : f32 to vector<256x512xf32>
      %67 = arith.select %65, %63, %66 : vector<256x512xi1>, vector<256x512xf32>
      %c0_36 = arith.constant 0 : index
      %c0_37 = arith.constant 0 : index
      %68 = vector.load %arg12[%c0_36, %c0_37] : memref<1x512xf32, #tpu.memory_space<vmem>>, vector<1x512xf32>
      %69 = vector.broadcast %35 : vector<1x1xf32> to vector<1x512xf32>
      %70 = arith.mulf %69, %68 : vector<1x512xf32>
      %cst_38 = arith.constant dense<0.000000e+00> : vector<1x512xf32>
      %71 = tpu.matmul %38, %67, %cst_38 {dimension_numbers = #tpu.dot_dimension_numbers<[0], [0], [1], [1], [0, 1, 1, 1], [], []>} : vector<256x1xf32>, vector<256x512xf32>, vector<1x512xf32> -> vector<1x512xf32>
      %72 = arith.addf %70, %71 : vector<1x512xf32>
      %c0_39 = arith.constant 0 : index
      %c0_40 = arith.constant 0 : index
      %73 = vector.load %arg12[%c0_39, %c0_40] : memref<1x512xf32, #tpu.memory_space<vmem>>, vector<1x512xf32>
      tpu.vector_store %arg12[%c0_39, %c0_40], %72 {strides = array<i32>} : memref<1x512xf32, #tpu.memory_space<vmem>>, vector<1x512xf32>,
    } else {
    }
    %c1_i32 = arith.constant 1 : i32
    %58 = arith.cmpi eq, %arg1, %c1_i32 : i32
    %59 = arith.extui %58 : i1 to i32
    %c0_i32_31 = arith.constant 0 : i32
    %60 = arith.cmpi ne, %59, %c0_i32_31 : i32
    scf.if %60 {
      %c0_32 = arith.constant 0 : index
      %c0_33 = arith.constant 0 : index
      %61 = vector.load %arg10[%c0_32, %c0_33] : memref<1x1xf32, #tpu.memory_space<vmem>>, vector<1x1xf32>
      %62 = vector.shape_cast %61 : vector<1x1xf32> to vector<1x1x1xf32>
      %c0_34 = arith.constant 0 : index
      %c0_35 = arith.constant 0 : index
      %c0_36 = arith.constant 0 : index
      %63 = vector.load %arg7[%c0_34, %c0_35, %c0_36] : memref<1x1x1xf32, #tpu.memory_space<vmem>>, vector<1x1x1xf32>
      tpu.vector_store %arg7[%c0_34, %c0_35, %c0_36], %62 {strides = array<i32>} : memref<1x1x1xf32, #tpu.memory_space<vmem>>, vector<1x1x1xf32>,
      %c0_37 = arith.constant 0 : index
      %c0_38 = arith.constant 0 : index
      %64 = vector.load %arg11[%c0_37, %c0_38] : memref<1x1xf32, #tpu.memory_space<vmem>>, vector<1x1xf32>
      %65 = vector.shape_cast %64 : vector<1x1xf32> to vector<1x1x1xf32>
      %c0_39 = arith.constant 0 : index
      %c0_40 = arith.constant 0 : index
      %c0_41 = arith.constant 0 : index
      %66 = vector.load %arg8[%c0_39, %c0_40, %c0_41] : memref<1x1x1xf32, #tpu.memory_space<vmem>>, vector<1x1x1xf32>
      tpu.vector_store %arg8[%c0_39, %c0_40, %c0_41], %65 {strides = array<i32>} : memref<1x1x1xf32, #tpu.memory_space<vmem>>, vector<1x1x1xf32>,
      %c0_42 = arith.constant 0 : index
      %c0_43 = arith.constant 0 : index
      %67 = vector.load %arg12[%c0_42, %c0_43] : memref<1x512xf32, #tpu.memory_space<vmem>>, vector<1x512xf32>
      %68 = vector.shape_cast %67 : vector<1x512xf32> to vector<1x1x512xf32>
      %c0_44 = arith.constant 0 : index
      %c0_45 = arith.constant 0 : index
      %c0_46 = arith.constant 0 : index
      %69 = vector.load %arg9[%c0_44, %c0_45, %c0_46] : memref<1x1x512xf32, #tpu.memory_space<vmem>>, vector<1x1x512xf32>
      tpu.vector_store %arg9[%c0_44, %c0_45, %c0_46], %68 {strides = array<i32>} : memref<1x1x512xf32, #tpu.memory_space<vmem>>, vector<1x1x512xf32>,
    } else {
    }
    return
  }
  func.func @transform_0(%arg0: i32, %arg1: i32) -> (i32, i32) {
    %c2_i32 = arith.constant 2 : i32
    %0 = arith.muli %arg0, %c2_i32 : i32
    %1 = arith.addi %0, %arg1 : i32
    %c2_i32_0 = arith.constant 2 : i32
    %2 = arith.minsi %1, %c2_i32_0 : i32
    %c0_i32 = arith.constant 0 : i32
    %c0_i32_1 = arith.constant 0 : i32
    return %2, %c0_i32 : i32, i32
  }
  func.func @transform_1(%arg0: i32, %arg1: i32) -> (i32, i32) {
    %c0_i32 = arith.constant 0 : i32
    %c0_i32_0 = arith.constant 0 : i32
    %c0_i32_1 = arith.constant 0 : i32
    return %c0_i32, %c0_i32_0 : i32, i32
  }
  func.func @transform_2(%arg0: i32, %arg1: i32) -> (i32, i32) {
    %c0_i32 = arith.constant 0 : i32
    %c0_i32_0 = arith.constant 0 : i32
    %c0_i32_1 = arith.constant 0 : i32
    return %c0_i32, %c0_i32_0 : i32, i32
  }
  func.func @transform_3(%arg0: i32, %arg1: i32) -> (i32, i32) {
    %c0_i32 = arith.constant 0 : i32
    %c0_i32_0 = arith.constant 0 : i32
    %c0_i32_1 = arith.constant 0 : i32
    return %c0_i32, %c0_i32_0 : i32, i32
  }
  func.func @transform_4(%arg0: i32, %arg1: i32) -> (i32, i32) {
    %c0_i32 = arith.constant 0 : i32
    %c0_i32_0 = arith.constant 0 : i32
    %c0_i32_1 = arith.constant 0 : i32
    return %c0_i32, %c0_i32_0 : i32, i32
  }
  func.func @transform_5(%arg0: i32, %arg1: i32) -> (i32, i32, i32) {
    %c0_i32 = arith.constant 0 : i32
    %c0_i32_0 = arith.constant 0 : i32
    %c0_i32_1 = arith.constant 0 : i32
    return %arg0, %c0_i32, %c0_i32_0 : i32, i32, i32
  }
  func.func @transform_6(%arg0: i32, %arg1: i32) -> (i32, i32, i32) {
    %c0_i32 = arith.constant 0 : i32
    %c0_i32_0 = arith.constant 0 : i32
    %c0_i32_1 = arith.constant 0 : i32
    return %arg0, %c0_i32, %c0_i32_0 : i32, i32, i32
  }
  func.func @transform_7(%arg0: i32, %arg1: i32) -> (i32, i32, i32) {
    %c0_i32 = arith.constant 0 : i32
    %c0_i32_0 = arith.constant 0 : i32
    %c0_i32_1 = arith.constant 0 : i32
    return %arg0, %c0_i32, %c0_i32_0 : i32, i32, i32
  }
}

</mosaic_0001>

<bundles_post_ra>
// kernel: tpu_custom_call.1
= control target key start
LH: loop header
LB: loop body
LE: loop exit
PB: predicated region body
PF: predicated region fallthrough
CT: control target
= control target key end

     0   :  { %s6401_s0 = inlined_call_operand.hbm [shape: f32[600,512], index: 0, kind: input, shape index: {}]   ;;  %s6402_s1 = inlined_call_operand.hbm [shape: bf16[512,128], index: 1, kind: input, shape index: {}]   ;;  %s6403_s2 = inlined_call_operand.hbm [shape: f32[1,128], index: 2, kind: input, shape index: {}]   ;;  %s6404_s3 = inlined_call_operand.hbm [shape: f32[1,128], index: 3, kind: input, shape index: {}]   ;;  %s6405_s4 = inlined_call_operand.<no memory space> [shape: f32[1,1], index: 4, kind: input, shape index: {}]   ;;  %s6406_s5 = inlined_call_operand.vmem [shape: f32[2,1,1], index: 5, kind: output, shape index: {0}]   ;;  %s6407_s6 = inlined_call_operand.vmem [shape: f32[2,1,1], index: 6, kind: output, shape index: {1}]   ;;  %s6408_s7 = inlined_call_operand.hbm [shape: f32[2,1,512], index: 7, kind: output, shape index: {2}]  }
   0x1   :  { %6424 = sst [smem:[#allocation60_spill]] %s6407_s6  ;;  %v13_v0 = vstv %s6405_s4 }
   0x2   :  { %6425 = sst [smem:[#allocation61_spill]] %s6408_s7  ;;  %14 = vst [vmem:[#allocation5] sm:$0x1] %v13_v0 }
   0x3   :  { %15 = vsyncpa [#allocation7], 0 }
   0x4   :  { %17 = vsyncpa [#allocation7 + $0x1], 0 }
   0x5   :  { %18 = vsyncpa [#allocation10], 0 }
   0x6   :  { %19 = vsyncpa [#allocation13], 0 }
   0x7   :  { %20 = vsyncpa [#allocation8], 0 }
   0x8   :  { %22 = vsyncpa [#allocation8 + $0x1], 0  ;;  %s4392_s26 = smov 0   ;;  %s4394_s27 = smov 0  }
   0x9   :  { %s4396_s28 = smov 0   ;;  %s4398_s29 = smov 0  }
   0xa   :  { %s4400_s30 = smov 0   ;;  %s4402_s8 = smov 0  }
   0xb   :  { %s4404_s4 = smov 0   ;;  %s4406_s9 = smov 0  }
   0xc   :  { %s4408_s10 = smov 0   ;;  %s4410_s11 = smov 0  }
   0xd   :  { %s4412_s12 = smov 0  }
   0xe LB: > { %6426 = sst [smem:[#allocation19_spill]] %s4292_s26  ;;  %s2965_s13 = sadd.s32 4294967295, %s4332_s12   ;;  %s4332_s12 = sphi %s4412_s12, %s28_s12   ;;  %s4328_s11 = sphi %s4410_s11, %s6558_s11   ;;  %s4324_s10 = sphi %s4408_s10, %s6557_s10   ;;  %s4320_s9 = sphi %s4406_s9, %s6556_s9   ;;  %s4316_s4 = sphi %s4404_s4, %s6555_s4   ;;  %s4312_s8 = sphi %s4402_s8, %s6563_s8   ;;  %s4308_s30 = sphi %s4400_s30, %s6562_s30   ;;  %s4304_s29 = sphi %s4398_s29, %s6561_s29   ;;  %s4300_s28 = sphi %s4396_s28, %s6553_s28   ;;  %s4296_s27 = sphi %s4394_s27, %s6560_s27   ;;  %s4292_s26 = sphi %s4392_s26, %s6559_s26  }
   0xf   : > { %6427 = sst [smem:[#allocation20_spill]] %s4300_s28  ;;  %s37_s15 = sadd.s32 1, %s4324_s10 }
  0x10   : > { %6428 = sst [smem:[#allocation21_spill]] %s4316_s4  ;;  %s40_s16 = sadd.s32 1, %s4328_s11 }
  0x11   : > { %6429 = sst [smem:[#allocation22_spill]] %s4324_s10  ;;  %p38_p0 = scmp.ge.s32.totalorder %s37_s15, 2 }
  0x12   : > { %6430 = sst [smem:[#allocation23_spill]] %s4328_s11  ;;  %s2967_s17 = sshll.u32 %s4328_s11, 1 }
  0x13   : > { %s45_s18 = sadd.s32 %s4324_s10, %s2967_s17  ;;  %s55_s19 = sadd.s32 1, %s4312_s8 }
  0x14   : > { %s6565_s15 = smov (%p38_p0, %s37_s15), 0  ;;  %s6567_s16 = smov (!%p38_p0, %s40_s16), %s4328_s11 }
  0x15   : > { %6431 = sst [smem:[#allocation24_spill]] %s6565_s15  ;;  %p46_p1 = scmp.lt.s32.totalorder %s45_s18, 2 }
  0x16   : > { %p62_p2 = scmp.ne.s32.totalorder %s4312_s8, %s4308_s30  ;;  %p42_p3 = scmp.ge.s32.totalorder %s6567_s16, 2 }
  0x17   : > { %p63_p4 = scmp.eq.s32.totalorder %s4332_s12, 0  ;;  %s6569_s18 = smov (!%p46_p1, %s45_s18), 2 }
  0x18   : > { %s6571_s16 = smov (%p42_p3, %s6567_s16), 0  ;;  %p68_p6 = scmp.ne.s32.totalorder %s4308_s30, %s4304_s29 }
  0x19   : > { %6432 = sst [smem:[#allocation25_spill]] %s6571_s16  ;;  %p4464_p5 = por %p63_p4, %p62_p2 }
  0x1a   : > { %s2968_s21 = sshll.u32 %s6571_s16, 1  ;;  %p4473_p7 = scmp.eq.s32.totalorder %s2965_s13, 0 }
  0x1b   : > { %s49_s23 = sadd.s32 %s2968_s21, %s6565_s15  ;;  %s214_s24 = ssub.s32 %s4328_s11, %s6571_s16 }
  0x1c   : > { %s6434_s22 = scalar_select %p4473_p7, 1, 0 }
  0x1d   : > { %p50_p8 = scmp.lt.s32.totalorder %s49_s23, 2  ;;  %p4482_p9 = por %p4473_p7, %p68_p6 }
  0x1e   : > { %p215_p10 = scmp.eq.s32.totalorder %s214_s24, 0  ;;  %s217_s29 = sadd.s32 1, %s4300_s28 }
  0x1f   : > { %s6435_s25 = scalar_select %p4482_p9, 1, 0 }
  0x20   : > { %s6573_s23 = smov (!%p50_p8, %s49_s23), 2  ;;  %p227_p11 = scmp.ne.s32.totalorder %s4300_s28, %s4296_s27 }
  0x21   : > { %s4488_s17 = scalar_select %p215_p10, %s4300_s28, %s217_s29  }
  0x22   : > { %s52_s14 = ssub.s32 %s6569_s18, %s6573_s23  ;;  %p228_p13 = scmp.eq.s32.totalorder %s2965_s13, 3 }
  0x23   : > { %6436 = sst [smem:[#allocation26_spill]] %s4488_s17  ;;  %p53_p12 = scmp.eq.s32.totalorder %s52_s14, 0 }
  0x24   : > { %p233_p0 = scmp.ne.s32.totalorder %s4296_s27, %s4292_s26  ;;  %s6437_s21 = sadd.s32 4294967294, %s4332_s12  }
  0x25   : > { %p234_p1 = scmp.eq.s32.totalorder %s6437_s21, 3  ;;  %p4502_p2 = por %p228_p13, %p227_p11 }
  0x26   : > { %s4500_s16 = scalar_select %p53_p12, %s4312_s8, %s55_s19  }
  0x27   : > { %s6439_s15 = scalar_select %p4502_p2, 1, 0 }
  0x28   : > { %6438 = sst [smem:[#allocation27_spill]] %s4500_s16  ;;  %p4506_p3 = por %p234_p1, %p233_p0 }
  0x29   : > { %6440 = sst [smem:[#allocation28_spill]] %s6439_s15  ;;  %p2969_p4 = scmp.ge.s32.totalorder %s4332_s12, 1 }
  0x2a   : > { %s6441_s24 = scalar_select %p4506_p3, 1, 0 }
  0x2b   : > { %p241_p6 = scmp.lt.s32.totalorder %s4332_s12, 5  ;;  %s4334_s13 = smov [#allocation9]  }
  0x2c   : > { %6442 = sst [smem:[#allocation29_spill]] %s6441_s24  ;;  %s253_s14 = sshll.u32 %s4334_s13, 4  ;;  %s4516_s14 = int_to_ptr.vmem [resolvable:$true] %s253_s14 }
  0x2d   : > { %p4512_p8 = pnand %p2969_p4, %p241_p6  ;;  %s4335_s29 = smov [#allocation11]  }
  0x2e   : > { %s267_s21 = sshll.u32 %s4335_s29, 4  ;;  %s4336_s11 = smov [#allocation12]   ;;  %s4526_s21 = int_to_ptr.vmem [resolvable:$true] %s267_s21 }
  0x2f   : > { %p3728_p10 = pneg %p4512_p8  ;;  %s278_s10 = sshll.u32 %s4336_s11, 4  ;;  %s4528_s10 = int_to_ptr.vmem [resolvable:$true] %s278_s10 }
  0x30   : > { %s4090_s17 = scalar_lea.hbm %s6402_s1, 4096 }
  0x31   : > { %p4522_p11 = pnand %p3728_p10, %p4473_p7  ;;  %p4091_p12 = scmp.ne.s32.totalorder %s6402_s1, %s4090_s17 }
  0x32   : > { %p4097_p4 = scmp.lt.u32.totalorder %s4090_s17, %s6402_s1 }
  0x33   : > { %p4538_p13 = pneg %p4522_p11 }
  0x35   : > { %p4093_p0 = pnand %p4538_p13, %p4091_p12 }
  0x37   : > { %p4094_p1 = pneg %p4093_p0 }
  0x39   : > { %p4099_p6 = pnand %p4097_p4, %p4094_p1 }
  0x3b   : > { %4102 = shalt.err (!%p4099_p6)
}
  0x3c   : > { %s4103_s28 = scalar_lea.vmem %s4516_s14, 4096  ;;  %p4111_p7 = scmp.lt.s32.totalorder %s4516_s14, %s4516_s14 }
  0x3d   : > { %p4104_p10 = scmp.ne.s32.totalorder %s4516_s14, %s4103_s28  ;;  %p4112_p9 = scmp.lt.s32.totalorder %s4103_s28, %s4103_s28 }
  0x3f   : > { %p4106_p3 = pnand %p4104_p10, %p4538_p13  ;;  %p4113_p12 = por %p4112_p9, %p4111_p7 }
  0x41   : > { %p4107_p2 = pneg %p4106_p3 }
  0x43   : > { %p4114_p0 = pnand %p4113_p12, %p4107_p2 }
  0x45   : > { %4117 = shalt.err (!%p4114_p0)
}
  0x46   : > { %s4337_s16 = smov 64   ;;  %s4338_s17 = smov 4  }
  0x47   : > { %3731 = dma.hbm_to_vmem [thread:$0]  (!%p4522_p11), %s6402_s1, 4096, %s4516_s14, [#allocation10], %s4337_s16, %s4337_s16, %s4338_s17  }
  0x48   : > { %s4118_s7 = scalar_lea.hbm %s6403_s2, 16 }
  0x49   : > { %p4119_p7 = scmp.ne.s32.totalorder %s6403_s2, %s4118_s7  ;;  %p4125_p3 = scmp.lt.u32.totalorder %s4118_s7, %s6403_s2 }
  0x4b   : > { %p4121_p9 = pnand %p4119_p7, %p4538_p13 }
  0x4d   : > { %p4122_p2 = pneg %p4121_p9 }
  0x4f   : > { %p4127_p1 = pnand %p4125_p3, %p4122_p2 }
  0x51   : > { %4130 = shalt.err (!%p4127_p1)
}
  0x52   : > { %s4131_s14 = scalar_lea.vmem %s4526_s21, 16  ;;  %s4138_s4 = scalar_lea.vmem %s4526_s21, 32 }
  0x53   : > { %p4132_p4 = scmp.ne.s32.totalorder %s4526_s21, %s4131_s14  ;;  %p4139_p12 = scmp.lt.s32.totalorder %s4526_s21, %s4526_s21 }
  0x54   : > { %p4140_p0 = scmp.lt.s32.totalorder %s4138_s4, %s4131_s14 }
  0x55   : > { %p4134_p6 = pnand %p4132_p4, %p4538_p13 }
  0x56   : > { %p4141_p7 = por %p4140_p0, %p4139_p12 }
  0x57   : > { %p4135_p10 = pneg %p4134_p6 }
  0x59   : > { %p4142_p9 = pnand %p4141_p7, %p4135_p10 }
  0x5b   : > { %4145 = shalt.err (!%p4142_p9)
}
  0x5c   : > { %3734 = dma.hbm_to_vmem [thread:$0]  (!%p4522_p11), %s6403_s2, 16, %s4526_s21, [#allocation10]  }
  0x5d   : > { %s4146_s17 = scalar_lea.hbm %s6404_s3, 16 }
  0x5e   : > { %p4147_p2 = scmp.ne.s32.totalorder %s6404_s3, %s4146_s17  ;;  %p4153_p4 = scmp.lt.u32.totalorder %s4146_s17, %s6404_s3 }
  0x60   : > { %p4149_p3 = pnand %p4147_p2, %p4538_p13 }
  0x62   : > { %p4150_p1 = pneg %p4149_p3 }
  0x64   : > { %p4155_p6 = pnand %p4153_p4, %p4150_p1 }
  0x66   : > { %4158 = shalt.err (!%p4155_p6)
}
  0x67   : > { %s4159_s21 = scalar_lea.vmem %s4528_s10, 16  ;;  %s4166_s28 = scalar_lea.vmem %s4528_s10, 32 }
  0x68   : > { %p4160_p10 = scmp.ne.s32.totalorder %s4528_s10, %s4159_s21  ;;  %p4167_p7 = scmp.lt.s32.totalorder %s4528_s10, %s4528_s10 }
  0x69   : > { %p4168_p9 = scmp.lt.s32.totalorder %s4166_s28, %s4159_s21 }
  0x6a   : > { %p4162_p12 = pnand %p4160_p10, %p4538_p13 }
  0x6b   : > { %p4169_p2 = por %p4168_p9, %p4167_p7 }
  0x6c   : > { %p4163_p0 = pneg %p4162_p12 }
  0x6e   : > { %p4170_p3 = pnand %p4169_p2, %p4163_p0 }
  0x70   : > { %4173 = shalt.err (!%p4170_p3)
}
  0x71   : > { %3737 = dma.hbm_to_vmem [thread:$0]  (!%p4522_p11), %s6404_s3, 16, %s4528_s10, [#allocation13]  }
  0x72   : > { %p2973_p1 = scmp.ge.s32.totalorder %s4332_s12, 4 }
  0x74   : > { %288 = sbr.rel (%p2973_p1) target bundleno = 158 (0x9e), region = 32 }
  0x7b   : > { %291 = sbr.rel (!%p4464_p5) target bundleno = 158 (0x9e), region = 36  ;;  %s292_s26 = sand.u32 (%p4464_p5), 1, %s4312_s8  }
  0x7c   : > { %s2976_s6 = sshll.u32 (%p4464_p5), %s6569_s18, 5  ;;  %s2974_s7 = sshll.u32 (%p4464_p5), %s292_s26, 10 }
  0x7d   : > { %s302_s15 = ssub.s32 (%p4464_p5), 75, %s2976_s6  ;;  %s4615_s17 = scalar_lea.sflag (%p4464_p5), [#allocation7], %s292_s26 }
  0x7e   : > { %p303_p13 = scmp.lt.s32.totalorder (%p4464_p5), %s302_s15, 32  ;;  %s296_s10 = scalar_lea.vmem (%p4464_p5), [#allocation6], %s2974_s7 }
  0x82   : > { %s6575_s15 = smov (!%p303_p13, %s302_s15), 32 }
  0x83   : > { %s4612_s19 = sshll.u32 %s6575_s15, 9 }
  0x84   : > { %s308_s16 = ssub.s32 16384, %s4612_s19 }
  0x85   : > { %309 = vsyncadd %s4615_s17, %s308_s16  ;;  %p2979_p5 = scmp.ne.s32.totalorder %s4612_s19, 0  ;;  %s3167_s20 = sshll.u32 %s6569_s18, 14 }
  0x86   : > { %s4623_s11 = scalar_lea.hbm %s6401_s0, %s3167_s20  ;;  %s315_s29 = sshll.u32 %s296_s10, 4  ;;  %s4625_s29 = int_to_ptr.vmem [resolvable:$true] %s315_s29 }
  0x87   : > { %s4174_s21 = scalar_lea.hbm %s4623_s11, %s4612_s19  ;;  %s4178_s18 = scalar_lea.hbm %s6401_s0, 38400 }
  0x88   : > { %p4175_p11 = scmp.ne.s32.totalorder %s4623_s11, %s4174_s21  ;;  %p4179_p10 = scmp.lt.u32.totalorder %s4623_s11, %s6401_s0 }
  0x89   : > { %p4180_p12 = scmp.lt.u32.totalorder %s4178_s18, %s4174_s21  ;;  %p4182_p7 = scmp.lt.u32.totalorder %s4174_s21, %s4623_s11 }
  0x8a   : > { %p4176_p4 = pnand %p4175_p11, %p2979_p5 }
  0x8b   : > { %p4181_p0 = por %p4180_p12, %p4179_p10 }
  0x8c   : > { %p4177_p6 = pneg %p4176_p4 }
  0x8d   : > { %p4183_p9 = por %p4182_p7, %p4181_p0 }
  0x8f   : > { %p4184_p2 = pnand %p4183_p9, %p4177_p6 }
  0x91   : > { %4187 = shalt.err (!%p4184_p2)
}
  0x92   : > { %s4188_s6 = scalar_lea.vmem %s4625_s29, %s4612_s19  ;;  %s4339_s7 = smov [#allocation6]  }
  0x93   : > { %p4189_p3 = scmp.ne.s32.totalorder %s4625_s29, %s4188_s6  ;;  %s4192_s15 = sshll.u32 %s4339_s7, 4  ;;  %s4193_s15 = int_to_ptr.vmem [resolvable:$false] %s4192_s15 }
  0x94   : > { %s4194_s16 = scalar_lea.vmem %s4193_s15, 32768  ;;  %p4195_p11 = scmp.lt.s32.totalorder %s4625_s29, %s4193_s15 }
  0x95   : > { %p4190_p1 = pnand %p4189_p3, %p2979_p5  ;;  %p4196_p4 = scmp.lt.s32.totalorder %s4194_s16, %s4188_s6 }
  0x97   : > { %p4191_p13 = pneg %p4190_p1  ;;  %p4197_p10 = por %p4196_p4, %p4195_p11 }
  0x99   : > { %p4198_p12 = pnand %p4197_p10, %p4191_p13 }
  0x9b   : > { %4201 = shalt.err (!%p4198_p12)
}
  0x9c   : > { %s4340_s10 = smov 512   ;;  %s4341_s20 = smov 32  }
  0x9d   : > { %321 = dma.hbm_to_vmem [thread:$0]  (%p2979_p5), %s4623_s11, %s4612_s19, %s4625_s29, %s4615_s17, %s4340_s10, %s4340_s10, %s4341_s20  }
  0x9e PF: > { %327 = sbr.rel (%p4512_p8) target bundleno = 1593 (0x639), region = 40 }
  0xa5   : > { %s329_s24 = sand.u32 1, %s4308_s30   ;;  %p6446_p6 = scmp.ne.s32.totalorder %s6435_s25, 0 }
  0xa6   : > { %s2985_s13 = sshll.u32 %s329_s24, 10  ;;  %s330_s21 = scalar_lea.sflag [#allocation7], %s329_s24 }
  0xa7   : > { %s4655_s28 = scalar_lea.vmem [#allocation6], %s2985_s13 }
  0xa8   : > { %4275 = dma.done.wait (%p6446_p6), %s330_s21, 16384  }
  0xa9   : > { %4277 = vsyncadd (%p6446_p6), %s330_s21, 4294950912  ;;  %p6447_p0 = scmp.ne.s32.totalorder %s6434_s22, 0 }
  0xab   : > { %4279 = dma.done.wait (%p6447_p0), [#allocation10], 4112  }
  0xac   : > { %4281 = vsyncadd (%p6447_p0), [#allocation10], 4294963184 }
  0xad   : > { %4283 = dma.done.wait (%p6447_p0), [#allocation13], 16  }
  0xae   : > { %4285 = vsyncadd (%p6447_p0), [#allocation13], 4294967280  ;;  %s379_s23 = sand.u32 1, %s4296_s27   ;;  %p392_p8 = scmp.lt.s32.totalorder %s4320_s9, 1 }
  0xaf   : > { %s4673_s25 = sshll.u32 %s379_s23, 2  ;;  %s6448_s18 = sld [smem:[#allocation60_spill]] }
  0xb0   : > { %s4676_s19 = scalar_select %p392_p8, %s4320_s9, 1 }
  0xb1   : > { %s381_s26 = scalar_lea.vmem [#allocation14], %s4673_s25  ;;  %s6449_s6 = sld [smem:[#allocation21_spill]] }
  0xb2   : > { %s394_s29 = scalar_lea.vmem %s6406_s5, %s4676_s19 }
  0xb5   : > { %s397_s4 = scalar_lea.vmem %s6448_s18, %s4676_s19 }
  0xb7   : > { %p2990_p5 = scmp.ne.s32.totalorder %s6449_s6, 0 }
  0xb8   : > { %vm403_vm0 = vcmask (!%p2990_p5), 0   ;;  %v406_v1 = vlaneseq (!%p2990_p5)  ;;  %v4342_v2 = vmov (!%p2990_p5), -1e+30   ;;  %v4343_v3 = vmov (!%p2990_p5), 0.0  }
  0xb9   : > { %402 = sbr.rel (%p2990_p5) target bundleno = 192 (0xc0), region = 60  ;;  %404 = vst.msk [vmem:[#allocation2] sm:$0x1] (!%p2990_p5), %vm403_vm0, %v4342_v2  ;;  %405 = vst.msk [vmem:[#allocation3] sm:$0x1] (!%p2990_p5), %vm403_vm0, %v4343_v3 }
  0xba   : > { %vm408_vm1 = vcmp.lt.s32.totalorder (!%p2990_p5), %v406_v1, 512 }
  0xbb   : > { %410 = vst.msk [vmem:[#allocation4] sm:$0xf] (!%p2990_p5), %vm408_vm1, %v4343_v3 }
  0xc0 PF: > { %v3850_v4 = vld [vmem:[#allocation9 + $0x40] sm:$0xff]   ;;  %v3854_v8 = vld [vmem:[#allocation9 + $0x48] sm:$0xff]   ;;  %v3858_v12 = vld [vmem:[#allocation9 + $0x50] sm:$0xff]   ;;  %s6450_s7 = sld [smem:[#allocation21_spill]]  ;;  %s3026_s15 = sshll.u32 %s4320_s9, 1  ;;  %vm1495_vm4 = vcmask 7168  }
  0xc1   : > { %v3851_v5 = vld [vmem:[#allocation9 + $0xc0] sm:$0xff]   ;;  %3169 = vmatprep.subr.bf16.mxu0 %v3850_v4  ;;  %v3855_v9 = vld [vmem:[#allocation9 + $0xc8] sm:$0xff]   ;;  %v3859_v13 = vld [vmem:[#allocation9 + $0xd0] sm:$0xff]  }
  0xc2   : > { %v3852_v6 = vld [vmem:[#allocation9] sm:$0xff]   ;;  %3281 = vmatprep.subr.bf16.mxu1 %v3851_v5  ;;  %v3856_v10 = vld [vmem:[#allocation9 + $0x8] sm:$0xff]   ;;  %v3860_v14 = vld [vmem:[#allocation9 + $0x10] sm:$0xff]  }
  0xc3   : > { %v3853_v7 = vld [vmem:[#allocation9 + $0x80] sm:$0xff]   ;;  %3170 = vmatpush3.bf16.msra.mxu0 %v3852_v6  ;;  %v3857_v11 = vld [vmem:[#allocation9 + $0x88] sm:$0xff]   ;;  %v3861_v15 = vld [vmem:[#allocation9 + $0x90] sm:$0xff]  }
  0xc4   : > { %3282 = vmatpush3.bf16.msra.mxu1 %v3853_v7  ;;  %3171 = vmatprep.subr.bf16.mxu0 %v3854_v8  ;;  %v3862_v16 = vld [vmem:[#allocation9 + $0x58] sm:$0xff]   ;;  %v3866_v20 = vld [vmem:[#allocation9 + $0x60] sm:$0xff]   ;;  %v3870_v24 = vld [vmem:[#allocation9 + $0x68] sm:$0xff]  }
  0xc5   : > { %3283 = vmatprep.subr.bf16.mxu1 %v3855_v9  ;;  %v3863_v17 = vld [vmem:[#allocation9 + $0xd8] sm:$0xff]   ;;  %v3867_v21 = vld [vmem:[#allocation9 + $0xe0] sm:$0xff]   ;;  %v3871_v25 = vld [vmem:[#allocation9 + $0xe8] sm:$0xff]  }
  0xc6   : > { %v3864_v18 = vld [vmem:[#allocation9 + $0x18] sm:$0xff]   ;;  %v3868_v22 = vld [vmem:[#allocation9 + $0x20] sm:$0xff]   ;;  %v3872_v26 = vld [vmem:[#allocation9 + $0x28] sm:$0xff]   ;;  %s4837_s16 = sadd.s32 %s6450_s7, %s3026_s15 }
  0xc7   : > { %3172 = vmatpush3.bf16.msra.mxu0 %v3856_v10  ;;  %v3865_v19 = vld [vmem:[#allocation9 + $0x98] sm:$0xff]   ;;  %v3869_v23 = vld [vmem:[#allocation9 + $0xa0] sm:$0xff]   ;;  %v3873_v27 = vld [vmem:[#allocation9 + $0xa8] sm:$0xff]   ;;  %p1747_p7 = scmp.lt.s32.totalorder %s4837_s16, 2  ;;  %s3027_s24 = sshll.u32 %s4837_s16, 8 }
  0xc8   : > { %3284 = vmatpush3.bf16.msra.mxu1 %v3857_v11  ;;  %3173 = vmatprep.subr.bf16.mxu0 %v3858_v12  ;;  %v3874_v28 = vld [vmem:[#allocation9 + $0x70] sm:$0xff]   ;;  %v3878_v32 = vld [vmem:[#allocation9 + $0x78] sm:$0xff]   ;;  %v412_v36 = vld [vmem:[%s4655_s28 + $0x8] sm:$0xff] }
  0xc9   : > { %3285 = vmatprep.subr.bf16.mxu1 %v3859_v13  ;;  %v3875_v29 = vld [vmem:[#allocation9 + $0xf0] sm:$0xff]   ;;  %v3879_v33 = vld [vmem:[#allocation9 + $0xf8] sm:$0xff]   ;;  %v416_v37 = vld [vmem:[%s4655_s28 + $0x28] sm:$0xff]  ;;  %s4845_s10 = scalar_select %p1747_p7, %s4837_s16, 2 }
  0xca   : > { %v3876_v30 = vld [vmem:[#allocation9 + $0x30] sm:$0xff]   ;;  %v3880_v34 = vld [vmem:[#allocation9 + $0x38] sm:$0xff]   ;;  %v540_v39 = vpack.c.bf16 %v416_v37, %v412_v36  ;;  %v411_v41 = vld [vmem:[%s4655_s28] sm:$0xff] }
  0xcb   : > { %3174 = vmatpush3.bf16.msra.mxu0 %v3860_v14  ;;  %v3877_v31 = vld [vmem:[#allocation9 + $0xb0] sm:$0xff]   ;;  %v3881_v35 = vld [vmem:[#allocation9 + $0xb8] sm:$0xff]   ;;  %v415_v42 = vld [vmem:[%s4655_s28 + $0x20] sm:$0xff]  ;;  %s3028_s20 = sshll.u32 %s4845_s10, 8 }
  0xcc   : > { %3286 = vmatpush3.bf16.msra.mxu1 %v3861_v15  ;;  %3175 = vmatprep.subr.bf16.mxu0 %v3862_v16  ;;  %v414_v38 = vld [vmem:[%s4655_s28 + $0x18] sm:$0xff]  ;;  %v539_v44 = vpack.c.bf16 %v415_v42, %v411_v41  ;;  %v413_v45 = vld [vmem:[%s4655_s28 + $0x10] sm:$0xff]  ;;  %v420_v47 = vld [vmem:[%s4655_s28 + $0x48] sm:$0xff]  ;;  %s5526_s13 = sadd.s32 256, %s3028_s20 }
  0xcd   : > { %3287 = vmatprep.subr.bf16.mxu1 %v3863_v17  ;;  %v418_v40 = vld [vmem:[%s4655_s28 + $0x38] sm:$0xff]  ;;  %v417_v46 = vld [vmem:[%s4655_s28 + $0x30] sm:$0xff]  ;;  %898 = vmatprep.mubr.bf16.mxu0 %v540_v39  ;;  %v424_v49 = vld [vmem:[%s4655_s28 + $0x68] sm:$0xff]  ;;  %p3029_p9 = scmp.gt.s32.totalorder %s5526_s13, 600 }
  0xce   : > { %v542_v43 = vpack.c.bf16 %v418_v40, %v414_v38  ;;  %v541_v48 = vpack.c.bf16 %v417_v46, %v413_v45  ;;  %v422_v50 = vld [vmem:[%s4655_s28 + $0x58] sm:$0xff]  ;;  %v544_v52 = vpack.c.bf16 %v424_v49, %v420_v47  ;;  %v419_v54 = vld [vmem:[%s4655_s28 + $0x40] sm:$0xff]  ;;  %v421_v56 = vld [vmem:[%s4655_s28 + $0x50] sm:$0xff] }
  0xcf   : > { %3176 = vmatpush3.bf16.msra.mxu0 %v3864_v18  ;;  %v426_v51 = vld [vmem:[%s4655_s28 + $0x78] sm:$0xff]  ;;  %v423_v55 = vld [vmem:[%s4655_s28 + $0x60] sm:$0xff]  ;;  %v425_v57 = vld [vmem:[%s4655_s28 + $0x70] sm:$0xff] }
  0xd0   : > { %3288 = vmatpush3.bf16.msra.mxu1 %v3865_v19  ;;  %3177 = vmatprep.subr.bf16.mxu0 %v3866_v20  ;;  %v546_v53 = vpack.c.bf16 %v426_v51, %v422_v50  ;;  %v428_v58 = vld [vmem:[%s4655_s28 + $0x88] sm:$0xff]  ;;  %v430_v60 = vld [vmem:[%s4655_s28 + $0x98] sm:$0xff]  ;;  %v543_v62 = vpack.c.bf16 %v423_v55, %v419_v54  ;;  %v545_v63 = vpack.c.bf16 %v425_v57, %v421_v56  ;;  %v427_v2 = vld [vmem:[%s4655_s28 + $0x80] sm:$0xff] }
  0xd1   : > { %3289 = vmatprep.subr.bf16.mxu1 %v3867_v21  ;;  %1059 = vmatprep.mubr.bf16.mxu1 %v542_v43  ;;  %v432_v59 = vld [vmem:[%s4655_s28 + $0xa8] sm:$0xff]  ;;  %v434_v61 = vld [vmem:[%s4655_s28 + $0xb8] sm:$0xff]  ;;  %v431_v3 = vld [vmem:[%s4655_s28 + $0xa0] sm:$0xff] }
  0xd2   : > { %v548_v0 = vpack.c.bf16 %v432_v59, %v428_v58  ;;  %v550_v1 = vpack.c.bf16 %v434_v61, %v430_v60  ;;  %v429_v4 = vld [vmem:[%s4655_s28 + $0x90] sm:$0xff]  ;;  %v436_v6 = vld [vmem:[%s4655_s28 + $0xc8] sm:$0xff]  ;;  %v438_v8 = vld [vmem:[%s4655_s28 + $0xd8] sm:$0xff]  ;;  %v547_v10 = vpack.c.bf16 %v431_v3, %v427_v2 }
  0xd3   : > { %3178 = vmatpush3.bf16.msra.mxu0 %v3868_v22  ;;  %v433_v5 = vld [vmem:[%s4655_s28 + $0xb0] sm:$0xff]  ;;  %v440_v7 = vld [vmem:[%s4655_s28 + $0xe8] sm:$0xff]  ;;  %v442_v9 = vld [vmem:[%s4655_s28 + $0xf8] sm:$0xff] }
  0xd4   : > { %3290 = vmatpush3.bf16.msra.mxu1 %v3869_v23  ;;  %3179 = vmatprep.subr.bf16.mxu0 %v3870_v24  ;;  %v549_v11 = vpack.c.bf16 %v433_v5, %v429_v4  ;;  %v552_v12 = vpack.c.bf16 %v440_v7, %v436_v6  ;;  %v554_v13 = vpack.c.bf16 %v442_v9, %v438_v8  ;;  %v435_v14 = vld [vmem:[%s4655_s28 + $0xc0] sm:$0xff]  ;;  %v437_v16 = vld [vmem:[%s4655_s28 + $0xd0] sm:$0xff]  ;;  %v444_v18 = vld [vmem:[%s4655_s28 + $0x108] sm:$0xff] }
  0xd5   : > { %3291 = vmatprep.subr.bf16.mxu1 %v3871_v25  ;;  %v439_v15 = vld [vmem:[%s4655_s28 + $0xe0] sm:$0xff]  ;;  %v441_v17 = vld [vmem:[%s4655_s28 + $0xf0] sm:$0xff]  ;;  %v448_v19 = vld [vmem:[%s4655_s28 + $0x128] sm:$0xff] }
  0xd6   : > { %v446_v20 = vld [vmem:[%s4655_s28 + $0x118] sm:$0xff]  ;;  %v551_v22 = vpack.c.bf16 %v439_v15, %v435_v14  ;;  %v553_v23 = vpack.c.bf16 %v441_v17, %v437_v16  ;;  %v556_v24 = vpack.c.bf16 %v448_v19, %v444_v18  ;;  %v451_v38 = vld [vmem:[%s4655_s28 + $0x140] sm:$0xff]  ;;  %v453_v40 = vld [vmem:[%s4655_s28 + $0x150] sm:$0xff] }
  0xd7   : > { %3180 = vmatpush3.bf16.msra.mxu0 %v3872_v26  ;;  %v450_v21 = vld [vmem:[%s4655_s28 + $0x138] sm:$0xff]  ;;  %v443_v26 = vld [vmem:[%s4655_s28 + $0x100] sm:$0xff]  ;;  %v457_v41 = vld [vmem:[%s4655_s28 + $0x170] sm:$0xff] }
  0xd8   : > { %3292 = vmatpush3.bf16.msra.mxu1 %v3873_v27  ;;  %3181 = vmatprep.subr.bf16.mxu0 %v3874_v28  ;;  %v558_v25 = vpack.c.bf16 %v450_v21, %v446_v20  ;;  %v447_v27 = vld [vmem:[%s4655_s28 + $0x120] sm:$0xff]  ;;  %v445_v28 = vld [vmem:[%s4655_s28 + $0x110] sm:$0xff]  ;;  %v460_v42 = vld [vmem:[%s4655_s28 + $0x188] sm:$0xff]  ;;  %v561_v47 = vpack.c.bf16 %v457_v41, %v453_v40 }
  0xd9   : > { %3293 = vmatprep.subr.bf16.mxu1 %v3875_v29  ;;  %v449_v29 = vld [vmem:[%s4655_s28 + $0x130] sm:$0xff]  ;;  %v455_v39 = vld [vmem:[%s4655_s28 + $0x160] sm:$0xff]  ;;  %v464_v43 = vld [vmem:[%s4655_s28 + $0x1a8] sm:$0xff] }
  0xda   : > { %v466_v45 = vld [vmem:[%s4655_s28 + $0x1b8] sm:$0xff]  ;;  %v559_v46 = vpack.c.bf16 %v455_v39, %v451_v38  ;;  %v459_v50 = vld [vmem:[%s4655_s28 + $0x180] sm:$0xff]  ;;  %v468_v54 = vld [vmem:[%s4655_s28 + $0x1c8] sm:$0xff] }
  0xdb   : > { %3182 = vmatpush3.bf16.msra.mxu0 %v3876_v30  ;;  %v452_v30 = vld [vmem:[%s4655_s28 + $0x148] sm:$0xff]  ;;  %v463_v51 = vld [vmem:[%s4655_s28 + $0x1a0] sm:$0xff]  ;;  %v470_v56 = vld [vmem:[%s4655_s28 + $0x1d8] sm:$0xff] }
  0xdc   : > { %3294 = vmatpush3.bf16.msra.mxu1 %v3877_v31  ;;  %3183 = vmatprep.subr.bf16.mxu0 %v3878_v32  ;;  %v456_v31 = vld [vmem:[%s4655_s28 + $0x168] sm:$0xff]  ;;  %v454_v32 = vld [vmem:[%s4655_s28 + $0x158] sm:$0xff]  ;;  %v563_v58 = vpack.c.bf16 %v463_v51, %v459_v50 }
  0xdd   : > { %3295 = vmatprep.subr.bf16.mxu1 %v3879_v33  ;;  %v458_v33 = vld [vmem:[%s4655_s28 + $0x178] sm:$0xff]  ;;  %v560_v36 = vpack.c.bf16 %v456_v31, %v452_v30  ;;  %v472_v55 = vld [vmem:[%s4655_s28 + $0x1e8] sm:$0xff] }
  0xde   : > { %v562_v37 = vpack.c.bf16 %v458_v33, %v454_v32  ;;  %v474_v57 = vld [vmem:[%s4655_s28 + $0x1f8] sm:$0xff]  ;;  %v568_v60 = vpack.c.bf16 %v472_v55, %v468_v54  ;;  %v476_v2 = vld [vmem:[%s4655_s28 + $0x208] sm:$0xff] }
  0xdf   : > { %3184 = vmatpush3.bf16.msra.mxu0 %v3880_v34  ;;  %v555_v34 = vpack.c.bf16 %v447_v27, %v443_v26  ;;  %v570_v61 = vpack.c.bf16 %v474_v57, %v470_v56  ;;  %v480_v3 = vld [vmem:[%s4655_s28 + $0x228] sm:$0xff]  ;;  %v478_v4 = vld [vmem:[%s4655_s28 + $0x218] sm:$0xff] }
  0xe0   : > { %3296 = vmatpush3.bf16.msra.mxu1 %v3881_v35  ;;  %v557_v35 = vpack.c.bf16 %v449_v29, %v445_v28  ;;  %v482_v5 = vld [vmem:[%s4655_s28 + $0x238] sm:$0xff]  ;;  %v572_v8 = vpack.c.bf16 %v480_v3, %v476_v2  ;;  %v484_v14 = vld [vmem:[%s4655_s28 + $0x248] sm:$0xff] }
  0xe1   : > { %v574_v9 = vpack.c.bf16 %v482_v5, %v478_v4  ;;  %v488_v15 = vld [vmem:[%s4655_s28 + $0x268] sm:$0xff]  ;;  %v486_v16 = vld [vmem:[%s4655_s28 + $0x258] sm:$0xff] }
  0xe2   : > { %899 = vmatmul.mubr.bf16.vlgmr.msra.gmra.mrb[0].mxu0 %v539_v44  ;;  %v462_v44 = vld [vmem:[%s4655_s28 + $0x198] sm:$0xff]  ;;  %v576_v20 = vpack.c.bf16 %v488_v15, %v484_v14  ;;  %v492_v26 = vld [vmem:[%s4655_s28 + $0x288] sm:$0xff] }
  0xe3   : > { %1060 = vmatmul.mubr.bf16.vlgmr.msra.gmra.mrb[0].mxu1 %v541_v48  ;;  %906 = vmatprep.mubr.bf16.mxu0 %v544_v52  ;;  %v564_v48 = vpack.c.bf16 %v464_v43, %v460_v42  ;;  %v566_v49 = vpack.c.bf16 %v466_v45, %v462_v44  ;;  %v461_v52 = vld [vmem:[%s4655_s28 + $0x190] sm:$0xff]  ;;  %v490_v17 = vld [vmem:[%s4655_s28 + $0x278] sm:$0xff]  ;;  %v496_v27 = vld [vmem:[%s4655_s28 + $0x2a8] sm:$0xff] }
  0xe4   : > { %1067 = vmatprep.mubr.bf16.mxu1 %v546_v53  ;;  %v465_v53 = vld [vmem:[%s4655_s28 + $0x1b0] sm:$0xff]  ;;  %v578_v21 = vpack.c.bf16 %v490_v17, %v486_v16  ;;  %v494_v28 = vld [vmem:[%s4655_s28 + $0x298] sm:$0xff]  ;;  %v580_v32 = vpack.c.bf16 %v496_v27, %v492_v26  ;;  %v500_v38 = vld [vmem:[%s4655_s28 + $0x2c8] sm:$0xff] }
  0xe5   : > { %v565_v59 = vpack.c.bf16 %v465_v53, %v461_v52  ;;  %v498_v29 = vld [vmem:[%s4655_s28 + $0x2b8] sm:$0xff]  ;;  %v504_v39 = vld [vmem:[%s4655_s28 + $0x2e8] sm:$0xff] }
  0xe6   : > { %v582_v33 = vpack.c.bf16 %v498_v29, %v494_v28  ;;  %v502_v40 = vld [vmem:[%s4655_s28 + $0x2d8] sm:$0xff]  ;;  %v584_v44 = vpack.c.bf16 %v504_v39, %v500_v38  ;;  %v508_v50 = vld [vmem:[%s4655_s28 + $0x308] sm:$0xff]  ;;  %v4816_v38 = vld [vmem:[#allocation11] ss:$0 sm:$0xff] }
  0xe7   : > { %v506_v41 = vld [vmem:[%s4655_s28 + $0x2f8] sm:$0xff]  ;;  %v512_v51 = vld [vmem:[%s4655_s28 + $0x328] sm:$0xff] }
  0xe8   : > { %v586_v45 = vpack.c.bf16 %v506_v41, %v502_v40  ;;  %v510_v52 = vld [vmem:[%s4655_s28 + $0x318] sm:$0xff]  ;;  %v588_v56 = vpack.c.bf16 %v512_v51, %v508_v50 }
  0xe9   : > { %v514_v53 = vld [vmem:[%s4655_s28 + $0x338] sm:$0xff] }
  0xea   : > { %907 = vmatmul.mubr.bf16.gmra.mrb[4].mxu0 %v543_v62  ;;  %v467_v62 = vld [vmem:[%s4655_s28 + $0x1c0] sm:$0xff]  ;;  %v590_v57 = vpack.c.bf16 %v514_v53, %v510_v52 }
  0xeb   : > { %1068 = vmatmul.mubr.bf16.gmra.mrb[4].mxu1 %v545_v63  ;;  %914 = vmatprep.mubr.bf16.mxu0 %v548_v0  ;;  %v471_v63 = vld [vmem:[%s4655_s28 + $0x1e0] sm:$0xff]  ;;  %v469_v0 = vld [vmem:[%s4655_s28 + $0x1d0] sm:$0xff] }
  0xec   : > { %1075 = vmatprep.mubr.bf16.mxu1 %v550_v1  ;;  %v473_v1 = vld [vmem:[%s4655_s28 + $0x1f0] sm:$0xff]  ;;  %v567_v6 = vpack.c.bf16 %v471_v63, %v467_v62  ;;  %v516_v62 = vld [vmem:[%s4655_s28 + $0x348] sm:$0xff] }
  0xed   : > { %v569_v7 = vpack.c.bf16 %v473_v1, %v469_v0  ;;  %v520_v63 = vld [vmem:[%s4655_s28 + $0x368] sm:$0xff]  ;;  %v518_v0 = vld [vmem:[%s4655_s28 + $0x358] sm:$0xff] }
  0xee   : > { %v522_v1 = vld [vmem:[%s4655_s28 + $0x378] sm:$0xff]  ;;  %v592_v4 = vpack.c.bf16 %v520_v63, %v516_v62 }
  0xef   : > { %v594_v5 = vpack.c.bf16 %v522_v1, %v518_v0 }
  0xf2   : > { %915 = vmatmul.mubr.bf16.gmra.mrb[8].mxu0 %v547_v10  ;;  %v475_v10 = vld [vmem:[%s4655_s28 + $0x200] sm:$0xff] }
  0xf3   : > { %1076 = vmatmul.mubr.bf16.gmra.mrb[8].mxu1 %v549_v11  ;;  %922 = vmatprep.mubr.bf16.mxu0 %v552_v12  ;;  %v479_v11 = vld [vmem:[%s4655_s28 + $0x220] sm:$0xff]  ;;  %v477_v12 = vld [vmem:[%s4655_s28 + $0x210] sm:$0xff] }
  0xf4   : > { %1083 = vmatprep.mubr.bf16.mxu1 %v554_v13  ;;  %v481_v13 = vld [vmem:[%s4655_s28 + $0x230] sm:$0xff]  ;;  %v571_v18 = vpack.c.bf16 %v479_v11, %v475_v10  ;;  %v524_v10 = vld [vmem:[%s4655_s28 + $0x388] sm:$0xff] }
  0xf5   : > { %v573_v19 = vpack.c.bf16 %v481_v13, %v477_v12  ;;  %v528_v11 = vld [vmem:[%s4655_s28 + $0x3a8] sm:$0xff]  ;;  %v526_v12 = vld [vmem:[%s4655_s28 + $0x398] sm:$0xff] }
  0xf6   : > { %v530_v13 = vld [vmem:[%s4655_s28 + $0x3b8] sm:$0xff]  ;;  %v596_v16 = vpack.c.bf16 %v528_v11, %v524_v10 }
  0xf7   : > { %v598_v17 = vpack.c.bf16 %v530_v13, %v526_v12 }
  0xfa   : > { %923 = vmatmul.mubr.bf16.gmra.mrb[12].mxu0 %v551_v22  ;;  %v483_v22 = vld [vmem:[%s4655_s28 + $0x240] sm:$0xff] }
  0xfb   : > { %1084 = vmatmul.mubr.bf16.gmra.mrb[12].mxu1 %v553_v23  ;;  %930 = vmatprep.mubr.bf16.mxu0 %v556_v24  ;;  %v487_v23 = vld [vmem:[%s4655_s28 + $0x260] sm:$0xff]  ;;  %v485_v24 = vld [vmem:[%s4655_s28 + $0x250] sm:$0xff] }
  0xfc   : > { %1091 = vmatprep.mubr.bf16.mxu1 %v558_v25  ;;  %v489_v25 = vld [vmem:[%s4655_s28 + $0x270] sm:$0xff]  ;;  %v575_v30 = vpack.c.bf16 %v487_v23, %v483_v22  ;;  %v532_v22 = vld [vmem:[%s4655_s28 + $0x3c8] sm:$0xff] }
  0xfd   : > { %v577_v31 = vpack.c.bf16 %v489_v25, %v485_v24  ;;  %v536_v23 = vld [vmem:[%s4655_s28 + $0x3e8] sm:$0xff]  ;;  %v534_v24 = vld [vmem:[%s4655_s28 + $0x3d8] sm:$0xff] }
  0xfe   : > { %v538_v25 = vld [vmem:[%s4655_s28 + $0x3f8] sm:$0xff]  ;;  %v600_v28 = vpack.c.bf16 %v536_v23, %v532_v22 }
  0xff   : > { %v602_v29 = vpack.c.bf16 %v538_v25, %v534_v24 }
 0x102   : > { %931 = vmatmul.mubr.bf16.gmra.mrb[16].mxu0 %v555_v34  ;;  %v491_v34 = vld [vmem:[%s4655_s28 + $0x280] sm:$0xff] }
 0x103   : > { %1092 = vmatmul.mubr.bf16.gmra.mrb[16].mxu1 %v557_v35  ;;  %938 = vmatprep.mubr.bf16.mxu0 %v560_v36  ;;  %v495_v35 = vld [vmem:[%s4655_s28 + $0x2a0] sm:$0xff]  ;;  %v493_v36 = vld [vmem:[%s4655_s28 + $0x290] sm:$0xff] }
 0x104   : > { %1099 = vmatprep.mubr.bf16.mxu1 %v562_v37  ;;  %v497_v37 = vld [vmem:[%s4655_s28 + $0x2b0] sm:$0xff]  ;;  %v579_v42 = vpack.c.bf16 %v495_v35, %v491_v34 }
 0x105   : > { %v581_v43 = vpack.c.bf16 %v497_v37, %v493_v36 }
 0x10a   : > { %939 = vmatmul.mubr.bf16.gmra.mrb[20].mxu0 %v559_v46  ;;  %v499_v46 = vld [vmem:[%s4655_s28 + $0x2c0] sm:$0xff] }
 0x10b   : > { %1100 = vmatmul.mubr.bf16.gmra.mrb[20].mxu1 %v561_v47  ;;  %946 = vmatprep.mubr.bf16.mxu0 %v564_v48  ;;  %v503_v47 = vld [vmem:[%s4655_s28 + $0x2e0] sm:$0xff]  ;;  %v501_v48 = vld [vmem:[%s4655_s28 + $0x2d0] sm:$0xff] }
 0x10c   : > { %1107 = vmatprep.mubr.bf16.mxu1 %v566_v49  ;;  %v505_v49 = vld [vmem:[%s4655_s28 + $0x2f0] sm:$0xff]  ;;  %v583_v54 = vpack.c.bf16 %v503_v47, %v499_v46 }
 0x10d   : > { %v585_v55 = vpack.c.bf16 %v505_v49, %v501_v48 }
 0x112   : > { %947 = vmatmul.mubr.bf16.gmra.mrb[24].mxu0 %v563_v58  ;;  %v507_v58 = vld [vmem:[%s4655_s28 + $0x300] sm:$0xff] }
 0x113   : > { %1108 = vmatmul.mubr.bf16.gmra.mrb[24].mxu1 %v565_v59  ;;  %954 = vmatprep.mubr.bf16.mxu0 %v568_v60  ;;  %v511_v59 = vld [vmem:[%s4655_s28 + $0x320] sm:$0xff]  ;;  %v509_v60 = vld [vmem:[%s4655_s28 + $0x310] sm:$0xff] }
 0x114   : > { %1115 = vmatprep.mubr.bf16.mxu1 %v570_v61  ;;  %v513_v61 = vld [vmem:[%s4655_s28 + $0x330] sm:$0xff]  ;;  %v587_v2 = vpack.c.bf16 %v511_v59, %v507_v58 }
 0x115   : > { %v589_v3 = vpack.c.bf16 %v513_v61, %v509_v60 }
 0x11a   : > { %955 = vmatmul.mubr.bf16.gmra.mrb[28].mxu0 %v567_v6  ;;  %v515_v6 = vld [vmem:[%s4655_s28 + $0x340] sm:$0xff] }
 0x11b   : > { %1116 = vmatmul.mubr.bf16.gmra.mrb[28].mxu1 %v569_v7  ;;  %962 = vmatprep.mubr.bf16.mxu0 %v572_v8  ;;  %v519_v7 = vld [vmem:[%s4655_s28 + $0x360] sm:$0xff]  ;;  %v517_v8 = vld [vmem:[%s4655_s28 + $0x350] sm:$0xff] }
 0x11c   : > { %1123 = vmatprep.mubr.bf16.mxu1 %v574_v9  ;;  %v521_v9 = vld [vmem:[%s4655_s28 + $0x370] sm:$0xff]  ;;  %v591_v14 = vpack.c.bf16 %v519_v7, %v515_v6  ;;  %v4822_v6 = vld [vmem:[#allocation12] ss:$0 sm:$0xff] }
 0x11d   : > { %v593_v15 = vpack.c.bf16 %v521_v9, %v517_v8 }
 0x122   : > { %963 = vmatmul.mubr.bf16.gmra.mrb[32].mxu0 %v571_v18  ;;  %v523_v18 = vld [vmem:[%s4655_s28 + $0x380] sm:$0xff] }
 0x123   : > { %1124 = vmatmul.mubr.bf16.gmra.mrb[32].mxu1 %v573_v19  ;;  %970 = vmatprep.mubr.bf16.mxu0 %v576_v20  ;;  %v527_v19 = vld [vmem:[%s4655_s28 + $0x3a0] sm:$0xff]  ;;  %v525_v20 = vld [vmem:[%s4655_s28 + $0x390] sm:$0xff] }
 0x124   : > { %1131 = vmatprep.mubr.bf16.mxu1 %v578_v21  ;;  %v529_v21 = vld [vmem:[%s4655_s28 + $0x3b0] sm:$0xff]  ;;  %v595_v26 = vpack.c.bf16 %v527_v19, %v523_v18 }
 0x125   : > { %v597_v27 = vpack.c.bf16 %v529_v21, %v525_v20 }
 0x12a   : > { %971 = vmatmul.mubr.bf16.gmra.mrb[36].mxu0 %v575_v30  ;;  %v531_v30 = vld [vmem:[%s4655_s28 + $0x3c0] sm:$0xff] }
 0x12b   : > { %1132 = vmatmul.mubr.bf16.gmra.mrb[36].mxu1 %v577_v31  ;;  %978 = vmatprep.mubr.bf16.mxu0 %v580_v32  ;;  %v535_v31 = vld [vmem:[%s4655_s28 + $0x3e0] sm:$0xff]  ;;  %v533_v32 = vld [vmem:[%s4655_s28 + $0x3d0] sm:$0xff] }
 0x12c   : > { %1139 = vmatprep.mubr.bf16.mxu1 %v582_v33  ;;  %v537_v33 = vld [vmem:[%s4655_s28 + $0x3f0] sm:$0xff]  ;;  %v599_v34 = vpack.c.bf16 %v535_v31, %v531_v30 }
 0x12d   : > { %v601_v35 = vpack.c.bf16 %v537_v33, %v533_v32 }
 0x132   : > { %979 = vmatmul.mubr.bf16.gmra.mrb[40].mxu0 %v579_v42 }
 0x133   : > { %1140 = vmatmul.mubr.bf16.gmra.mrb[40].mxu1 %v581_v43  ;;  %986 = vmatprep.mubr.bf16.mxu0 %v584_v44 }
 0x134   : > { %1147 = vmatprep.mubr.bf16.mxu1 %v586_v45 }
 0x13a   : > { %987 = vmatmul.mubr.bf16.gmra.mrb[44].mxu0 %v583_v54 }
 0x13b   : > { %1148 = vmatmul.mubr.bf16.gmra.mrb[44].mxu1 %v585_v55  ;;  %994 = vmatprep.mubr.bf16.mxu0 %v588_v56 }
 0x13c   : > { %1155 = vmatprep.mubr.bf16.mxu1 %v590_v57 }
 0x142   : > { %995 = vmatmul.mubr.bf16.gmra.mrb[48].mxu0 %v587_v2 }
 0x143   : > { %1156 = vmatmul.mubr.bf16.gmra.mrb[48].mxu1 %v589_v3  ;;  %1002 = vmatprep.mubr.bf16.mxu0 %v592_v4 }
 0x144   : > { %1163 = vmatprep.mubr.bf16.mxu1 %v594_v5 }
 0x14a   : > { %1003 = vmatmul.mubr.bf16.gmra.mrb[52].mxu0 %v591_v14 }
 0x14b   : > { %1164 = vmatmul.mubr.bf16.gmra.mrb[52].mxu1 %v593_v15  ;;  %1010 = vmatprep.mubr.bf16.mxu0 %v596_v16 }
 0x14c   : > { %1171 = vmatprep.mubr.bf16.mxu1 %v598_v17 }
 0x152   : > { %1011 = vmatmul.mubr.bf16.gmra.mrb[56].mxu0 %v595_v26 }
 0x153   : > { %1172 = vmatmul.mubr.bf16.gmra.mrb[56].mxu1 %v597_v27  ;;  %1018 = vmatprep.mubr.bf16.mxu0 %v600_v28 }
 0x154   : > { %1179 = vmatprep.mubr.bf16.mxu1 %v602_v29 }
 0x15a   : > { %1019 = vmatmul.mubr.bf16.gmra.mrb[60].mxu0 %v599_v34 }
 0x15b   : > { %1180 = vmatmul.mubr.bf16.gmra.mrb[60].mxu1 %v601_v35 }
 0x1b5   : > { %v3185_v36 = vpop.f32.mrb[0].mxu0 }
 0x1b6   : > { %v3297_v37 = vpop.f32.mrb[0].mxu1  ;;  %v3186_v39 = vpop.f32.mrb[1].mxu0 }
 0x1b7   : > { %v3187_v40 = vadd.f32 %v3186_v39, %v3185_v36  ;;  %v3298_v41 = vpop.f32.mrb[1].mxu1  ;;  %v3188_v42 = vpop.f32.mrb[2].mxu0 }
 0x1b8   : > { %v3299_v43 = vadd.f32 %v3298_v41, %v3297_v37  ;;  %v3300_v44 = vpop.f32.mrb[2].mxu1  ;;  %v3189_v45 = vpop.f32.mrb[3].mxu0 }
 0x1b9   : > { %v901_v46 = vadd.f32 %v3187_v40, %v4816_v38  ;;  %v3190_v47 = vadd.f32 %v3189_v45, %v3188_v42  ;;  %v3301_v48 = vpop.f32.mrb[3].mxu1 }
 0x1ba   : > { %v3302_v49 = vadd.f32 %v3301_v48, %v3300_v44 }
 0x1bb   : > { %v1062_v50 = vadd.f32 %v3299_v43, %v901_v46  ;;  %v904_v51 = vadd.f32 %v3190_v47, %v4816_v38 }
 0x1bd   : > { %3882 = vtanh.f32 %v1062_v50  ;;  %v1065_v52 = vadd.f32 %v3302_v49, %v904_v51  ;;  %v3191_v53 = vpop.f32.mrb[4].mxu0 }
 0x1be   : > { %v3303_v54 = vpop.f32.mrb[4].mxu1  ;;  %v3192_v55 = vpop.f32.mrb[5].mxu0 }
 0x1bf   : > { %3884 = vtanh.f32 %v1065_v52  ;;  %v3193_v56 = vadd.f32 %v3192_v55, %v3191_v53  ;;  %v3304_v57 = vpop.f32.mrb[5].mxu1  ;;  %v3194_v58 = vpop.f32.mrb[6].mxu0 }
 0x1c0   : > { %v3305_v59 = vadd.f32 %v3304_v57, %v3303_v54  ;;  %v3306_v60 = vpop.f32.mrb[6].mxu1  ;;  %v3195_v61 = vpop.f32.mrb[7].mxu0 }
 0x1c1   : > { %v909_v62 = vadd.f32 %v3193_v56, %v4816_v38  ;;  %v3196_v63 = vadd.f32 %v3195_v61, %v3194_v58  ;;  %v3307_v0 = vpop.f32.mrb[7].mxu1 }
 0x1c2   : > { %v3308_v1 = vadd.f32 %v3307_v0, %v3306_v60 }
 0x1c3   : > { %v1070_v2 = vadd.f32 %v3305_v59, %v909_v62  ;;  %v912_v3 = vadd.f32 %v3196_v63, %v4816_v38  ;;  %v6423_v62 = vlaneseq }
 0x1c5   : > { %3886 = vtanh.f32 %v1070_v2  ;;  %v1073_v4 = vadd.f32 %v3308_v1, %v912_v3  ;;  %v3197_v5 = vpop.f32.mrb[8].mxu0 }
 0x1c6   : > { %v3309_v7 = vpop.f32.mrb[8].mxu1  ;;  %v3198_v8 = vpop.f32.mrb[9].mxu0 }
 0x1c7   : > { %v3883_v9 = vpop.eup %3882  ;;  %3888 = vtanh.f32 %v1073_v4  ;;  %v3199_v10 = vadd.f32 %v3198_v8, %v3197_v5  ;;  %v3310_v11 = vpop.f32.mrb[9].mxu1  ;;  %v4842_v5 = vshrl.u32 %v6423_v62, 7 }
 0x1c8   : > { %v3200_v12 = vpop.f32.mrb[10].mxu0  ;;  %v3311_v13 = vadd.f32 %v3310_v11, %v3309_v7  ;;  %v3312_v14 = vpop.f32.mrb[10].mxu1  ;;  %v1227_v16 = vmul.f32 %v3883_v9, %v4822_v6 }
 0x1c9   : > { %v3201_v15 = vpop.f32.mrb[11].mxu0  ;;  %v3885_v17 = vpop.eup %3884  ;;  %v917_v18 = vadd.f32 %v3199_v10, %v4816_v38 }
 0x1ca   : > { %v3202_v19 = vadd.f32 %v3201_v15, %v3200_v12  ;;  %v3313_v20 = vpop.f32.mrb[11].mxu1  ;;  %1259 = vadd.xlane.f32.xlu0 %v1227_v16  ;;  %v1228_v24 = vmul.f32 %v3885_v17, %v4822_v6 }
 0x1cb   : > { %v3314_v21 = vadd.f32 %v3313_v20, %v3312_v14  ;;  %v1078_v22 = vadd.f32 %v3311_v13, %v917_v18  ;;  %v4848_v13 = vadd.s32 8, %v4842_v5  ;;  %v4852_v14 = vadd.s32 16, %v4842_v5 }
 0x1cc   : > { %v920_v23 = vadd.f32 %v3202_v19, %v4816_v38  ;;  %v4857_v19 = vstv %s3028_s20 }
 0x1cd   : > { %3890 = vtanh.f32 %v1078_v22  ;;  %v3203_v26 = vpop.f32.mrb[12].mxu0 }
 0x1ce   : > { %v1081_v25 = vadd.f32 %v3314_v21, %v920_v23  ;;  %v3315_v27 = vpop.f32.mrb[12].mxu1  ;;  %v3204_v28 = vpop.f32.mrb[13].mxu0  ;;  %1261 = vadd.xlane.f32.xlu0 %v1228_v24  ;;  %v4862_v24 = vadd.s32 %v4857_v19, %v4848_v13 }
 0x1cf   : > { %v3887_v29 = vpop.eup %3886  ;;  %v3205_v30 = vadd.f32 %v3204_v28, %v3203_v26  ;;  %v3316_v31 = vpop.f32.mrb[13].mxu1  ;;  %v4870_v28 = vadd.s32 24, %v4842_v5 }
 0x1d0   : > { %3892 = vtanh.f32 %v1081_v25  ;;  %v3206_v32 = vpop.f32.mrb[14].mxu0  ;;  %v3317_v33 = vadd.f32 %v3316_v31, %v3315_v27  ;;  %v3318_v34 = vpop.f32.mrb[14].mxu1  ;;  %v1229_v36 = vmul.f32 %v3887_v29, %v4822_v6  ;;  %v4866_v25 = vadd.s32 %v4857_v19, %v4852_v14 }
 0x1d1   : > { %v3207_v35 = vpop.f32.mrb[15].mxu0  ;;  %v3889_v37 = vpop.eup %3888  ;;  %v925_v39 = vadd.f32 %v3205_v30, %v4816_v38  ;;  %v4875_v31 = vadd.s32 %v4857_v19, %v4870_v28 }
 0x1d2   : > { %v3208_v40 = vadd.f32 %v3207_v35, %v3206_v32  ;;  %v3319_v41 = vpop.f32.mrb[15].mxu1  ;;  %1263 = vadd.xlane.f32.xlu1 %v1229_v36  ;;  %v1230_v45 = vmul.f32 %v3889_v37, %v4822_v6  ;;  %6451 = vst [vmem:[#allocation30_spill] sm:$0xff] %v4866_v25  ;;  %v4878_v36 = vadd.s32 32, %v4842_v5 }
 0x1d3   : > { %v3320_v42 = vadd.f32 %v3319_v41, %v3318_v34  ;;  %v1086_v43 = vadd.f32 %v3317_v33, %v925_v39  ;;  %6452 = vst [vmem:[#allocation31_spill] sm:$0xff] %v4875_v31 }
 0x1d4   : > { %v928_v44 = vadd.f32 %v3208_v40, %v4816_v38 }
 0x1d5   : > { %3894 = vtanh.f32 %v1086_v43  ;;  %v3209_v47 = vpop.f32.mrb[16].mxu0 }
 0x1d6   : > { %v1089_v46 = vadd.f32 %v3320_v42, %v928_v44  ;;  %v3321_v48 = vpop.f32.mrb[16].mxu1  ;;  %v3210_v49 = vpop.f32.mrb[17].mxu0  ;;  %1265 = vadd.xlane.f32.xlu1 %v1230_v45 }
 0x1d7   : > { %v3891_v50 = vpop.eup %3890  ;;  %v3211_v51 = vadd.f32 %v3210_v49, %v3209_v47  ;;  %v3322_v52 = vpop.f32.mrb[17].mxu1 }
 0x1d8   : > { %3896 = vtanh.f32 %v1089_v46  ;;  %v3212_v53 = vpop.f32.mrb[18].mxu0  ;;  %v3323_v54 = vadd.f32 %v3322_v52, %v3321_v48  ;;  %v3324_v55 = vpop.f32.mrb[18].mxu1  ;;  %v1231_v57 = vmul.f32 %v3891_v50, %v4822_v6  ;;  %v4883_v46 = vadd.s32 %v4857_v19, %v4878_v36 }
 0x1d9   : > { %v3213_v56 = vpop.f32.mrb[19].mxu0  ;;  %v933_v59 = vadd.f32 %v3211_v51, %v4816_v38  ;;  %v3325_v61 = vpop.f32.mrb[19].mxu1 }
 0x1da   : > { %v3893_v58 = vpop.eup %3892  ;;  %v3214_v60 = vadd.f32 %v3213_v56, %v3212_v53  ;;  %v3326_v63 = vadd.f32 %v3325_v61, %v3324_v55  ;;  %1267 = vadd.xlane.f32.xlu0 %v1231_v57  ;;  %6453 = vst [vmem:[#allocation32_spill] sm:$0xff] %v4883_v46  ;;  %v4888_v53 = vadd.s32 40, %v4842_v5  ;;  %v4896_v61 = vadd.s32 48, %v4842_v5 }
 0x1db   : > { %v1232_v0 = vmul.f32 %v3893_v58, %v4822_v6  ;;  %v1094_v1 = vadd.f32 %v3323_v54, %v933_v59 }
 0x1dc   : > { %v936_v2 = vadd.f32 %v3214_v60, %v4816_v38  ;;  %v4893_v56 = vadd.s32 %v4857_v19, %v4888_v53 }
 0x1dd   : > { %1269 = vadd.xlane.f32.xlu1 %v1232_v0  ;;  %3898 = vtanh.f32 %v1094_v1  ;;  %v3215_v4 = vpop.f32.mrb[20].mxu0 }
 0x1de   : > { %v1097_v3 = vadd.f32 %v3326_v63, %v936_v2  ;;  %v3327_v7 = vpop.f32.mrb[20].mxu1  ;;  %v3216_v8 = vpop.f32.mrb[21].mxu0  ;;  %6454 = vst [vmem:[#allocation33_spill] sm:$0xff] %v4893_v56 }
 0x1df   : > { %v3895_v9 = vpop.eup %3894  ;;  %v3217_v10 = vadd.f32 %v3216_v8, %v3215_v4  ;;  %v3328_v11 = vpop.f32.mrb[21].mxu1 }
 0x1e0   : > { %3900 = vtanh.f32 %v1097_v3  ;;  %v3218_v12 = vpop.f32.mrb[22].mxu0  ;;  %v3329_v15 = vadd.f32 %v3328_v11, %v3327_v7  ;;  %v3330_v16 = vpop.f32.mrb[22].mxu1  ;;  %v1233_v18 = vmul.f32 %v3895_v9, %v4822_v6  ;;  %v4901_v9 = vadd.s32 %v4857_v19, %v4896_v61 }
 0x1e1   : > { %v3219_v17 = vpop.f32.mrb[23].mxu0  ;;  %v941_v21 = vadd.f32 %v3217_v10, %v4816_v38  ;;  %v3331_v23 = vpop.f32.mrb[23].mxu1 }
 0x1e2   : > { %v3897_v20 = vpop.eup %3896  ;;  %v3220_v22 = vadd.f32 %v3219_v17, %v3218_v12  ;;  %v3332_v26 = vadd.f32 %v3331_v23, %v3330_v16  ;;  %1271 = vadd.xlane.f32.xlu0 %v1233_v18  ;;  %6455 = vst [vmem:[#allocation34_spill] sm:$0xff] %v4901_v9  ;;  %v4906_v18 = vadd.s32 56, %v4842_v5 }
 0x1e3   : > { %v1234_v27 = vmul.f32 %v3897_v20, %v4822_v6  ;;  %v1102_v29 = vadd.f32 %v3329_v15, %v941_v21 }
 0x1e4   : > { %v944_v30 = vadd.f32 %v3220_v22, %v4816_v38  ;;  %v4911_v22 = vadd.s32 %v4857_v19, %v4906_v18 }
 0x1e5   : > { %1273 = vadd.xlane.f32.xlu1 %v1234_v27  ;;  %3902 = vtanh.f32 %v1102_v29  ;;  %v3221_v33 = vpop.f32.mrb[24].mxu0 }
 0x1e6   : > { %v1105_v32 = vadd.f32 %v3332_v26, %v944_v30  ;;  %v3333_v34 = vpop.f32.mrb[24].mxu1  ;;  %v3222_v35 = vpop.f32.mrb[25].mxu0  ;;  %6456 = vst [vmem:[#allocation35_spill] sm:$0xff] %v4911_v22  ;;  %v4914_v30 = vadd.s32 64, %v4842_v5 }
 0x1e7   : > { %v3899_v37 = vpop.eup %3898  ;;  %v3223_v39 = vadd.f32 %v3222_v35, %v3221_v33  ;;  %v3334_v40 = vpop.f32.mrb[25].mxu1 }
 0x1e8   : > { %3904 = vtanh.f32 %v1105_v32  ;;  %v3224_v41 = vpop.f32.mrb[26].mxu0  ;;  %v3335_v42 = vadd.f32 %v3334_v40, %v3333_v34  ;;  %v3336_v43 = vpop.f32.mrb[26].mxu1  ;;  %v1235_v45 = vmul.f32 %v3899_v37, %v4822_v6 }
 0x1e9   : > { %v3225_v44 = vpop.f32.mrb[27].mxu0  ;;  %v949_v48 = vadd.f32 %v3223_v39, %v4816_v38  ;;  %v3337_v50 = vpop.f32.mrb[27].mxu1 }
 0x1ea   : > { %v3901_v47 = vpop.eup %3900  ;;  %v3226_v49 = vadd.f32 %v3225_v44, %v3224_v41  ;;  %v3338_v51 = vadd.f32 %v3337_v50, %v3336_v43  ;;  %1275 = vadd.xlane.f32.xlu0 %v1235_v45  ;;  %v4924_v50 = vadd.s32 72, %v4842_v5 }
 0x1eb   : > { %v1236_v52 = vmul.f32 %v3901_v47, %v4822_v6  ;;  %v1110_v54 = vadd.f32 %v3335_v42, %v949_v48  ;;  %v4919_v42 = vadd.s32 %v4857_v19, %v4914_v30 }
 0x1ec   : > { %v952_v55 = vadd.f32 %v3226_v49, %v4816_v38 }
 0x1ed   : > { %1277 = vadd.xlane.f32.xlu1 %v1236_v52  ;;  %3906 = vtanh.f32 %v1110_v54  ;;  %v3227_v58 = vpop.f32.mrb[28].mxu0  ;;  %6457 = vst [vmem:[#allocation36_spill] sm:$0xff] %v4919_v42  ;;  %v4929_v54 = vadd.s32 %v4857_v19, %v4924_v50 }
 0x1ee   : > { %v1113_v57 = vadd.f32 %v3338_v51, %v952_v55  ;;  %v3339_v59 = vpop.f32.mrb[28].mxu1  ;;  %v3228_v60 = vpop.f32.mrb[29].mxu0 }
 0x1ef   : > { %v3903_v63 = vpop.eup %3902  ;;  %v3229_v0 = vadd.f32 %v3228_v60, %v3227_v58  ;;  %v3340_v1 = vpop.f32.mrb[29].mxu1  ;;  %6458 = vst [vmem:[#allocation37_spill] sm:$0xff] %v4929_v54  ;;  %v4932_v60 = vadd.s32 80, %v4842_v5 }
 0x1f0   : > { %3908 = vtanh.f32 %v1113_v57  ;;  %v3230_v2 = vpop.f32.mrb[30].mxu0  ;;  %v3341_v3 = vadd.f32 %v3340_v1, %v3339_v59  ;;  %v3342_v4 = vpop.f32.mrb[30].mxu1  ;;  %v1237_v8 = vmul.f32 %v3903_v63, %v4822_v6 }
 0x1f1   : > { %v3231_v7 = vpop.f32.mrb[31].mxu0  ;;  %v957_v11 = vadd.f32 %v3229_v0, %v4816_v38  ;;  %v3343_v15 = vpop.f32.mrb[31].mxu1 }
 0x1f2   : > { %v3905_v10 = vpop.eup %3904  ;;  %v3232_v12 = vadd.f32 %v3231_v7, %v3230_v2  ;;  %v3344_v16 = vadd.f32 %v3343_v15, %v3342_v4  ;;  %1279 = vadd.xlane.f32.xlu0 %v1237_v8 }
 0x1f3   : > { %v1238_v17 = vmul.f32 %v3905_v10, %v4822_v6  ;;  %v1118_v20 = vadd.f32 %v3341_v3, %v957_v11  ;;  %v4937_v10 = vadd.s32 %v4857_v19, %v4932_v60 }
 0x1f4   : > { %v960_v21 = vadd.f32 %v3232_v12, %v4816_v38 }
 0x1f5   : > { %1281 = vadd.xlane.f32.xlu1 %v1238_v17  ;;  %3910 = vtanh.f32 %v1118_v20  ;;  %v3233_v26 = vpop.f32.mrb[32].mxu0  ;;  %6459 = vst [vmem:[#allocation38_spill] sm:$0xff] %v4937_v10 }
 0x1f6   : > { %v1121_v23 = vadd.f32 %v3344_v16, %v960_v21  ;;  %v3345_v27 = vpop.f32.mrb[32].mxu1  ;;  %v3234_v29 = vpop.f32.mrb[33].mxu0  ;;  %v4942_v21 = vadd.s32 88, %v4842_v5 }
 0x1f7   : > { %v3907_v32 = vpop.eup %3906  ;;  %v3235_v33 = vadd.f32 %v3234_v29, %v3233_v26  ;;  %v3346_v34 = vpop.f32.mrb[33].mxu1 }
 0x1f8   : > { %3912 = vtanh.f32 %v1121_v23  ;;  %v3236_v35 = vpop.f32.mrb[34].mxu0  ;;  %v3347_v37 = vadd.f32 %v3346_v34, %v3345_v27  ;;  %v3348_v39 = vpop.f32.mrb[34].mxu1  ;;  %v1239_v41 = vmul.f32 %v3907_v32, %v4822_v6  ;;  %v4947_v27 = vadd.s32 %v4857_v19, %v4942_v21 }
 0x1f9   : > { %v3237_v40 = vpop.f32.mrb[35].mxu0  ;;  %v965_v44 = vadd.f32 %v3235_v33, %v4816_v38  ;;  %v3349_v47 = vpop.f32.mrb[35].mxu1 }
 0x1fa   : > { %v3909_v43 = vpop.eup %3908  ;;  %v3238_v45 = vadd.f32 %v3237_v40, %v3236_v35  ;;  %v3350_v48 = vadd.f32 %v3349_v47, %v3348_v39  ;;  %1283 = vadd.xlane.f32.xlu0 %v1239_v41  ;;  %6460 = vst [vmem:[#allocation39_spill] sm:$0xff] %v4947_v27  ;;  %v4950_v35 = vadd.s32 96, %v4842_v5 }
 0x1fb   : > { %v1240_v49 = vmul.f32 %v3909_v43, %v4822_v6  ;;  %v1126_v51 = vadd.f32 %v3347_v37, %v965_v44 }
 0x1fc   : > { %v968_v52 = vadd.f32 %v3238_v45, %v4816_v38 }
 0x1fd   : > { %1285 = vadd.xlane.f32.xlu1 %v1240_v49  ;;  %3914 = vtanh.f32 %v1126_v51  ;;  %v3239_v57 = vpop.f32.mrb[36].mxu0 }
 0x1fe   : > { %v1129_v55 = vadd.f32 %v3350_v48, %v968_v52  ;;  %v3351_v58 = vpop.f32.mrb[36].mxu1  ;;  %v3240_v59 = vpop.f32.mrb[37].mxu0  ;;  %v4955_v48 = vadd.s32 %v4857_v19, %v4950_v35 }
 0x1ff   : > { %v3911_v63 = vpop.eup %3910  ;;  %v3241_v0 = vadd.f32 %v3240_v59, %v3239_v57  ;;  %v3352_v1 = vpop.f32.mrb[37].mxu1  ;;  %v4960_v59 = vadd.s32 104, %v4842_v5 }
 0x200   : > { %3916 = vtanh.f32 %v1129_v55  ;;  %v3242_v2 = vpop.f32.mrb[38].mxu0  ;;  %v3353_v3 = vadd.f32 %v3352_v1, %v3351_v58  ;;  %v3354_v4 = vpop.f32.mrb[38].mxu1  ;;  %v1241_v8 = vmul.f32 %v3911_v63, %v4822_v6  ;;  %6461 = vst [vmem:[#allocation40_spill] sm:$0xff] %v4955_v48 }
 0x201   : > { %v3243_v7 = vpop.f32.mrb[39].mxu0  ;;  %v973_v12 = vadd.f32 %v3241_v0, %v4816_v38  ;;  %v3355_v16 = vpop.f32.mrb[39].mxu1  ;;  %v4965_v1 = vadd.s32 %v4857_v19, %v4960_v59 }
 0x202   : > { %v3913_v11 = vpop.eup %3912  ;;  %v3244_v15 = vadd.f32 %v3243_v7, %v3242_v2  ;;  %v3356_v17 = vadd.f32 %v3355_v16, %v3354_v4  ;;  %1287 = vadd.xlane.f32.xlu0 %v1241_v8  ;;  %v4968_v8 = vadd.s32 112, %v4842_v5 }
 0x203   : > { %v1242_v20 = vmul.f32 %v3913_v11, %v4822_v6  ;;  %v1134_v23 = vadd.f32 %v3353_v3, %v973_v12  ;;  %6462 = vst [vmem:[#allocation41_spill] sm:$0xff] %v4965_v1 }
 0x204   : > { %v976_v26 = vadd.f32 %v3244_v15, %v4816_v38 }
 0x205   : > { %1289 = vadd.xlane.f32.xlu1 %v1242_v20  ;;  %3918 = vtanh.f32 %v1134_v23  ;;  %v3245_v32 = vpop.f32.mrb[40].mxu0 }
 0x206   : > { %v1137_v29 = vadd.f32 %v3356_v17, %v976_v26  ;;  %v3357_v33 = vpop.f32.mrb[40].mxu1  ;;  %v3246_v34 = vpop.f32.mrb[41].mxu0 }
 0x207   : > { %v3915_v37 = vpop.eup %3914  ;;  %v3247_v39 = vadd.f32 %v3246_v34, %v3245_v32  ;;  %v3358_v40 = vpop.f32.mrb[41].mxu1 }
 0x208   : > { %3920 = vtanh.f32 %v1137_v29  ;;  %v3248_v41 = vpop.f32.mrb[42].mxu0  ;;  %v3359_v43 = vadd.f32 %v3358_v40, %v3357_v33  ;;  %v3360_v44 = vpop.f32.mrb[42].mxu1  ;;  %v1243_v47 = vmul.f32 %v3915_v37, %v4822_v6  ;;  %v4973_v29 = vadd.s32 %v4857_v19, %v4968_v8 }
 0x209   : > { %v3249_v45 = vpop.f32.mrb[43].mxu0  ;;  %v981_v51 = vadd.f32 %v3247_v39, %v4816_v38  ;;  %v3361_v55 = vpop.f32.mrb[43].mxu1 }
 0x20a   : > { %v3917_v49 = vpop.eup %3916  ;;  %v3250_v52 = vadd.f32 %v3249_v45, %v3248_v41  ;;  %v3362_v57 = vadd.f32 %v3361_v55, %v3360_v44  ;;  %1291 = vadd.xlane.f32.xlu0 %v1243_v47  ;;  %6463 = vst [vmem:[#allocation42_spill] sm:$0xff] %v4973_v29  ;;  %v4978_v41 = vadd.s32 120, %v4842_v5  ;;  %v4986_v55 = vadd.s32 128, %v4842_v5 }
 0x20b   : > { %v1244_v58 = vmul.f32 %v3917_v49, %v4822_v6  ;;  %v1142_v63 = vadd.f32 %v3359_v43, %v981_v51 }
 0x20c   : > { %v984_v0 = vadd.f32 %v3250_v52, %v4816_v38  ;;  %v4983_v45 = vadd.s32 %v4857_v19, %v4978_v41 }
 0x20d   : > { %1293 = vadd.xlane.f32.xlu1 %v1244_v58  ;;  %3922 = vtanh.f32 %v1142_v63  ;;  %v3251_v3 = vpop.f32.mrb[44].mxu0 }
 0x20e   : > { %v1145_v2 = vadd.f32 %v3362_v57, %v984_v0  ;;  %v3363_v4 = vpop.f32.mrb[44].mxu1  ;;  %v3252_v7 = vpop.f32.mrb[45].mxu0  ;;  %6464 = vst [vmem:[#allocation43_spill] sm:$0xff] %v4983_v45 }
 0x20f   : > { %v3919_v11 = vpop.eup %3918  ;;  %v3253_v12 = vadd.f32 %v3252_v7, %v3251_v3  ;;  %v3364_v15 = vpop.f32.mrb[45].mxu1 }
 0x210   : > { %3924 = vtanh.f32 %v1145_v2  ;;  %v3254_v16 = vpop.f32.mrb[46].mxu0  ;;  %v3365_v17 = vadd.f32 %v3364_v15, %v3363_v4  ;;  %v3366_v20 = vpop.f32.mrb[46].mxu1  ;;  %v1245_v26 = vmul.f32 %v3919_v11, %v4822_v6  ;;  %v4991_v11 = vadd.s32 %v4857_v19, %v4986_v55 }
 0x211   : > { %v3255_v23 = vpop.f32.mrb[47].mxu0  ;;  %v989_v33 = vadd.f32 %v3253_v12, %v4816_v38  ;;  %v3367_v37 = vpop.f32.mrb[47].mxu1 }
 0x212   : > { %v3921_v32 = vpop.eup %3920  ;;  %v3256_v34 = vadd.f32 %v3255_v23, %v3254_v16  ;;  %v3368_v39 = vadd.f32 %v3367_v37, %v3366_v20  ;;  %1295 = vadd.xlane.f32.xlu0 %v1245_v26  ;;  %6465 = vst [vmem:[#allocation44_spill] sm:$0xff] %v4991_v11  ;;  %v4996_v26 = vadd.s32 136, %v4842_v5 }
 0x213   : > { %v1246_v40 = vmul.f32 %v3921_v32, %v4822_v6  ;;  %v1150_v43 = vadd.f32 %v3365_v17, %v989_v33 }
 0x214   : > { %v992_v44 = vadd.f32 %v3256_v34, %v4816_v38  ;;  %v5001_v34 = vadd.s32 %v4857_v19, %v4996_v26 }
 0x215   : > { %1297 = vadd.xlane.f32.xlu1 %v1246_v40  ;;  %3926 = vtanh.f32 %v1150_v43  ;;  %v3257_v49 = vpop.f32.mrb[48].mxu0 }
 0x216   : > { %v1153_v47 = vadd.f32 %v3368_v39, %v992_v44  ;;  %v3369_v51 = vpop.f32.mrb[48].mxu1  ;;  %v3258_v52 = vpop.f32.mrb[49].mxu0  ;;  %6466 = vst [vmem:[#allocation45_spill] sm:$0xff] %v5001_v34  ;;  %v5004_v44 = vadd.s32 144, %v4842_v5 }
 0x217   : > { %v3923_v57 = vpop.eup %3922  ;;  %v3259_v58 = vadd.f32 %v3258_v52, %v3257_v49  ;;  %v3370_v63 = vpop.f32.mrb[49].mxu1 }
 0x218   : > { %3928 = vtanh.f32 %v1153_v47  ;;  %v3260_v0 = vpop.f32.mrb[50].mxu0  ;;  %v3371_v2 = vadd.f32 %v3370_v63, %v3369_v51  ;;  %v3372_v3 = vpop.f32.mrb[50].mxu1  ;;  %v1247_v7 = vmul.f32 %v3923_v57, %v4822_v6 }
 0x219   : > { %v3261_v4 = vpop.f32.mrb[51].mxu0  ;;  %v997_v15 = vadd.f32 %v3259_v58, %v4816_v38  ;;  %v3373_v17 = vpop.f32.mrb[51].mxu1 }
 0x21a   : > { %v3925_v12 = vpop.eup %3924  ;;  %v3262_v16 = vadd.f32 %v3261_v4, %v3260_v0  ;;  %v3374_v20 = vadd.f32 %v3373_v17, %v3372_v3  ;;  %1299 = vadd.xlane.f32.xlu0 %v1247_v7  ;;  %v5014_v17 = vadd.s32 152, %v4842_v5 }
 0x21b   : > { %v1248_v23 = vmul.f32 %v3925_v12, %v4822_v6  ;;  %v1158_v32 = vadd.f32 %v3371_v2, %v997_v15  ;;  %v5009_v2 = vadd.s32 %v4857_v19, %v5004_v44 }
 0x21c   : > { %v1000_v33 = vadd.f32 %v3262_v16, %v4816_v38 }
 0x21d   : > { %1301 = vadd.xlane.f32.xlu1 %v1248_v23  ;;  %3930 = vtanh.f32 %v1158_v32  ;;  %v3263_v39 = vpop.f32.mrb[52].mxu0  ;;  %6467 = vst [vmem:[#allocation46_spill] sm:$0xff] %v5009_v2  ;;  %v5019_v32 = vadd.s32 %v4857_v19, %v5014_v17 }
 0x21e   : > { %v1161_v37 = vadd.f32 %v3374_v20, %v1000_v33  ;;  %v3375_v40 = vpop.f32.mrb[52].mxu1  ;;  %v3264_v43 = vpop.f32.mrb[53].mxu0 }
 0x21f   : > { %v3927_v47 = vpop.eup %3926  ;;  %v3265_v49 = vadd.f32 %v3264_v43, %v3263_v39  ;;  %v3376_v51 = vpop.f32.mrb[53].mxu1  ;;  %6468 = vst [vmem:[#allocation47_spill] sm:$0xff] %v5019_v32  ;;  %v5022_v43 = vadd.s32 160, %v4842_v5  ;;  %v5134_v32 = vstv %s3027_s24 }
 0x220   : > { %3932 = vtanh.f32 %v1161_v37  ;;  %v3266_v52 = vpop.f32.mrb[54].mxu0  ;;  %v3377_v57 = vadd.f32 %v3376_v51, %v3375_v40  ;;  %v3378_v58 = vpop.f32.mrb[54].mxu1  ;;  %v1249_v0 = vmul.f32 %v3927_v47, %v4822_v6  ;;  %v1399_v11 = vadd.s32 %v5134_v32, %v4842_v5 }
 0x221   : > { %v3267_v63 = vpop.f32.mrb[55].mxu0  ;;  %v1005_v4 = vadd.f32 %v3265_v49, %v4816_v38  ;;  %v3379_v12 = vpop.f32.mrb[55].mxu1  ;;  %v5144_v45 = vadd.s32 %v5134_v32, %v4848_v13  ;;  %v5148_v29 = vadd.s32 %v5134_v32, %v4852_v14  ;;  %v5152_v1 = vadd.s32 %v5134_v32, %v4870_v28 }
 0x222   : > { %v3929_v3 = vpop.eup %3928  ;;  %v3268_v7 = vadd.f32 %v3267_v63, %v3266_v52  ;;  %v3380_v15 = vadd.f32 %v3379_v12, %v3378_v58  ;;  %1303 = vadd.xlane.f32.xlu0 %v1249_v0  ;;  %v1403_v48 = vadd.s32 %v5134_v32, %v4878_v36  ;;  %v5158_v27 = vadd.s32 %v5134_v32, %v4888_v53 }
 0x223   : > { %v1250_v16 = vmul.f32 %v3929_v3, %v4822_v6  ;;  %v1166_v20 = vadd.f32 %v3377_v57, %v1005_v4  ;;  %v5027_v3 = vadd.s32 %v4857_v19, %v5022_v43  ;;  %v5162_v10 = vadd.s32 %v5134_v32, %v4896_v61  ;;  %v5184_v61 = vld [vmem:[#allocation5] ss:$0 sm:$0xff] }
 0x224   : > { %v1008_v23 = vadd.f32 %v3268_v7, %v4816_v38  ;;  %v5166_v13 = vadd.s32 %v5134_v32, %v4906_v18  ;;  %v5170_v14 = vadd.s32 %v5134_v32, %v4914_v30  ;;  %v5174_v28 = vadd.s32 %v5134_v32, %v4924_v50 }
 0x225   : > { %1305 = vadd.xlane.f32.xlu1 %v1250_v16  ;;  %3934 = vtanh.f32 %v1166_v20  ;;  %v3269_v37 = vpop.f32.mrb[56].mxu0  ;;  %6469 = vst [vmem:[#allocation48_spill] sm:$0xff] %v5027_v3  ;;  %vm1431_vm2 = vcmp.lt.s32.totalorder %v1399_v11, 600  ;;  %vm1432_vm3 = vcmp.lt.s32.totalorder %v5144_v45, 600  ;;  %vm1433_vm5 = vcmp.lt.s32.totalorder %v5148_v29, 600 }
 0x226   : > { %v1169_v33 = vadd.f32 %v3380_v15, %v1008_v23  ;;  %v3381_v39 = vpop.f32.mrb[56].mxu1  ;;  %v3270_v40 = vpop.f32.mrb[57].mxu0  ;;  %v5032_v23 = vadd.s32 168, %v4842_v5  ;;  %vm1434_vm6 = vcmp.lt.s32.totalorder %v5152_v1, 600  ;;  %vm1435_vm7 = vcmp.lt.s32.totalorder %v1403_v48, 600 }
 0x227   : > { %v3931_v47 = vpop.eup %3930  ;;  %v3271_v49 = vadd.f32 %v3270_v40, %v3269_v37  ;;  %v3382_v51 = vpop.f32.mrb[57].mxu1  ;;  %vm1436_vm8 = vcmp.lt.s32.totalorder %v5158_v27, 600  ;;  %vm1437_vm9 = vcmp.lt.s32.totalorder %v5162_v10, 600  ;;  %vm1438_vm10 = vcmp.lt.s32.totalorder %v5166_v13, 600 }
 0x228   : > { %3936 = vtanh.f32 %v1169_v33  ;;  %v3272_v52 = vpop.f32.mrb[58].mxu0  ;;  %v3383_v57 = vadd.f32 %v3382_v51, %v3381_v39  ;;  %v3384_v58 = vpop.f32.mrb[58].mxu1  ;;  %v1251_v0 = vmul.f32 %v3931_v47, %v4822_v6  ;;  %v5037_v39 = vadd.s32 %v4857_v19, %v5032_v23 }
 0x229   : > { %v3273_v63 = vpop.f32.mrb[59].mxu0  ;;  %v1013_v7 = vadd.f32 %v3271_v49, %v4816_v38  ;;  %v3385_v15 = vpop.f32.mrb[59].mxu1  ;;  %v5190_v18 = vadd.s32 %v5134_v32, %v4932_v60  ;;  %v5194_v30 = vadd.s32 %v5134_v32, %v4942_v21  ;;  %vm1439_vm11 = vcmp.lt.s32.totalorder %v5170_v14, 600 }
 0x22a   : > { %v3933_v4 = vpop.eup %3932  ;;  %v3274_v12 = vadd.f32 %v3273_v63, %v3272_v52  ;;  %v3386_v16 = vadd.f32 %v3385_v15, %v3384_v58  ;;  %1307 = vadd.xlane.f32.xlu0 %v1251_v0  ;;  %6470 = vst [vmem:[#allocation49_spill] sm:$0xff] %v5037_v39  ;;  %v5040_v52 = vadd.s32 176, %v4842_v5  ;;  %vm1440_vm12 = vcmp.lt.s32.totalorder %v5174_v28, 600 }
 0x22b   : > { %v1252_v20 = vmul.f32 %v3933_v4, %v4822_v6  ;;  %v1174_v33 = vadd.f32 %v3383_v57, %v1013_v7  ;;  %v5200_v50 = vadd.s32 %v5134_v32, %v4950_v35  ;;  %v5204_v54 = vadd.s32 %v5134_v32, %v4960_v59 }
 0x22c   : > { %v1016_v37 = vadd.f32 %v3274_v12, %v4816_v38  ;;  %v5212_v21 = vadd.s32 %v5134_v32, %v4968_v8  ;;  %v5216_v22 = vadd.s32 %v5134_v32, %v4978_v41  ;;  %v5220_v35 = vadd.s32 %v5134_v32, %v4986_v55 }
 0x22d   : > { %1309 = vadd.xlane.f32.xlu1 %v1252_v20  ;;  %3938 = vtanh.f32 %v1174_v33  ;;  %v3275_v47 = vpop.f32.mrb[60].mxu0  ;;  %v5045_v20 = vadd.s32 %v4857_v19, %v5040_v52  ;;  %v5224_v59 = vadd.s32 %v5134_v32, %v4996_v26  ;;  %v5230_v8 = vadd.s32 %v5134_v32, %v5004_v44 }
 0x22e   : > { %v1177_v40 = vadd.f32 %v3386_v16, %v1016_v37  ;;  %v3387_v49 = vpop.f32.mrb[60].mxu1  ;;  %v3276_v51 = vpop.f32.mrb[61].mxu0  ;;  %v5234_v41 = vadd.s32 %v5134_v32, %v5014_v17  ;;  %vm1441_vm13 = vcmp.lt.s32.totalorder %v5190_v18, 600  ;;  %vm1442_vm14 = vcmp.lt.s32.totalorder %v5194_v30, 600 }
 0x22f   : > { %v3935_v58 = vpop.eup %3934  ;;  %v3277_v63 = vadd.f32 %v3276_v51, %v3275_v47  ;;  %v3388_v0 = vpop.f32.mrb[61].mxu1  ;;  %6471 = vst [vmem:[#allocation50_spill] sm:$0xff] %v5045_v20  ;;  %v5050_v47 = vadd.s32 184, %v4842_v5  ;;  %v5240_v55 = vadd.s32 %v5134_v32, %v5022_v43  ;;  %v5244_v26 = vadd.s32 %v5134_v32, %v5032_v23 }
 0x230   : > { %3940 = vtanh.f32 %v1177_v40  ;;  %v3278_v57 = vpop.f32.mrb[62].mxu0  ;;  %v3389_v4 = vadd.f32 %v3388_v0, %v3387_v49  ;;  %v3390_v7 = vpop.f32.mrb[62].mxu1  ;;  %v1253_v15 = vmul.f32 %v3935_v58, %v4822_v6  ;;  %v5248_v44 = vadd.s32 %v5134_v32, %v5040_v52 }
 0x231   : > { %v3279_v12 = vpop.f32.mrb[63].mxu0  ;;  %v1021_v33 = vadd.f32 %v3277_v63, %v4816_v38  ;;  %v3391_v62 = vpop.f32.mrb[63].mxu1  ;;  %v5055_v58 = vadd.s32 %v4857_v19, %v5050_v47  ;;  %v5058_v63 = vadd.s32 192, %v4842_v5  ;;  %v5252_v17 = vadd.s32 %v5134_v32, %v5050_v47 }
 0x232   : > { %v3937_v16 = vpop.eup %3936  ;;  %v3280_v37 = vadd.f32 %v3279_v12, %v3278_v57  ;;  %v3392_v39 = vadd.f32 %v3391_v62, %v3390_v7  ;;  %1311 = vadd.xlane.f32.xlu0 %v1253_v15  ;;  %v5067_v12 = vadd.s32 200, %v4842_v5  ;;  %v5074_v15 = vadd.s32 208, %v4842_v5 }
 0x233   : > { %v1254_v40 = vmul.f32 %v3937_v16, %v4822_v6  ;;  %v1182_v49 = vadd.f32 %v3389_v4, %v1021_v33  ;;  %6472 = vst [vmem:[#allocation51_spill] sm:$0xff] %v5055_v58  ;;  %v5063_v7 = vadd.s32 %v4857_v19, %v5058_v63  ;;  %vm1443_vm15 = vcmp.lt.s32.totalorder %v5200_v50, 600 }
 0x234   : > { %v1024_v51 = vadd.f32 %v3280_v37, %v4816_v38  ;;  %v5079_v37 = vadd.s32 %v4857_v19, %v5074_v15  ;;  %vm1444_vm0 = vcmp.lt.s32.totalorder %v5204_v54, 600  ;;  %v5264_v52 = vadd.s32 %v5134_v32, %v5058_v63 }
 0x235   : > { %1313 = vadd.xlane.f32.xlu1 %v1254_v40  ;;  %3942 = vtanh.f32 %v1182_v49  ;;  %6473 = vst [vmem:[#allocation52_spill] sm:$0xff] %v5063_v7  ;;  %v5268_v47 = vadd.s32 %v5134_v32, %v5067_v12  ;;  %vm1445_vm1 = vcmp.lt.s32.totalorder %v5212_v21, 600  ;;  %v5277_v46 = vadd.s32 %v5134_v32, %v5074_v15 }
 0x236   : > { %v1185_v0 = vadd.f32 %v3392_v39, %v1024_v51  ;;  %v5071_v39 = vadd.s32 %v4857_v19, %v5067_v12  ;;  %6475 = vst [vmem:[#allocation54_spill] sm:$0xff] %v5079_v37  ;;  %v5083_v51 = vadd.s32 216, %v4842_v5 }
 0x237   : > { %v3939_v62 = vpop.eup %3938 }
 0x238   : > { %3944 = vtanh.f32 %v1185_v0  ;;  %v1255_v57 = vmul.f32 %v3939_v62, %v4822_v6  ;;  %6474 = vst [vmem:[#allocation53_spill] sm:$0xff] %v5071_v39  ;;  %v5087_v0 = vadd.s32 %v4857_v19, %v5083_v51  ;;  %v5090_v62 = vadd.s32 224, %v4842_v5 }
 0x239   : > { %v5281_v63 = vadd.s32 %v5134_v32, %v5083_v51 }
 0x23a   : > { %v3941_v4 = vpop.eup %3940  ;;  %1315 = vadd.xlane.f32.xlu0 %v1255_v57  ;;  %6476 = vst [vmem:[#allocation55_spill] sm:$0xff] %v5087_v0  ;;  %v5094_v57 = vadd.s32 %v4857_v19, %v5090_v62  ;;  %v5299_v11 = vadd.s32 %v5134_v32, %v5090_v62 }
 0x23b   : > { %v1256_v38 = vmul.f32 %v3941_v4, %v4822_v6  ;;  %v5097_v4 = vadd.s32 232, %v4842_v5 }
 0x23c   : > { %6477 = vst [vmem:[#allocation56_spill] sm:$0xff] %v5094_v57 }
 0x23d   : > { %1317 = vadd.xlane.f32.xlu1 %v1256_v38  ;;  %v5104_v38 = vadd.s32 240, %v4842_v5 }
 0x23f   : > { %v3943_v16 = vpop.eup %3942 }
 0x240   : > { %v1257_v33 = vmul.f32 %v3943_v16, %v4822_v6  ;;  %v5108_v16 = vadd.s32 %v4857_v19, %v5104_v38 }
 0x242   : > { %v3945_v40 = vpop.eup %3944  ;;  %1319 = vadd.xlane.f32.xlu0 %v1257_v33  ;;  %6479 = vst [vmem:[#allocation58_spill] sm:$0xff] %v5108_v16  ;;  %v5111_v33 = vadd.s32 248, %v4842_v5 }
 0x243   : > { %v1258_v49 = vmul.f32 %v3945_v40, %v4822_v6  ;;  %v5101_v6 = vadd.s32 %v4857_v19, %v5097_v4 }
 0x244   : > { %v5115_v40 = vadd.s32 %v4857_v19, %v5111_v33  ;;  %v5325_v45 = vadd.s32 %v5134_v32, %v5111_v33 }
 0x245   : > { %1321 = vadd.xlane.f32.xlu1 %v1258_v49  ;;  %6478 = vst [vmem:[#allocation57_spill] sm:$0xff] %v5101_v6 }
 0x246   : > { %6480 = vst [vmem:[#allocation59_spill] sm:$0xff] %v5115_v40 }
 0x257   : > { %v1260_v49 = vpop.xlane.xlu0 %1259 }
 0x258   : > { %v1330_v9 = vadd.f32 %v5184_v61, %v1260_v49 }
 0x25a   : > { %v5284_v31 = vsel %vm1431_vm2, %v1330_v9, -1e+30  ;;  %vm1446_vm2 = vcmp.lt.s32.totalorder %v5216_v22, 600 }
 0x25b   : > { %v1262_v0 = vpop.xlane.xlu0 %1261  ;;  %v1496_v29 = vsel %vm1495_vm4, %v5284_v31, -inf }
 0x25f   : > { %v1264_v57 = vpop.xlane.xlu1 %1263 }
 0x260   : > { %v1332_v49 = vadd.f32 %v5184_v61, %v1264_v57 }
 0x262   : > { %v5311_v48 = vsel %vm1433_vm5, %v1332_v49, -1e+30  ;;  %vm1449_vm5 = vcmp.lt.s32.totalorder %v5230_v8, 600 }
 0x263   : > { %v5117_v37 = vpop.xlane.xlu1 %1265 }
 0x267   : > { %v1268_v6 = vpop.xlane.xlu0 %1267 }
 0x268   : > { %v1334_v56 = vadd.f32 %v5184_v61, %v1268_v6  ;;  %v1331_v6 = vadd.f32 %v5184_v61, %v1262_v0  ;;  %v1333_v0 = vadd.f32 %v5184_v61, %v5117_v37 }
 0x26a   : > { %v5119_v39 = vpop.xlane.xlu1 %1269  ;;  %v5287_v12 = vsel %vm1435_vm7, %v1334_v56, -1e+30  ;;  %v5303_v56 = vadd.s32 %v5134_v32, %v5097_v4  ;;  %v5307_v9 = vsel %vm1432_vm3, %v1331_v6, -1e+30  ;;  %vm1447_vm7 = vcmp.lt.s32.totalorder %v5220_v35, 600 }
 0x26b   : > { %v1335_v57 = vadd.f32 %v5184_v61, %v5119_v39  ;;  %v5331_v51 = vsel %vm1434_vm6, %v1333_v0, -1e+30  ;;  %v1500_v62 = vsel %vm1495_vm4, %v5287_v12, -inf  ;;  %vm1448_vm3 = vcmp.lt.s32.totalorder %v5224_v59, 600 }
 0x26c   : > { %v1499_v14 = vsel %vm1495_vm4, %v5331_v51, -inf  ;;  %vm1450_vm6 = vcmp.lt.s32.totalorder %v5234_v41, 600 }
 0x26d   : > { %v5337_v4 = vsel %vm1436_vm8, %v1335_v57, -1e+30  ;;  %vm1451_vm8 = vcmp.lt.s32.totalorder %v5240_v55, 600 }
 0x26f   : > { %v5121_v7 = vpop.xlane.xlu0 %1271 }
 0x270   : > { %v1336_v37 = vadd.f32 %v5184_v61, %v5121_v7  ;;  %v5321_v7 = vadd.s32 %v5134_v32, %v5104_v38 }
 0x272   : > { %v5123_v58 = vpop.xlane.xlu1 %1273  ;;  %v5342_v32 = vsel %vm1437_vm9, %v1336_v37, -1e+30  ;;  %vm1452_vm9 = vcmp.lt.s32.totalorder %v5244_v26, 600 }
 0x273   : > { %v1337_v39 = vadd.f32 %v5184_v61, %v5123_v58  ;;  %v1504_v49 = vsel %vm1495_vm4, %v5342_v32, -inf }
 0x275   : > { %v5346_v38 = vsel %vm1438_vm10, %v1337_v39, -1e+30  ;;  %vm1453_vm10 = vcmp.lt.s32.totalorder %v5248_v44, 600 }
 0x276   : > { %v1506_v0 = vsel %vm1495_vm4, %v5346_v38, -inf }
 0x277   : > { %v5125_v16 = vpop.xlane.xlu0 %1275 }
 0x278   : > { %v1338_v15 = vadd.f32 %v5184_v61, %v5125_v16 }
 0x27a   : > { %v5127_v20 = vpop.xlane.xlu1 %1277  ;;  %v5355_v27 = vsel %vm1439_vm11, %v1338_v15, -1e+30  ;;  %vm1454_vm11 = vcmp.lt.s32.totalorder %v5252_v17, 600 }
 0x27b   : > { %v1339_v25 = vadd.f32 %v5184_v61, %v5127_v20 }
 0x27d   : > { %v5359_v10 = vsel %vm1440_vm12, %v1339_v25, -1e+30  ;;  %vm1456_vm12 = vcmp.lt.s32.totalorder %v5268_v47, 600 }
 0x27e   : > { %v1510_v57 = vsel %vm1495_vm4, %v5359_v10, -inf }
 0x27f   : > { %v5130_v3 = vpop.xlane.xlu0 %1279 }
 0x280   : > { %v1340_v1 = vadd.f32 %v5184_v61, %v5130_v3  ;;  %v1497_v3 = vsel %vm1495_vm4, %v5307_v9, -inf }
 0x282   : > { %v5132_v40 = vpop.xlane.xlu1 %1281  ;;  %v5388_v37 = vsel %vm1441_vm13, %v1340_v1, -1e+30  ;;  %vm1455_vm13 = vcmp.lt.s32.totalorder %v5264_v52, 600 }
 0x283   : > { %v1341_v16 = vadd.f32 %v5184_v61, %v5132_v40  ;;  %v1498_v40 = vsel %vm1495_vm4, %v5311_v48, -inf }
 0x284   : > { %v1505_v30 = vmax.f32 %v1498_v40, %v1504_v49 }
 0x285   : > { %v5392_v39 = vsel %vm1442_vm14, %v1341_v16, -1e+30  ;;  %vm1457_vm14 = vcmp.lt.s32.totalorder %v5277_v46, 600  ;;  %v5530_v46 = vadd.s32 %v4857_v19, %v4842_v5 }
 0x287   : > { %v5136_v2 = vpop.xlane.xlu0 %1283 }
 0x288   : > { %v1342_v33 = vadd.f32 %v5184_v61, %v5136_v2  ;;  %v1501_v2 = vmax.f32 %v1496_v29, %v1500_v62 }
 0x28a   : > { %v5138_v34 = vpop.xlane.xlu1 %1285  ;;  %v5397_v15 = vsel %vm1443_vm15, %v1342_v33, -1e+30  ;;  %vm1458_vm15 = vcmp.lt.s32.totalorder %v5281_v63, 600 }
 0x28b   : > { %v1343_v13 = vadd.f32 %v5184_v61, %v5138_v34  ;;  %v1502_v34 = vsel %vm1495_vm4, %v5337_v4, -inf  ;;  %v1516_v40 = vsel %vm1495_vm4, %v5397_v15, -inf }
 0x28c   : > { %v1503_v1 = vmax.f32 %v1497_v3, %v1502_v34 }
 0x28d   : > { %v5401_v29 = vsel %vm1444_vm0, %v1343_v13, -1e+30  ;;  %v1507_v13 = vmax.f32 %v1499_v14, %v1506_v0  ;;  %vm1460_vm0 = vcmp.lt.s32.totalorder %v5303_v56, 600 }
 0x28e   : > { %v1511_v21 = vmax.f32 %v1503_v1, %v1510_v57 }
 0x28f   : > { %v5176_v36 = vpop.xlane.xlu0 %1287 }
 0x290   : > { %v1344_v28 = vadd.f32 %v5184_v61, %v5176_v36  ;;  %v1508_v36 = vsel %vm1495_vm4, %v5355_v27, -inf }
 0x292   : > { %v5178_v53 = vpop.xlane.xlu1 %1289  ;;  %v5409_v16 = vsel %vm1445_vm1, %v1344_v28, -1e+30  ;;  %v1518_v28 = vsel %vm1495_vm4, %v5401_v29, -inf  ;;  %vm1459_vm1 = vcmp.lt.s32.totalorder %v5299_v11, 600 }
 0x293   : > { %v1345_v62 = vadd.f32 %v5184_v61, %v5178_v53  ;;  %v1509_v53 = vmax.f32 %v1501_v2, %v1508_v36  ;;  %v1519_v1 = vmax.f32 %v1511_v21, %v1518_v28 }
 0x295   : > { %v5433_v14 = vsel %vm1446_vm2, %v1345_v62, -1e+30  ;;  %vm1461_vm2 = vcmp.lt.s32.totalorder %v5321_v7, 600 }
 0x297   : > { %v5206_v42 = vpop.xlane.xlu0 %1291 }
 0x298   : > { %v1346_v18 = vadd.f32 %v5184_v61, %v5206_v42  ;;  %v1512_v42 = vsel %vm1495_vm4, %v5388_v37, -inf }
 0x299   : > { %v1513_v49 = vmax.f32 %v1505_v30, %v1512_v42 }
 0x29a   : > { %v5208_v60 = vpop.xlane.xlu1 %1293  ;;  %v5437_v2 = vsel %vm1447_vm7, %v1346_v18, -1e+30  ;;  %v1517_v18 = vmax.f32 %v1509_v53, %v1516_v40  ;;  %vm1462_vm7 = vcmp.lt.s32.totalorder %v5325_v45, 600  ;;  %v5563_v45 = vsub.s32 0, %v4842_v5 }
 0x29b   : > { %v1347_v50 = vadd.f32 %v5184_v61, %v5208_v60  ;;  %v1514_v60 = vsel %vm1495_vm4, %v5392_v39, -inf }
 0x29c   : > { %v1515_v35 = vmax.f32 %v1507_v13, %v1514_v60 }
 0x29d   : > { %v5443_v0 = vsel %vm1448_vm3, %v1347_v50, -1e+30  ;;  %vm1744_vm3 = vcmask 0  }
 0x29e   : > { %v1526_v50 = vsel %vm1495_vm4, %v5443_v0, -inf }
 0x29f   : > { %v5258_v43 = vpop.xlane.xlu0 %1295 }
 0x2a0   : > { %v1348_v3 = vadd.f32 %v5184_v61, %v5258_v43  ;;  %v1520_v43 = vsel %vm1495_vm4, %v5409_v16, -inf }
 0x2a1   : > { %v1521_v30 = vmax.f32 %v1513_v49, %v1520_v43  ;;  %v1527_v43 = vmax.f32 %v1519_v1, %v1526_v50 }
 0x2a2   : > { %v5260_v23 = vpop.xlane.xlu1 %1297 }
 0x2a3   : > { %v1349_v34 = vadd.f32 %v5184_v61, %v5260_v23  ;;  %v5452_v23 = vsel %vm1449_vm5, %v1348_v3, -1e+30 }
 0x2a4   : > { %v1528_v53 = vsel %vm1495_vm4, %v5452_v23, -inf }
 0x2a5   : > { %v5464_v8 = vsel %vm1450_vm6, %v1349_v34, -1e+30 }
 0x2a7   : > { %v5315_v20 = vpop.xlane.xlu0 %1299 }
 0x2a8   : > { %v1350_v36 = vadd.f32 %v5184_v61, %v5315_v20  ;;  %v1522_v20 = vsel %vm1495_vm4, %v5433_v14, -inf }
 0x2a9   : > { %v1523_v28 = vmax.f32 %v1515_v35, %v1522_v20 }
 0x2aa   : > { %v5317_v58 = vpop.xlane.xlu1 %1301  ;;  %v5472_v42 = vsel %vm1451_vm8, %v1350_v36, -1e+30 }
 0x2ab   : > { %v1351_v22 = vadd.f32 %v5184_v61, %v5317_v58  ;;  %v1524_v58 = vsel %vm1495_vm4, %v5437_v2, -inf  ;;  %v1532_v34 = vsel %vm1495_vm4, %v5472_v42, -inf }
 0x2ac   : > { %v1525_v26 = vmax.f32 %v1517_v18, %v1524_v58 }
 0x2ad   : > { %v5476_v3 = vsel %vm1452_vm9, %v1351_v22, -1e+30  ;;  %v1529_v22 = vmax.f32 %v1521_v30, %v1528_v53 }
 0x2ae   : > { %v1533_v1 = vmax.f32 %v1525_v26, %v1532_v34 }
 0x2af   : > { %v1304_v25 = vpop.xlane.xlu0 %1303 }
 0x2b0   : > { %v1352_v59 = vadd.f32 %v5184_v61, %v1304_v25 }
 0x2b2   : > { %v1306_v6 = vpop.xlane.xlu1 %1305 }
 0x2b3   : > { %v1353_v13 = vadd.f32 %v5184_v61, %v1306_v6  ;;  %v5482_v6 = vsel %vm1453_vm10, %v1352_v59, -1e+30 }
 0x2b5   : > { %v5493_v44 = vsel %vm1454_vm11, %v1353_v13, -1e+30 }
 0x2b6   : > { %v1538_v30 = vsel %vm1495_vm4, %v5493_v44, -inf }
 0x2b7   : > { %v1308_v54 = vpop.xlane.xlu0 %1307 }
 0x2b8   : > { %v1354_v21 = vadd.f32 %v5184_v61, %v1308_v54  ;;  %v1530_v54 = vsel %vm1495_vm4, %v5464_v8, -inf }
 0x2b9   : > { %v1531_v17 = vmax.f32 %v1523_v28, %v1530_v54 }
 0x2ba   : > { %v1310_v33 = vpop.xlane.xlu1 %1309  ;;  %v5506_v35 = vsel %vm1455_vm13, %v1354_v21, -1e+30 }
 0x2bb   : > { %v1355_v25 = vadd.f32 %v5184_v61, %v1310_v33  ;;  %v1540_v56 = vsel %vm1495_vm4, %v5506_v35, -inf }
 0x2bd   : > { %v5497_v49 = vsel %vm1456_vm12, %v1355_v25, -1e+30 }
 0x2be   : > { %v1542_v52 = vsel %vm1495_vm4, %v5497_v49, -inf }
 0x2bf   : > { %v1312_v57 = vpop.xlane.xlu0 %1311 }
 0x2c0   : > { %v1356_v33 = vadd.f32 %v5184_v61, %v1312_v57  ;;  %v1534_v57 = vsel %vm1495_vm4, %v5476_v3, -inf }
 0x2c1   : > { %v1535_v63 = vmax.f32 %v1527_v43, %v1534_v57 }
 0x2c2   : > { %v1314_v62 = vpop.xlane.xlu1 %1313  ;;  %v5510_v18 = vsel %vm1457_vm14, %v1356_v33, -1e+30 }
 0x2c3   : > { %v1357_v55 = vadd.f32 %v5184_v61, %v1314_v62  ;;  %v1536_v62 = vsel %vm1495_vm4, %v5482_v6, -inf  ;;  %v1544_v25 = vsel %vm1495_vm4, %v5510_v18, -inf }
 0x2c4   : > { %v1537_v13 = vmax.f32 %v1529_v22, %v1536_v62 }
 0x2c5   : > { %v5514_v47 = vsel %vm1458_vm15, %v1357_v55, -1e+30  ;;  %v1541_v55 = vmax.f32 %v1533_v1, %v1540_v56  ;;  %v5560_v56 = vld [vmem:[#allocation2] sm:$0x1] }
 0x2c6   : > { %v1546_v53 = vsel %vm1495_vm4, %v5514_v47, -inf  ;;  %v1545_v26 = vmax.f32 %v1537_v13, %v1544_v25 }
 0x2c7   : > { %v1316_v41 = vpop.xlane.xlu0 %1315 }
 0x2c8   : > { %v1358_v36 = vadd.f32 %v5184_v61, %v1316_v41  ;;  %v1539_v41 = vmax.f32 %v1531_v17, %v1538_v30 }
 0x2ca   : > { %v1318_v60 = vpop.xlane.xlu1 %1317  ;;  %v5536_v58 = vsel %vm1459_vm1, %v1358_v36, -1e+30  ;;  %v1547_v43 = vmax.f32 %v1539_v41, %v1546_v53 }
 0x2cb   : > { %v1359_v40 = vadd.f32 %v5184_v61, %v1318_v60  ;;  %v1543_v60 = vmax.f32 %v1535_v63, %v1542_v52 }
 0x2cd   : > { %v5518_v59 = vsel %vm1460_vm0, %v1359_v40, -1e+30  ;;  %v1548_v40 = vsel %vm1495_vm4, %v5536_v58, -inf }
 0x2ce   : > { %v1550_v19 = vsel %vm1495_vm4, %v5518_v59, -inf  ;;  %v1549_v36 = vmax.f32 %v1541_v55, %v1548_v40 }
 0x2cf   : > { %v1320_v20 = vpop.xlane.xlu0 %1319  ;;  %v1551_v54 = vmax.f32 %v1543_v60, %v1550_v19 }
 0x2d0   : > { %v1360_v50 = vadd.f32 %v5184_v61, %v1320_v20 }
 0x2d1   : > { %v1556_v57 = vmax.f32 %v1549_v36, %v1551_v54 }
 0x2d2   : > { %v1322_v21 = vpop.xlane.xlu1 %1321  ;;  %v5547_v11 = vsel %vm1461_vm2, %v1360_v50, -1e+30 }
 0x2d3   : > { %v1361_v33 = vadd.f32 %v5184_v61, %v1322_v21  ;;  %v1552_v28 = vsel %vm1495_vm4, %v5547_v11, -inf }
 0x2d4   : > { %v1553_v22 = vmax.f32 %v1545_v26, %v1552_v28 }
 0x2d5   : > { %v5556_v34 = vsel %vm1462_vm7, %v1361_v33, -1e+30 }
 0x2d6   : > { %v1554_v7 = vsel %vm1495_vm4, %v5556_v34, -inf }
 0x2d7   : > { %v1555_v61 = vmax.f32 %v1547_v43, %v1554_v7 }
 0x2d9   : > { %v1557_v62 = vmax.f32 %v1553_v22, %v1555_v61 }
 0x2db   : > { %v1558_v17 = vmax.f32 %v1556_v57, %v1557_v62 }
 0x2dd   : > { %v1559_v1 = vrot.slane %v1558_v17, 4 }
 0x2df   : > { %v1560_v30 = vmax.f32 %v1558_v17, %v1559_v1 }
 0x2e1   : > { %v1561_v52 = vrot.slane %v1560_v30, 2 }
 0x2e3   : > { %v1562_v20 = vmax.f32 %v1560_v30, %v1561_v52 }
 0x2e5   : > { %v1563_v63 = vrot.slane %v1562_v20, 1 }
 0x2e7   : > { %v1564_v50 = vmax.f32 %v1562_v20, %v1563_v63 }
 0x2e9   : > { %v5566_v13 = vmax.f32 %v5560_v56, %v1564_v50 }
 0x2eb   : > { %v1567_v25 = vsub.f32 %v5560_v56, %v5566_v13  ;;  %1746 = vst.msk [vmem:[#allocation2] sm:$0x1] %vm1744_vm3, %v5566_v13  ;;  %v5574_v53 = vrot.slane %v5566_v13, %v5563_v45 }
 0x2ed   : > { %v1576_v19 = vsub.f32 %v5284_v31, %v5574_v53  ;;  %v1577_v21 = vsub.f32 %v5307_v9, %v5574_v53  ;;  %v1578_v41 = vsub.f32 %v5311_v48, %v5574_v53  ;;  %v1579_v60 = vsub.f32 %v5331_v51, %v5574_v53 }
 0x2ee   : > { %v1580_v33 = vsub.f32 %v5287_v12, %v5574_v53  ;;  %v1581_v28 = vsub.f32 %v5337_v4, %v5574_v53  ;;  %v1582_v31 = vsub.f32 %v5342_v32, %v5574_v53  ;;  %v1583_v48 = vsub.f32 %v5346_v38, %v5574_v53 }
 0x2ef   : > { %v1608_v55 = vmul.f32 1.442695, %v1576_v19  ;;  %v1610_v40 = vmul.f32 1.442695, %v1577_v21  ;;  %v1612_v26 = vmul.f32 1.442695, %v1578_v41  ;;  %v1584_v12 = vsub.f32 %v5355_v27, %v5574_v53 }
 0x2f0   : > { %v1614_v43 = vmul.f32 1.442695, %v1579_v60  ;;  %v1616_v9 = vmul.f32 1.442695, %v1580_v33  ;;  %v1618_v51 = vmul.f32 1.442695, %v1581_v28  ;;  %v1585_v4 = vsub.f32 %v5359_v10, %v5574_v53 }
 0x2f1   : > { %3946 = vpow2.f32 %v1608_v55  ;;  %v1620_v54 = vmul.f32 1.442695, %v1582_v31  ;;  %v1622_v7 = vmul.f32 1.442695, %v1583_v48  ;;  %v1586_v32 = vsub.f32 %v5388_v37, %v5574_v53 }
 0x2f2   : > { %3948 = vpow2.f32 %v1610_v40  ;;  %v1624_v36 = vmul.f32 1.442695, %v1584_v12  ;;  %v1587_v61 = vsub.f32 %v5392_v39, %v5574_v53  ;;  %v1626_v27 = vmul.f32 1.442695, %v1585_v4 }
 0x2f3   : > { %3950 = vpow2.f32 %v1612_v26  ;;  %v1588_v17 = vsub.f32 %v5397_v15, %v5574_v53  ;;  %v1628_v1 = vmul.f32 1.442695, %v1586_v32  ;;  %v1589_v20 = vsub.f32 %v5401_v29, %v5574_v53 }
 0x2f4   : > { %3952 = vpow2.f32 %v1614_v43  ;;  %v1630_v63 = vmul.f32 1.442695, %v1587_v61  ;;  %v1590_v15 = vsub.f32 %v5409_v16, %v5574_v53  ;;  %v1591_v29 = vsub.f32 %v5433_v14, %v5574_v53 }
 0x2f5   : > { %3954 = vpow2.f32 %v1616_v9  ;;  %v1632_v41 = vmul.f32 1.442695, %v1588_v17  ;;  %v1634_v40 = vmul.f32 1.442695, %v1589_v20  ;;  %v1592_v16 = vsub.f32 %v5437_v2, %v5574_v53 }
 0x2f6   : > { %3956 = vpow2.f32 %v1618_v51  ;;  %v1636_v31 = vmul.f32 1.442695, %v1590_v15  ;;  %v1593_v14 = vsub.f32 %v5443_v0, %v5574_v53  ;;  %v1638_v12 = vmul.f32 1.442695, %v1591_v29 }
 0x2f7   : > { %3958 = vpow2.f32 %v1620_v54  ;;  %v1594_v2 = vsub.f32 %v5452_v23, %v5574_v53  ;;  %v1640_v32 = vmul.f32 1.442695, %v1592_v16  ;;  %v1595_v0 = vsub.f32 %v5464_v8, %v5574_v53 }
 0x2f8   : > { %3960 = vpow2.f32 %v1622_v7  ;;  %v1596_v23 = vsub.f32 %v5472_v42, %v5574_v53  ;;  %v1597_v8 = vsub.f32 %v5476_v3, %v5574_v53  ;;  %v1598_v42 = vsub.f32 %v5482_v6, %v5574_v53 }
 0x2f9   : > { %3962 = vpow2.f32 %v1624_v36  ;;  %v1599_v3 = vsub.f32 %v5493_v44, %v5574_v53  ;;  %v1600_v6 = vsub.f32 %v5506_v35, %v5574_v53  ;;  %v1601_v44 = vsub.f32 %v5497_v49, %v5574_v53 }
 0x2fa   : > { %3964 = vpow2.f32 %v1626_v27  ;;  %v1602_v35 = vsub.f32 %v5510_v18, %v5574_v53  ;;  %v1603_v49 = vsub.f32 %v5514_v47, %v5574_v53  ;;  %v1604_v18 = vsub.f32 %v5536_v58, %v5574_v53 }
 0x2fb   : > { %v5598_v22 = vpop.eup %3946  ;;  %3966 = vpow2.f32 %v1628_v1  ;;  %v1605_v47 = vsub.f32 %v5518_v59, %v5574_v53  ;;  %v1606_v58 = vsub.f32 %v5547_v11, %v5574_v53  ;;  %v1607_v59 = vsub.f32 %v5556_v34, %v5574_v53 }
 0x2fc   : > { %v5600_v38 = vpop.eup %3948  ;;  %v1674_v57 = vsel %vm1495_vm4, %v5598_v22, 0.0  ;;  %3968 = vpow2.f32 %v1630_v63 }
 0x2fd   : > { %v5606_v10 = vpop.eup %3950  ;;  %v1675_v62 = vsel %vm1495_vm4, %v5600_v38, 0.0  ;;  %3970 = vpow2.f32 %v1632_v41  ;;  %v1668_v11 = vmul.f32 1.442695, %v1606_v58 }
 0x2fe   : > { %v5610_v37 = vpop.eup %3952  ;;  %v1676_v30 = vadd.f32 %v1675_v62, %v1674_v57  ;;  %v1677_v39 = vsel %vm1495_vm4, %v5606_v10, 0.0  ;;  %3972 = vpow2.f32 %v1634_v40  ;;  %v1642_v57 = vmul.f32 1.442695, %v1593_v14 }
 0x2ff   : > { %v5616_v52 = vpop.eup %3954  ;;  %v1679_v19 = vsel %vm1495_vm4, %v5610_v37, 0.0  ;;  %3974 = vpow2.f32 %v1636_v31 }
 0x300   : > { %v1678_v50 = vadd.f32 %v1677_v39, %v1676_v30  ;;  %v5622_v21 = vpop.eup %3956  ;;  %v1681_v33 = vsel %vm1495_vm4, %v5616_v52, 0.0  ;;  %3976 = vpow2.f32 %v1638_v12  ;;  %v1644_v30 = vmul.f32 1.442695, %v1594_v2 }
 0x301   : > { %v5628_v55 = vpop.eup %3958  ;;  %v1683_v26 = vsel %vm1495_vm4, %v5622_v21, 0.0  ;;  %3978 = vpow2.f32 %v1640_v32 }
 0x302   : > { %v1680_v60 = vadd.f32 %v1679_v19, %v1678_v50  ;;  %v5634_v43 = vpop.eup %3960  ;;  %v1685_v48 = vsel %vm1495_vm4, %v5628_v55, 0.0  ;;  %3980 = vpow2.f32 %v1642_v57  ;;  %v1646_v50 = vmul.f32 1.442695, %v1595_v0 }
 0x303   : > { %v5640_v51 = vpop.eup %3962  ;;  %v1687_v4 = vsel %vm1495_vm4, %v5634_v43, 0.0  ;;  %3982 = vpow2.f32 %v1644_v30 }
 0x304   : > { %v1682_v28 = vadd.f32 %v1681_v33, %v1680_v60  ;;  %v5646_v7 = vpop.eup %3964  ;;  %v1689_v61 = vsel %vm1495_vm4, %v5640_v51, 0.0  ;;  %v1648_v60 = vmul.f32 1.442695, %v1596_v23  ;;  %3984 = vpow2.f32 %v1646_v50 }
 0x305   : > { %v5652_v27 = vpop.eup %3966  ;;  %v1691_v17 = vsel %vm1495_vm4, %v5646_v7, 0.0 }
 0x306   : > { %v1684_v9 = vadd.f32 %v1683_v26, %v1682_v28  ;;  %v5658_v1 = vpop.eup %3968  ;;  %v1693_v20 = vsel %vm1495_vm4, %v5652_v27, 0.0  ;;  %v1650_v28 = vmul.f32 1.442695, %v1597_v8  ;;  %3986 = vpow2.f32 %v1648_v60 }
 0x307   : > { %v5664_v63 = vpop.eup %3970  ;;  %v1695_v15 = vsel %vm1495_vm4, %v5658_v1, 0.0 }
 0x308   : > { %v1686_v54 = vadd.f32 %v1685_v48, %v1684_v9  ;;  %v5670_v41 = vpop.eup %3972  ;;  %v1697_v29 = vsel %vm1495_vm4, %v5664_v63, 0.0  ;;  %v1652_v9 = vmul.f32 1.442695, %v1598_v42  ;;  %3988 = vpow2.f32 %v1650_v28 }
 0x309   : > { %v5676_v40 = vpop.eup %3974  ;;  %v1699_v16 = vsel %vm1495_vm4, %v5670_v41, 0.0 }
 0x30a   : > { %v1688_v36 = vadd.f32 %v1687_v4, %v1686_v54  ;;  %v5682_v31 = vpop.eup %3976  ;;  %v1701_v14 = vsel %vm1495_vm4, %v5676_v40, 0.0  ;;  %v1654_v54 = vmul.f32 1.442695, %v1599_v3  ;;  %3990 = vpow2.f32 %v1652_v9 }
 0x30b   : > { %v5688_v12 = vpop.eup %3978  ;;  %v1703_v2 = vsel %vm1495_vm4, %v5682_v31, 0.0 }
 0x30c   : > { %v1690_v62 = vadd.f32 %v1689_v61, %v1688_v36  ;;  %v5694_v32 = vpop.eup %3980  ;;  %v1656_v36 = vmul.f32 1.442695, %v1600_v6  ;;  %v1705_v0 = vsel %vm1495_vm4, %v5688_v12, 0.0  ;;  %3992 = vpow2.f32 %v1654_v54 }
 0x30d   : > { %v5700_v57 = vpop.eup %3982  ;;  %v1707_v23 = vsel %vm1495_vm4, %v5694_v32, 0.0  ;;  %v1670_v54 = vmul.f32 1.442695, %v1607_v59 }
 0x30e   : > { %v1692_v39 = vadd.f32 %v1691_v17, %v1690_v62  ;;  %v1658_v62 = vmul.f32 1.442695, %v1601_v44  ;;  %v5706_v30 = vpop.eup %3984  ;;  %3994 = vpow2.f32 %v1656_v36  ;;  %v1709_v8 = vsel %vm1495_vm4, %v5700_v57, 0.0 }
 0x30f   : > { %v1711_v42 = vsel %vm1495_vm4, %v5706_v30, 0.0 }
 0x310   : > { %v1694_v19 = vadd.f32 %v1693_v20, %v1692_v39  ;;  %v1660_v39 = vmul.f32 1.442695, %v1602_v35  ;;  %v5712_v50 = vpop.eup %3986  ;;  %3996 = vpow2.f32 %v1658_v62 }
 0x311   : > { %v1713_v3 = vsel %vm1495_vm4, %v5712_v50, 0.0 }
 0x312   : > { %v1696_v33 = vadd.f32 %v1695_v15, %v1694_v19  ;;  %v1662_v19 = vmul.f32 1.442695, %v1603_v49  ;;  %v5718_v60 = vpop.eup %3988  ;;  %3998 = vpow2.f32 %v1660_v39 }
 0x313   : > { %v1715_v6 = vsel %vm1495_vm4, %v5718_v60, 0.0 }
 0x314   : > { %v1698_v26 = vadd.f32 %v1697_v29, %v1696_v33  ;;  %v1664_v33 = vmul.f32 1.442695, %v1604_v18  ;;  %v5724_v28 = vpop.eup %3990  ;;  %4000 = vpow2.f32 %v1662_v19 }
 0x316   : > { %v1700_v48 = vadd.f32 %v1699_v16, %v1698_v26  ;;  %v1666_v26 = vmul.f32 1.442695, %v1605_v47  ;;  %v5730_v9 = vpop.eup %3992  ;;  %4002 = vpow2.f32 %v1664_v33 }
 0x317   : > { %v1719_v34 = vsel %vm1495_vm4, %v5730_v9, 0.0 }
 0x318   : > { %v1702_v4 = vadd.f32 %v1701_v14, %v1700_v48  ;;  %v1717_v14 = vsel %vm1495_vm4, %v5724_v28, 0.0  ;;  %v5734_v44 = vpop.eup %3994  ;;  %4004 = vpow2.f32 %v1666_v26 }
 0x319   : > { %4006 = vpow2.f32 %v1668_v11  ;;  %v1721_v35 = vsel %vm1495_vm4, %v5734_v44, 0.0 }
 0x31a   : > { %v1704_v61 = vadd.f32 %v1703_v2, %v1702_v4  ;;  %v5738_v53 = vpop.eup %3996  ;;  %4008 = vpow2.f32 %v1670_v54 }
 0x31c   : > { %v1706_v17 = vadd.f32 %v1705_v0, %v1704_v61  ;;  %v5742_v36 = vpop.eup %3998  ;;  %v1723_v0 = vsel %vm1495_vm4, %v5738_v53, 0.0 }
 0x31e   : > { %v1708_v20 = vadd.f32 %v1707_v23, %v1706_v17  ;;  %v5746_v49 = vpop.eup %4000  ;;  %v1725_v17 = vsel %vm1495_vm4, %v5742_v36, 0.0 }
 0x31f   : > { %v1727_v39 = vsel %vm1495_vm4, %v5746_v49, 0.0 }
 0x320   : > { %v1710_v15 = vadd.f32 %v1709_v8, %v1708_v20  ;;  %v5750_v23 = vpop.eup %4002 }
 0x321   : > { %v1729_v47 = vsel %vm1495_vm4, %v5750_v23, 0.0 }
 0x322   : > { %v1712_v29 = vadd.f32 %v1711_v42, %v1710_v15  ;;  %v5754_v20 = vpop.eup %4004  ;;  %v1568_v42 = vmul.f32 1.442695, %v1567_v25  ;;  %v1672_v25 = vld [vmem:[#allocation3] sm:$0x1] }
 0x323   : > { %v5758_v19 = vpop.eup %4006  ;;  %v1731_v58 = vsel %vm1495_vm4, %v5754_v20, 0.0 }
 0x324   : > { %v1714_v16 = vadd.f32 %v1713_v3, %v1712_v29  ;;  %v5765_v33 = vpop.eup %4008  ;;  %v1733_v3 = vsel %vm1495_vm4, %v5758_v19, 0.0  ;;  %4010 = vpow2.f32 %v1568_v42  ;;  %v1802_v42 = vld [vmem:[%s4655_s28 + $0x68] sm:$0xff] (!%p3029_p9) }
 0x325   : > { %v1735_v26 = vsel %vm1495_vm4, %v5765_v33, 0.0 }
 0x326   : > { %v1716_v48 = vadd.f32 %v1715_v6, %v1714_v16 }
 0x328   : > { %v1718_v4 = vadd.f32 %v1717_v14, %v1716_v48 }
 0x32a   : > { %v1720_v2 = vadd.f32 %v1719_v34, %v1718_v4 }
 0x32c   : > { %v1722_v61 = vadd.f32 %v1721_v35, %v1720_v2  ;;  %v4012_v2 = vpack.i.bf16 (!%p3029_p9), %v5598_v22, %v5688_v12  ;;  %v1790_v35 = vld [vmem:[%s4655_s28 + $0x8] sm:$0xff] (!%p3029_p9) }
 0x32e   : > { %v1724_v62 = vadd.f32 %v1723_v0, %v1722_v61  ;;  %v5771_v13 = vpop.eup %4010  ;;  %v1794_v61 = vld [vmem:[%s4655_s28 + $0x28] sm:$0xff] (!%p3029_p9)  ;;  %v1792_v0 = vld [vmem:[%s4655_s28 + $0x18] sm:$0xff] (!%p3029_p9)  ;;  %4013 = vxpose.xlu0.b32.start [1/16] (narrow) (!%p3029_p9), %v4012_v2, 8 }
 0x32f   : > { %v1673_v54 = vmul.f32 %v5771_v13, %v1672_v25  ;;  %v1808_v2 = vld [vmem:[%s4655_s28 + $0x98] sm:$0xff] (!%p3029_p9) }
 0x330   : > { %v1726_v18 = vadd.f32 %v1725_v17, %v1724_v62  ;;  %v1796_v62 = vld [vmem:[%s4655_s28 + $0x38] sm:$0xff] (!%p3029_p9)  ;;  %v1789_v17 = vld [vmem:[%s4655_s28] sm:$0xff] (!%p3029_p9) }
 0x332   : > { %v1728_v8 = vadd.f32 %v1727_v39, %v1726_v18  ;;  %v1793_v18 = vld [vmem:[%s4655_s28 + $0x20] sm:$0xff] (!%p3029_p9)  ;;  %v4014_v39 = vpack.i.bf16 (!%p3029_p9), %v5600_v38, %v5694_v32 }
 0x334   : > { %v1730_v15 = vadd.f32 %v1729_v47, %v1728_v8  ;;  %v1791_v8 = vld [vmem:[%s4655_s28 + $0x10] sm:$0xff] (!%p3029_p9)  ;;  %4015 = vxpose.xlu0.b32.cont [2/16] (narrow) (!%p3029_p9), %v4014_v39, 8 }
 0x335   : > { %v1795_v47 = vld [vmem:[%s4655_s28 + $0x30] sm:$0xff] (!%p3029_p9) }
 0x336   : > { %v1732_v29 = vadd.f32 %v1731_v58, %v1730_v15  ;;  %v1798_v15 = vld [vmem:[%s4655_s28 + $0x48] sm:$0xff] (!%p3029_p9)  ;;  %v1800_v58 = vld [vmem:[%s4655_s28 + $0x58] sm:$0xff] (!%p3029_p9)  ;;  %v1807_v39 = vld [vmem:[%s4655_s28 + $0x90] sm:$0xff] (!%p3029_p9) }
 0x338   : > { %v1734_v59 = vadd.f32 %v1733_v3, %v1732_v29  ;;  %v1804_v29 = vld [vmem:[%s4655_s28 + $0x78] sm:$0xff] (!%p3029_p9)  ;;  %v3393_v3 = vpack.c.bf16 (!%p3029_p9), %v1794_v61, %v1790_v35 }
 0x339   : > { %v3461_v25 = vpack.c.bf16 (!%p3029_p9), %v1804_v29, %v1800_v58  ;;  %v1812_v35 = vld [vmem:[%s4655_s28 + $0xb8] sm:$0xff] (!%p3029_p9)  ;;  %v4344_v58 = vmov (!%p3029_p9), 0   ;;  %v4018_v29 = vpack.i.bf16 (!%p3029_p9), %v5610_v37, %v5706_v30 }
 0x33a   : > { %v1736_v16 = vadd.f32 %v1735_v26, %v1734_v59  ;;  %v3457_v59 = vpack.c.bf16 (!%p3029_p9), %v1796_v62, %v1792_v0  ;;  %v3395_v26 = vpack.c.bf16 (!%p3029_p9), %v1793_v18, %v1789_v17  ;;  %3394 = vmatprep.subr.bf16.mxu0 (!%p3029_p9), %v3393_v3  ;;  %v1805_v17 = vld [vmem:[%s4655_s28 + $0x80] sm:$0xff] (!%p3029_p9)  ;;  %4049 = vset.pattern.permute.xlu1 (!%p3029_p9), %v4344_v58  ;;  %v1816_v3 = vld [vmem:[%s4655_s28 + $0xd8] sm:$0xff] (!%p3029_p9) }
 0x33b   : > { %v1809_v18 = vld [vmem:[%s4655_s28 + $0xa0] sm:$0xff] (!%p3029_p9)  ;;  %1920 = vperm.xlu1 (!%p3029_p9), %4049, %v5771_v13  }
 0x33c   : > { %v1737_v6 = vrot.slane %v1736_v16, 4  ;;  %3458 = vmatprep.subr.bf16.mxu1 (!%p3029_p9), %v3457_v59  ;;  %3396 = vmatpush1.bf16.msra.mxu0 (!%p3029_p9), %v3395_v26  ;;  %v1820_v59 = vld [vmem:[%s4655_s28 + $0xf8] sm:$0xff] (!%p3029_p9)  ;;  %v3403_v26 = vpack.c.bf16 (!%p3029_p9), %v1809_v18, %v1805_v17  ;;  %v1821_v17 = vld [vmem:[%s4655_s28 + $0x100] sm:$0xff] (!%p3029_p9) }
 0x33d   : > { %v1825_v18 = vld [vmem:[%s4655_s28 + $0x120] sm:$0xff] (!%p3029_p9) }
 0x33e   : > { %v1738_v11 = vadd.f32 %v1737_v6, %v1736_v16  ;;  %v3459_v16 = vpack.c.bf16 (!%p3029_p9), %v1795_v47, %v1791_v8  ;;  %v1797_v6 = vld [vmem:[%s4655_s28 + $0x40] sm:$0xff] (!%p3029_p9)  ;;  %v3465_v8 = vpack.c.bf16 (!%p3029_p9), %v1812_v35, %v1808_v2  ;;  %v1811_v47 = vld [vmem:[%s4655_s28 + $0xb0] sm:$0xff] (!%p3029_p9)  ;;  %v1824_v2 = vld [vmem:[%s4655_s28 + $0x118] sm:$0xff] (!%p3029_p9) }
 0x33f   : > { %v1828_v35 = vld [vmem:[%s4655_s28 + $0x138] sm:$0xff] (!%p3029_p9) }
 0x340   : > { %v1739_v48 = vrot.slane %v1738_v11, 2  ;;  %3460 = vmatpush1.bf16.msra.mxu1 (!%p3029_p9), %v3459_v16  ;;  %v3467_v16 = vpack.c.bf16 (!%p3029_p9), %v1811_v47, %v1807_v39  ;;  %v1823_v39 = vld [vmem:[%s4655_s28 + $0x110] sm:$0xff] (!%p3029_p9) }
 0x341   : > { %3462 = vmatprep.subr.bf16.mxu1 (!%p3029_p9), %v3461_v25  ;;  %v3469_v25 = vpack.c.bf16 (!%p3029_p9), %v1820_v59, %v1816_v3  ;;  %v1827_v47 = vld [vmem:[%s4655_s28 + $0x130] sm:$0xff] (!%p3029_p9)  ;;  %v1832_v3 = vld [vmem:[%s4655_s28 + $0x158] sm:$0xff] (!%p3029_p9) }
 0x342   : > { %v1740_v56 = vadd.f32 %v1739_v48, %v1738_v11  ;;  %v1801_v11 = vld [vmem:[%s4655_s28 + $0x60] sm:$0xff] (!%p3029_p9)  ;;  %v1799_v48 = vld [vmem:[%s4655_s28 + $0x50] sm:$0xff] (!%p3029_p9)  ;;  %v1836_v59 = vld [vmem:[%s4655_s28 + $0x178] sm:$0xff] (!%p3029_p9) }
 0x343   : > { %v3399_v61 = vpack.c.bf16 (!%p3029_p9), %v1801_v11, %v1797_v6  ;;  %v1813_v11 = vld [vmem:[%s4655_s28 + $0xc0] sm:$0xff] (!%p3029_p9) }
 0x344   : > { %v1741_v14 = vrot.slane %v1740_v56, 1  ;;  %1788 = sbr.rel (%p3029_p9) target bundleno = 1192 (0x4a8), region = 64 }
 0x346   : > { %v1742_v4 = vadd.f32 %v1741_v14, %v1740_v56  ;;  %v3397_v56 = vpack.c.bf16 (!%p3029_p9), %v1802_v42, %v1798_v15  ;;  %v1803_v14 = vld [vmem:[%s4655_s28 + $0x70] sm:$0xff] (!%p3029_p9)  ;;  %v1814_v15 = vld [vmem:[%s4655_s28 + $0xc8] sm:$0xff] (!%p3029_p9) }
 0x347   : > { %v3463_v0 = vpack.c.bf16 (!%p3029_p9), %v1803_v14, %v1799_v48  ;;  %v1818_v42 = vld [vmem:[%s4655_s28 + $0xe8] sm:$0xff] (!%p3029_p9)  ;;  %v1817_v48 = vld [vmem:[%s4655_s28 + $0xe0] sm:$0xff] (!%p3029_p9)  ;;  %v1819_v14 = vld [vmem:[%s4655_s28 + $0xf0] sm:$0xff] (!%p3029_p9) }
 0x348   : > { %v1743_v34 = vadd.f32 %v1742_v4, %v1673_v54  ;;  %v1806_v54 = vld [vmem:[%s4655_s28 + $0x88] sm:$0xff] (!%p3029_p9)  ;;  %3398 = vmatprep.subr.bf16.mxu0 (!%p3029_p9), %v3397_v56  ;;  %v3405_v6 = vpack.c.bf16 (!%p3029_p9), %v1818_v42, %v1814_v15  ;;  %v1815_v56 = vld [vmem:[%s4655_s28 + $0xd0] sm:$0xff] (!%p3029_p9) }
 0x349   : > { %v1810_v4 = vld [vmem:[%s4655_s28 + $0xa8] sm:$0xff] (!%p3029_p9)  ;;  %3400 = vmatpush1.bf16.msra.mxu0 (!%p3029_p9), %v3399_v61  ;;  %3464 = vmatpush1.bf16.msra.mxu1 (!%p3029_p9), %v3463_v0  ;;  %v3407_v61 = vpack.c.bf16 (!%p3029_p9), %v1817_v48, %v1813_v11  ;;  %v3471_v0 = vpack.c.bf16 (!%p3029_p9), %v1819_v14, %v1815_v56  ;;  %v1829_v11 = vld [vmem:[%s4655_s28 + $0x140] sm:$0xff] (!%p3029_p9)  ;;  %v1831_v56 = vld [vmem:[%s4655_s28 + $0x150] sm:$0xff] (!%p3029_p9) }
 0x34a   : > { %1745 = vst.msk [vmem:[#allocation3] sm:$0x1] %vm1744_vm3, %v1743_v34  ;;  %v4016_v34 = vpack.i.bf16 (!%p3029_p9), %v5606_v10, %v5700_v57  ;;  %v3401_v62 = vpack.c.bf16 (!%p3029_p9), %v1810_v4, %v1806_v54  ;;  %3466 = vmatprep.subr.bf16.mxu1 (!%p3029_p9), %v3465_v8  ;;  %v1822_v54 = vld [vmem:[%s4655_s28 + $0x108] sm:$0xff] (!%p3029_p9)  ;;  %v3473_v8 = vpack.c.bf16 (!%p3029_p9), %v1828_v35, %v1824_v2  ;;  %v1833_v48 = vld [vmem:[%s4655_s28 + $0x160] sm:$0xff] (!%p3029_p9)  ;;  %v1835_v14 = vld [vmem:[%s4655_s28 + $0x170] sm:$0xff] (!%p3029_p9) }
 0x34b   : > { %v1826_v4 = vld [vmem:[%s4655_s28 + $0x128] sm:$0xff]  ;;  %v1840_v2 = vld [vmem:[%s4655_s28 + $0x198] sm:$0xff] }
 0x34c   : > { %4017 = vxpose.xlu0.b32.cont [3/16] (narrow) %v4016_v34, 8  ;;  %3402 = vmatprep.subr.bf16.mxu0 %v3401_v62  ;;  %v4020_v34 = vpack.i.bf16 %v5616_v52, %v5712_v50  ;;  %v3409_v62 = vpack.c.bf16 %v1826_v4, %v1822_v54  ;;  %v1830_v15 = vld [vmem:[%s4655_s28 + $0x148] sm:$0xff]  ;;  %v1844_v35 = vld [vmem:[%s4655_s28 + $0x1b8] sm:$0xff] }
 0x34d   : > { %3404 = vmatpush1.bf16.msra.mxu0 %v3403_v26  ;;  %3468 = vmatpush1.bf16.msra.mxu1 %v3467_v16  ;;  %v1834_v42 = vld [vmem:[%s4655_s28 + $0x168] sm:$0xff]  ;;  %v3411_v26 = vpack.c.bf16 %v1825_v18, %v1821_v17  ;;  %v3475_v16 = vpack.c.bf16 %v1827_v47, %v1823_v39  ;;  %v1837_v17 = vld [vmem:[%s4655_s28 + $0x180] sm:$0xff]  ;;  %v1839_v39 = vld [vmem:[%s4655_s28 + $0x190] sm:$0xff] }
 0x34e   : > { %3406 = vmatprep.subr.bf16.mxu0 %v3405_v6  ;;  %3470 = vmatprep.subr.bf16.mxu1 %v3469_v25  ;;  %v3413_v6 = vpack.c.bf16 %v1834_v42, %v1830_v15  ;;  %v3477_v25 = vpack.c.bf16 %v1836_v59, %v1832_v3  ;;  %v1838_v54 = vld [vmem:[%s4655_s28 + $0x188] sm:$0xff]  ;;  %v1841_v18 = vld [vmem:[%s4655_s28 + $0x1a0] sm:$0xff]  ;;  %v1843_v47 = vld [vmem:[%s4655_s28 + $0x1b0] sm:$0xff] }
 0x34f   : > { %v1842_v4 = vld [vmem:[%s4655_s28 + $0x1a8] sm:$0xff]  ;;  %v1848_v3 = vld [vmem:[%s4655_s28 + $0x1d8] sm:$0xff] }
 0x350   : > { %4019 = vxpose.xlu0.b32.cont [4/16] (narrow) %v4018_v29, 8  ;;  %v4022_v29 = vpack.i.bf16 %v5622_v21, %v5718_v60  ;;  %v1846_v15 = vld [vmem:[%s4655_s28 + $0x1c8] sm:$0xff]  ;;  %v1852_v59 = vld [vmem:[%s4655_s28 + $0x1f8] sm:$0xff] }
 0x351   : > { %3408 = vmatpush1.bf16.msra.mxu0 %v3407_v61  ;;  %3472 = vmatpush1.bf16.msra.mxu1 %v3471_v0  ;;  %v3415_v61 = vpack.c.bf16 %v1833_v48, %v1829_v11  ;;  %v3479_v0 = vpack.c.bf16 %v1835_v14, %v1831_v56  ;;  %v1850_v42 = vld [vmem:[%s4655_s28 + $0x1e8] sm:$0xff]  ;;  %v1845_v11 = vld [vmem:[%s4655_s28 + $0x1c0] sm:$0xff]  ;;  %v1847_v56 = vld [vmem:[%s4655_s28 + $0x1d0] sm:$0xff] }
 0x352   : > { %3410 = vmatprep.subr.bf16.mxu0 %v3409_v62  ;;  %3474 = vmatprep.subr.bf16.mxu1 %v3473_v8  ;;  %v3417_v62 = vpack.c.bf16 %v1842_v4, %v1838_v54  ;;  %v3481_v8 = vpack.c.bf16 %v1844_v35, %v1840_v2  ;;  %v1849_v48 = vld [vmem:[%s4655_s28 + $0x1e0] sm:$0xff]  ;;  %v1851_v14 = vld [vmem:[%s4655_s28 + $0x1f0] sm:$0xff]  ;;  %v1854_v54 = vld [vmem:[%s4655_s28 + $0x208] sm:$0xff] }
 0x353   : > { %v1858_v4 = vld [vmem:[%s4655_s28 + $0x228] sm:$0xff]  ;;  %v1856_v2 = vld [vmem:[%s4655_s28 + $0x218] sm:$0xff] }
 0x354   : > { %4021 = vxpose.xlu0.b32.cont [5/16] (narrow) %v4020_v34, 8  ;;  %v4024_v34 = vpack.i.bf16 %v5628_v55, %v5724_v28  ;;  %v1860_v35 = vld [vmem:[%s4655_s28 + $0x238] sm:$0xff] }
 0x355   : > { %3412 = vmatpush1.bf16.msra.mxu0 %v3411_v26  ;;  %3476 = vmatpush1.bf16.msra.mxu1 %v3475_v16  ;;  %v3419_v26 = vpack.c.bf16 %v1841_v18, %v1837_v17  ;;  %v3483_v16 = vpack.c.bf16 %v1843_v47, %v1839_v39  ;;  %v1853_v17 = vld [vmem:[%s4655_s28 + $0x200] sm:$0xff]  ;;  %v1855_v39 = vld [vmem:[%s4655_s28 + $0x210] sm:$0xff] }
 0x356   : > { %3414 = vmatprep.subr.bf16.mxu0 %v3413_v6  ;;  %3478 = vmatprep.subr.bf16.mxu1 %v3477_v25  ;;  %v3421_v6 = vpack.c.bf16 %v1850_v42, %v1846_v15  ;;  %v3485_v25 = vpack.c.bf16 %v1852_v59, %v1848_v3  ;;  %v1857_v18 = vld [vmem:[%s4655_s28 + $0x220] sm:$0xff]  ;;  %v1859_v47 = vld [vmem:[%s4655_s28 + $0x230] sm:$0xff]  ;;  %v1862_v15 = vld [vmem:[%s4655_s28 + $0x248] sm:$0xff] }
 0x357   : > { %v1866_v42 = vld [vmem:[%s4655_s28 + $0x268] sm:$0xff]  ;;  %v1864_v3 = vld [vmem:[%s4655_s28 + $0x258] sm:$0xff] }
 0x358   : > { %4023 = vxpose.xlu0.b32.cont [6/16] (narrow) %v4022_v29, 8  ;;  %v4026_v29 = vpack.i.bf16 %v5634_v43, %v5730_v9  ;;  %v1868_v59 = vld [vmem:[%s4655_s28 + $0x278] sm:$0xff] }
 0x359   : > { %3416 = vmatpush1.bf16.msra.mxu0 %v3415_v61  ;;  %3480 = vmatpush1.bf16.msra.mxu1 %v3479_v0  ;;  %v3423_v61 = vpack.c.bf16 %v1849_v48, %v1845_v11  ;;  %v3487_v0 = vpack.c.bf16 %v1851_v14, %v1847_v56  ;;  %v1861_v11 = vld [vmem:[%s4655_s28 + $0x240] sm:$0xff]  ;;  %v1863_v56 = vld [vmem:[%s4655_s28 + $0x250] sm:$0xff] }
 0x35a   : > { %3418 = vmatprep.subr.bf16.mxu0 %v3417_v62  ;;  %3482 = vmatprep.subr.bf16.mxu1 %v3481_v8  ;;  %v3425_v62 = vpack.c.bf16 %v1858_v4, %v1854_v54  ;;  %v3489_v8 = vpack.c.bf16 %v1860_v35, %v1856_v2  ;;  %v1865_v48 = vld [vmem:[%s4655_s28 + $0x260] sm:$0xff]  ;;  %v1867_v14 = vld [vmem:[%s4655_s28 + $0x270] sm:$0xff]  ;;  %v1870_v54 = vld [vmem:[%s4655_s28 + $0x288] sm:$0xff] }
 0x35b   : > { %v1874_v4 = vld [vmem:[%s4655_s28 + $0x2a8] sm:$0xff]  ;;  %v1872_v2 = vld [vmem:[%s4655_s28 + $0x298] sm:$0xff] }
 0x35c   : > { %4025 = vxpose.xlu0.b32.cont [7/16] (narrow) %v4024_v34, 8  ;;  %v4028_v34 = vpack.i.bf16 %v5640_v51, %v5734_v44  ;;  %v1876_v35 = vld [vmem:[%s4655_s28 + $0x2b8] sm:$0xff] }
 0x35d   : > { %3420 = vmatpush1.bf16.msra.mxu0 %v3419_v26  ;;  %3484 = vmatpush1.bf16.msra.mxu1 %v3483_v16  ;;  %v3427_v26 = vpack.c.bf16 %v1857_v18, %v1853_v17  ;;  %v3491_v16 = vpack.c.bf16 %v1859_v47, %v1855_v39  ;;  %v1869_v17 = vld [vmem:[%s4655_s28 + $0x280] sm:$0xff]  ;;  %v1871_v39 = vld [vmem:[%s4655_s28 + $0x290] sm:$0xff] }
 0x35e   : > { %3422 = vmatprep.subr.bf16.mxu0 %v3421_v6  ;;  %3486 = vmatprep.subr.bf16.mxu1 %v3485_v25  ;;  %v3429_v6 = vpack.c.bf16 %v1866_v42, %v1862_v15  ;;  %v3493_v25 = vpack.c.bf16 %v1868_v59, %v1864_v3  ;;  %v1873_v18 = vld [vmem:[%s4655_s28 + $0x2a0] sm:$0xff]  ;;  %v1875_v47 = vld [vmem:[%s4655_s28 + $0x2b0] sm:$0xff]  ;;  %v1878_v15 = vld [vmem:[%s4655_s28 + $0x2c8] sm:$0xff] }
 0x35f   : > { %v1882_v42 = vld [vmem:[%s4655_s28 + $0x2e8] sm:$0xff]  ;;  %v1880_v3 = vld [vmem:[%s4655_s28 + $0x2d8] sm:$0xff] }
 0x360   : > { %4027 = vxpose.xlu0.b32.cont [8/16] (narrow) %v4026_v29, 8  ;;  %v4030_v29 = vpack.i.bf16 %v5646_v7, %v5738_v53  ;;  %v1884_v59 = vld [vmem:[%s4655_s28 + $0x2f8] sm:$0xff] }
 0x361   : > { %3424 = vmatpush1.bf16.msra.mxu0 %v3423_v61  ;;  %3488 = vmatpush1.bf16.msra.mxu1 %v3487_v0  ;;  %v3431_v61 = vpack.c.bf16 %v1865_v48, %v1861_v11  ;;  %v3495_v0 = vpack.c.bf16 %v1867_v14, %v1863_v56  ;;  %v1877_v11 = vld [vmem:[%s4655_s28 + $0x2c0] sm:$0xff]  ;;  %v1879_v56 = vld [vmem:[%s4655_s28 + $0x2d0] sm:$0xff] }
 0x362   : > { %3426 = vmatprep.subr.bf16.mxu0 %v3425_v62  ;;  %3490 = vmatprep.subr.bf16.mxu1 %v3489_v8  ;;  %v3433_v62 = vpack.c.bf16 %v1874_v4, %v1870_v54  ;;  %v3497_v8 = vpack.c.bf16 %v1876_v35, %v1872_v2  ;;  %v1881_v48 = vld [vmem:[%s4655_s28 + $0x2e0] sm:$0xff]  ;;  %v1883_v14 = vld [vmem:[%s4655_s28 + $0x2f0] sm:$0xff]  ;;  %v1886_v54 = vld [vmem:[%s4655_s28 + $0x308] sm:$0xff] }
 0x363   : > { %v1890_v4 = vld [vmem:[%s4655_s28 + $0x328] sm:$0xff]  ;;  %v1888_v2 = vld [vmem:[%s4655_s28 + $0x318] sm:$0xff] }
 0x364   : > { %4029 = vxpose.xlu0.b32.cont [9/16] (narrow) %v4028_v34, 8  ;;  %v4032_v34 = vpack.i.bf16 %v5652_v27, %v5742_v36  ;;  %v1892_v35 = vld [vmem:[%s4655_s28 + $0x338] sm:$0xff] }
 0x365   : > { %3428 = vmatpush1.bf16.msra.mxu0 %v3427_v26  ;;  %3492 = vmatpush1.bf16.msra.mxu1 %v3491_v16  ;;  %v3435_v26 = vpack.c.bf16 %v1873_v18, %v1869_v17  ;;  %v3499_v16 = vpack.c.bf16 %v1875_v47, %v1871_v39  ;;  %v1885_v17 = vld [vmem:[%s4655_s28 + $0x300] sm:$0xff]  ;;  %v1887_v39 = vld [vmem:[%s4655_s28 + $0x310] sm:$0xff] }
 0x366   : > { %3430 = vmatprep.subr.bf16.mxu0 %v3429_v6  ;;  %3494 = vmatprep.subr.bf16.mxu1 %v3493_v25  ;;  %v3437_v6 = vpack.c.bf16 %v1882_v42, %v1878_v15  ;;  %v3501_v25 = vpack.c.bf16 %v1884_v59, %v1880_v3  ;;  %v1889_v18 = vld [vmem:[%s4655_s28 + $0x320] sm:$0xff]  ;;  %v1891_v47 = vld [vmem:[%s4655_s28 + $0x330] sm:$0xff]  ;;  %v1894_v15 = vld [vmem:[%s4655_s28 + $0x348] sm:$0xff] }
 0x367   : > { %v1898_v42 = vld [vmem:[%s4655_s28 + $0x368] sm:$0xff]  ;;  %v1896_v3 = vld [vmem:[%s4655_s28 + $0x358] sm:$0xff] }
 0x368   : > { %4031 = vxpose.xlu0.b32.cont [10/16] (narrow) %v4030_v29, 8  ;;  %v4034_v29 = vpack.i.bf16 %v5658_v1, %v5746_v49  ;;  %v1900_v59 = vld [vmem:[%s4655_s28 + $0x378] sm:$0xff] }
 0x369   : > { %3432 = vmatpush1.bf16.msra.mxu0 %v3431_v61  ;;  %3496 = vmatpush1.bf16.msra.mxu1 %v3495_v0  ;;  %v3439_v61 = vpack.c.bf16 %v1881_v48, %v1877_v11  ;;  %v3503_v0 = vpack.c.bf16 %v1883_v14, %v1879_v56  ;;  %v1893_v11 = vld [vmem:[%s4655_s28 + $0x340] sm:$0xff]  ;;  %v1895_v56 = vld [vmem:[%s4655_s28 + $0x350] sm:$0xff] }
 0x36a   : > { %3434 = vmatprep.subr.bf16.mxu0 %v3433_v62  ;;  %3498 = vmatprep.subr.bf16.mxu1 %v3497_v8  ;;  %v3441_v62 = vpack.c.bf16 %v1890_v4, %v1886_v54  ;;  %v3505_v8 = vpack.c.bf16 %v1892_v35, %v1888_v2  ;;  %v1897_v48 = vld [vmem:[%s4655_s28 + $0x360] sm:$0xff]  ;;  %v1899_v14 = vld [vmem:[%s4655_s28 + $0x370] sm:$0xff]  ;;  %v1902_v54 = vld [vmem:[%s4655_s28 + $0x388] sm:$0xff] }
 0x36b   : > { %v1906_v4 = vld [vmem:[%s4655_s28 + $0x3a8] sm:$0xff]  ;;  %v1904_v2 = vld [vmem:[%s4655_s28 + $0x398] sm:$0xff] }
 0x36c   : > { %4033 = vxpose.xlu0.b32.cont [11/16] (narrow) %v4032_v34, 8  ;;  %v4036_v34 = vpack.i.bf16 %v5664_v63, %v5750_v23  ;;  %v1908_v35 = vld [vmem:[%s4655_s28 + $0x3b8] sm:$0xff] }
 0x36d   : > { %3436 = vmatpush1.bf16.msra.mxu0 %v3435_v26  ;;  %3500 = vmatpush1.bf16.msra.mxu1 %v3499_v16  ;;  %v3443_v26 = vpack.c.bf16 %v1889_v18, %v1885_v17  ;;  %v3507_v16 = vpack.c.bf16 %v1891_v47, %v1887_v39  ;;  %v1901_v17 = vld [vmem:[%s4655_s28 + $0x380] sm:$0xff]  ;;  %v1903_v39 = vld [vmem:[%s4655_s28 + $0x390] sm:$0xff] }
 0x36e   : > { %3438 = vmatprep.subr.bf16.mxu0 %v3437_v6  ;;  %3502 = vmatprep.subr.bf16.mxu1 %v3501_v25  ;;  %v3445_v6 = vpack.c.bf16 %v1898_v42, %v1894_v15  ;;  %v3509_v25 = vpack.c.bf16 %v1900_v59, %v1896_v3  ;;  %v1905_v18 = vld [vmem:[%s4655_s28 + $0x3a0] sm:$0xff]  ;;  %v1907_v47 = vld [vmem:[%s4655_s28 + $0x3b0] sm:$0xff]  ;;  %v1910_v15 = vld [vmem:[%s4655_s28 + $0x3c8] sm:$0xff] }
 0x36f   : > { %v1914_v42 = vld [vmem:[%s4655_s28 + $0x3e8] sm:$0xff]  ;;  %v1912_v3 = vld [vmem:[%s4655_s28 + $0x3d8] sm:$0xff] }
 0x370   : > { %4035 = vxpose.xlu0.b32.cont [12/16] (narrow) %v4034_v29, 8  ;;  %v4038_v29 = vpack.i.bf16 %v5670_v41, %v5754_v20  ;;  %v1916_v59 = vld [vmem:[%s4655_s28 + $0x3f8] sm:$0xff] }
 0x371   : > { %3440 = vmatpush1.bf16.msra.mxu0 %v3439_v61  ;;  %3504 = vmatpush1.bf16.msra.mxu1 %v3503_v0  ;;  %v3447_v61 = vpack.c.bf16 %v1897_v48, %v1893_v11  ;;  %v3511_v0 = vpack.c.bf16 %v1899_v14, %v1895_v56  ;;  %v1909_v11 = vld [vmem:[%s4655_s28 + $0x3c0] sm:$0xff]  ;;  %v3517_v56 = vpack.c.bf16 %v1916_v59, %v1912_v3  ;;  %v1915_v14 = vld [vmem:[%s4655_s28 + $0x3f0] sm:$0xff]  ;;  %v1917_v3 = vld [vmem:[#allocation4] sm:$0xf] }
 0x372   : > { %3442 = vmatprep.subr.bf16.mxu0 %v3441_v62  ;;  %3506 = vmatprep.subr.bf16.mxu1 %v3505_v8  ;;  %v3449_v62 = vpack.c.bf16 %v1906_v4, %v1902_v54  ;;  %v3513_v8 = vpack.c.bf16 %v1908_v35, %v1904_v2  ;;  %v1913_v48 = vld [vmem:[%s4655_s28 + $0x3e0] sm:$0xff] }
 0x373   : > { %v3455_v54 = vpack.c.bf16 %v1913_v48, %v1909_v11  ;;  %v6481_v48 = vlaneseq }
 0x374   : > { %4037 = vxpose.xlu0.b32.cont [13/16] (narrow) %v4036_v34, 8  ;;  %v4040_v34 = vpack.i.bf16 %v5676_v40, %v5758_v19 }
 0x375   : > { %3444 = vmatpush1.bf16.msra.mxu0 %v3443_v26  ;;  %3508 = vmatpush1.bf16.msra.mxu1 %v3507_v16  ;;  %v3451_v26 = vpack.c.bf16 %v1905_v18, %v1901_v17  ;;  %v3515_v16 = vpack.c.bf16 %v1907_v47, %v1903_v39  ;;  %vm2166_vm4 = vcmp.lt.s32.totalorder %v6481_v48, 512 }
 0x376   : > { %3446 = vmatprep.subr.bf16.mxu0 %v3445_v6  ;;  %3510 = vmatprep.subr.bf16.mxu1 %v3509_v25  ;;  %v3453_v6 = vpack.c.bf16 %v1914_v42, %v1910_v15  ;;  %v1911_v25 = vld [vmem:[%s4655_s28 + $0x3d0] sm:$0xff] }
 0x377   : > { %v3519_v4 = vpack.c.bf16 %v1915_v14, %v1911_v25 }
 0x378   : > { %4039 = vxpose.xlu0.b32.cont [14/16] (narrow) %v4038_v29, 8  ;;  %v4042_v29 = vpack.i.bf16 %v5682_v31, %v5765_v33 }
 0x379   : > { %3448 = vmatpush1.bf16.msra.mxu0 %v3447_v61  ;;  %3512 = vmatpush1.bf16.msra.mxu1 %v3511_v0  ;;  %v4345_v61 = vmov 1966171168  }
 0x37a   : > { %3450 = vmatprep.subr.bf16.mxu0 %v3449_v62  ;;  %3514 = vmatprep.subr.bf16.mxu1 %v3513_v8  ;;  %v2141_v0 = vunpack.c.l.s4 %v4345_v61 }
 0x37c   : > { %4041 = vxpose.xlu0.b32.cont [15/16] (narrow) %v4040_v34, 8  ;;  %v2142_v62 = vunpack.c.0.s8 %v2141_v0 }
 0x37d   : > { %3452 = vmatpush1.bf16.msra.mxu0 %v3451_v26  ;;  %3516 = vmatpush1.bf16.msra.mxu1 %v3515_v16 }
 0x37e   : > { %3454 = vmatprep.subr.bf16.mxu0 %v3453_v6  ;;  %3518 = vmatprep.subr.bf16.mxu1 %v3517_v56  ;;  %v2145_v8 = vsub.s32 %v2142_v62, %v4842_v5 }
 0x380   : > { %4043 = vxpose.xlu0.b32.end [16/16] (narrow) %v4042_v29, 8 }
 0x381   : > { %3456 = vmatpush1.bf16.msra.mxu0 %v3455_v54  ;;  %3520 = vmatpush1.bf16.msra.mxu1 %v3519_v4 }
 0x3a9   : > { %4050 = vset.pattern.permute.xlu0 %v4344_v58 }
 0x3ba   : > { %v1921_v17 = vpop.permute.xlu1 %1920 }
 0x3bb   : > { %v1926_v58 = vrot.slane %v1921_v17, %v5563_v45 }
 0x3bd   : > { %v1927_v6 = vmul.f32 %v1926_v58, %v1917_v3 }
 0x3c4   : > { %v4044_v34 = vpop.trf.xlu0 }
 0x3c5   : > { %v4048_v2 = vunpack.i.h.bf16 %v4044_v34  ;;  %v4045_v35 = vunpack.i.l.bf16 %v4044_v34 }
 0x3c7   : > { %2056 = vmatprep.mubr.f32.mxu0 %v4045_v35  ;;  %2127 = vmatprep.mubr.f32.mxu1 %v4045_v35 }
 0x3c8   : > { %2057 = vmatmul.mubr.f32.vlgmr.msra.gmra.mrb[0].mxu0 %v4048_v2  ;;  %2128 = vmatmul.mubr.f32.vlgmr.msra.gmra.mrb[0].mxu1 %v4048_v2 }
 0x49b   : > { %v2058_v18 = vpop.f32.mrb[0].mxu0  ;;  %v2129_v39 = vpop.f32.mrb[0].mxu1 }
 0x49c   : > { %v2060_v47 = vpop.f32.mrb[1].mxu0  ;;  %v2131_v15 = vpop.f32.mrb[1].mxu1 }
 0x49d   : > { %v2138_v42 = vcombine.low %v2058_v18, %v2060_v47  ;;  %v2139_v29 = vcombine.low %v2129_v39, %v2131_v15 }
 0x49f   : > { %v2146_v59 = vrot.slane %v2138_v42, %v2145_v8  ;;  %v2153_v26 = vrot.slane %v2139_v29, %v2145_v8 }
 0x4a1   : > { %v2154_v16 = vcombine.low %v2146_v59, %v2153_v26 }
 0x4a3   : > { %v2161_v11 = vrot.slane %v2154_v16, %v2145_v8 }
 0x4a5   : > { %v2163_v56 = vadd.f32 %v2161_v11, %v1927_v6 }
 0x4a7   : > { %2168 = vst.msk [vmem:[#allocation4] sm:$0xf] %vm2166_vm4, %v2163_v56 }
 0x4a8 PF: > { %p3030_p2 = scmp.le.s32.totalorder %s5526_s13, 600 }
 0x4a9   : > { %v4051_v25 = vpack.i.bf16 (!%p3030_p2), %v5598_v22, %v5688_v12  ;;  %v2205_v14 = vld [vmem:[%s4655_s28 + $0x8] sm:$0xff] (!%p3030_p2)  ;;  %v2207_v4 = vld [vmem:[%s4655_s28 + $0x18] sm:$0xff] (!%p3030_p2)  ;;  %v2204_v2 = vld [vmem:[%s4655_s28] sm:$0xff] (!%p3030_p2)  ;;  %v4053_v61 = vpack.i.bf16 (!%p3030_p2), %v5600_v38, %v5694_v32  ;;  %vm2172_vm5 = vcmp.lt.s32.totalorder (!%p3030_p2), %v5530_v46, 600  ;;  %vm2173_vm6 = vcmp.lt.s32.totalorder (!%p3030_p2), %v4862_v24, 600 }
 0x4aa   : > { %2171 = sbr.rel (%p3030_p2) target bundleno = 1551 (0x60f), region = 68  ;;  %v2209_v54 = vld [vmem:[%s4655_s28 + $0x28] sm:$0xff] (!%p3030_p2)  ;;  %v2211_v34 = vld [vmem:[%s4655_s28 + $0x38] sm:$0xff] (!%p3030_p2)  ;;  %v2208_v35 = vld [vmem:[%s4655_s28 + $0x20] sm:$0xff] (!%p3030_p2)  ;;  %v4055_v59 = vpack.i.bf16 (!%p3030_p2), %v5606_v10, %v5700_v57 }
 0x4ab   : > { %4052 = vxpose.xlu0.b32.start [1/16] (narrow) (!%p3030_p2), %v4051_v25, 8  ;;  %v2206_v0 = vld [vmem:[%s4655_s28 + $0x10] sm:$0xff] (!%p3030_p2)  ;;  %v2213_v17 = vld [vmem:[%s4655_s28 + $0x48] sm:$0xff] (!%p3030_p2)  ;;  %v2215_v22 = vld [vmem:[%s4655_s28 + $0x58] sm:$0xff] (!%p3030_p2)  ;;  %v3521_v39 = vpack.c.bf16 (!%p3030_p2), %v2209_v54, %v2205_v14  ;;  %v3617_v8 = vpack.c.bf16 (!%p3030_p2), %v2211_v34, %v2207_v4  ;;  %v3524_v32 = vpack.c.bf16 (!%p3030_p2), %v2208_v35, %v2204_v2 }
 0x4ac   : > { %v2210_v62 = vld [vmem:[%s4655_s28 + $0x30] sm:$0xff] (!%p3030_p2)  ;;  %v2217_v18 = vld [vmem:[%s4655_s28 + $0x68] sm:$0xff] (!%p3030_p2)  ;;  %v2219_v12 = vld [vmem:[%s4655_s28 + $0x78] sm:$0xff] (!%p3030_p2) }
 0x4ad   : > { %v2212_v47 = vld [vmem:[%s4655_s28 + $0x40] sm:$0xff] (!%p3030_p2)  ;;  %v2214_v42 = vld [vmem:[%s4655_s28 + $0x50] sm:$0xff] (!%p3030_p2)  ;;  %vm5964_vm8 = vmpackc.low (!%p3030_p2), %vm2173_vm6, %vm2172_vm5  ;;  %v3620_v29 = vpack.c.bf16 (!%p3030_p2), %v2210_v62, %v2206_v0  ;;  %v3527_v26 = vpack.c.bf16 (!%p3030_p2), %v2217_v18, %v2213_v17  ;;  %v3623_v6 = vpack.c.bf16 (!%p3030_p2), %v2219_v12, %v2215_v22  ;;  %v4057_v12 = vpack.i.bf16 (!%p3030_p2), %v5610_v37, %v5706_v30 }
 0x4ae   : > { %v2216_v15 = vld [vmem:[%s4655_s28 + $0x60] sm:$0xff] (!%p3030_p2)  ;;  %v6484_v58 = vld [vmem:[#allocation30_spill] sm:$0xff] (!%p3030_p2)  ;;  %v6485_v3 = vld [vmem:[#allocation31_spill] sm:$0xff] (!%p3030_p2)  ;;  %3523 = vmatprep.subr.msk.bf16.mxu0 (!%p3030_p2), %vm5964_vm8, %v3521_v39  ;;  %3619 = vmatprep.subr.msk.bf16.mxu1 (!%p3030_p2), %vm5964_vm8, %v3617_v8 }
 0x4af   : > { %vm2174_vm9 = vcmp.lt.s32.totalorder (!%p3030_p2), %v6484_v58, 600  ;;  %vm2175_vm10 = vcmp.lt.s32.totalorder (!%p3030_p2), %v6485_v3, 600  ;;  %v2218_v46 = vld [vmem:[%s4655_s28 + $0x70] sm:$0xff] (!%p3030_p2)  ;;  %v2221_v24 = vld [vmem:[%s4655_s28 + $0x88] sm:$0xff] (!%p3030_p2)  ;;  %4054 = vxpose.xlu0.b32.cont [2/16] (narrow) (!%p3030_p2), %v4053_v61, 8  ;;  %v6488_v11 = vld [vmem:[#allocation32_spill] sm:$0xff] (!%p3030_p2)  ;;  %3526 = vmatpush1.bf16.msk.msra.mxu0 (!%p3030_p2), %vm5964_vm8, %v3524_v32  ;;  %v3530_v10 = vpack.c.bf16 (!%p3030_p2), %v2216_v15, %v2212_v47 }
 0x4b0   : > { %vm5976_vm11 = vmpackc.low (!%p3030_p2), %vm2175_vm10, %vm2174_vm9  ;;  %vm2176_vm12 = vcmp.lt.s32.totalorder (!%p3030_p2), %v6488_v11, 600  ;;  %v2225_v48 = vld [vmem:[%s4655_s28 + $0xa8] sm:$0xff] (!%p3030_p2)  ;;  %v2223_v56 = vld [vmem:[%s4655_s28 + $0x98] sm:$0xff] (!%p3030_p2)  ;;  %3622 = vmatpush1.bf16.msk.msra.mxu1 (!%p3030_p2), %vm5964_vm8, %v3620_v29  ;;  %v3626_v54 = vpack.c.bf16 (!%p3030_p2), %v2218_v46, %v2214_v42 }
 0x4b1   : > { %v6489_v57 = vld [vmem:[#allocation33_spill] sm:$0xff]  ;;  %v2227_v25 = vld [vmem:[%s4655_s28 + $0xb8] sm:$0xff]  ;;  %3529 = vmatprep.subr.msk.bf16.mxu0 %vm5976_vm11, %v3527_v26  ;;  %v3533_v4 = vpack.c.bf16 %v2225_v48, %v2221_v24  ;;  %v2222_v35 = vld [vmem:[%s4655_s28 + $0x90] sm:$0xff]  ;;  %3625 = vmatprep.subr.msk.bf16.mxu1 %vm5976_vm11, %v3623_v6  ;;  %v4059_v26 = vpack.i.bf16 %v5616_v52, %v5712_v50 }
 0x4b2   : > { %vm2177_vm13 = vcmp.lt.s32.totalorder %v6489_v57, 600  ;;  %v2220_v14 = vld [vmem:[%s4655_s28 + $0x80] sm:$0xff]  ;;  %v6492_v61 = vld [vmem:[#allocation34_spill] sm:$0xff]  ;;  %v6493_v0 = vld [vmem:[#allocation35_spill] sm:$0xff]  ;;  %v3629_v62 = vpack.c.bf16 %v2227_v25, %v2223_v56 }
 0x4b3   : > { %vm5994_vm14 = vmpackc.low %vm2177_vm13, %vm2176_vm12  ;;  %v2224_v2 = vld [vmem:[%s4655_s28 + $0xa0] sm:$0xff]  ;;  %vm2178_vm15 = vcmp.lt.s32.totalorder %v6492_v61, 600  ;;  %vm2179_vm0 = vcmp.lt.s32.totalorder %v6493_v0, 600  ;;  %v2226_v17 = vld [vmem:[%s4655_s28 + $0xb0] sm:$0xff]  ;;  %4056 = vxpose.xlu0.b32.cont [3/16] (narrow) %v4055_v59, 8  ;;  %3532 = vmatpush1.bf16.msk.msra.mxu0 %vm5976_vm11, %v3530_v10 }
 0x4b4   : > { %v2229_v18 = vld [vmem:[%s4655_s28 + $0xc8] sm:$0xff]  ;;  %v2231_v39 = vld [vmem:[%s4655_s28 + $0xd8] sm:$0xff]  ;;  %v3536_v47 = vpack.c.bf16 %v2224_v2, %v2220_v14  ;;  %vm6013_vm1 = vmpackc.low %vm2179_vm0, %vm2178_vm15  ;;  %3628 = vmatpush1.bf16.msk.msra.mxu1 %vm5976_vm11, %v3626_v54  ;;  %3535 = vmatprep.subr.msk.bf16.mxu0 %vm5994_vm14, %v3533_v4  ;;  %v3632_v37 = vpack.c.bf16 %v2226_v17, %v2222_v35  ;;  %v4061_v35 = vpack.i.bf16 %v5622_v21, %v5718_v60 }
 0x4b5   : > { %v2233_v22 = vld [vmem:[%s4655_s28 + $0xe8] sm:$0xff]  ;;  %v2235_v8 = vld [vmem:[%s4655_s28 + $0xf8] sm:$0xff]  ;;  %v2228_v42 = vld [vmem:[%s4655_s28 + $0xc0] sm:$0xff]  ;;  %3631 = vmatprep.subr.msk.bf16.mxu1 %vm5994_vm14, %v3629_v62 }
 0x4b6   : > { %v3539_v30 = vpack.c.bf16 %v2233_v22, %v2229_v18  ;;  %v2232_v38 = vld [vmem:[%s4655_s28 + $0xe0] sm:$0xff]  ;;  %v2230_v32 = vld [vmem:[%s4655_s28 + $0xd0] sm:$0xff]  ;;  %v3635_v3 = vpack.c.bf16 %v2235_v8, %v2231_v39  ;;  %v2237_v24 = vld [vmem:[%s4655_s28 + $0x108] sm:$0xff]  ;;  %v4346_v18 = vmov 0  }
 0x4b7   : > { %v6496_v29 = vld [vmem:[#allocation36_spill] sm:$0xff]  ;;  %v6497_v58 = vld [vmem:[#allocation37_spill] sm:$0xff]  ;;  %v2234_v46 = vld [vmem:[%s4655_s28 + $0xf0] sm:$0xff]  ;;  %4058 = vxpose.xlu0.b32.cont [4/16] (narrow) %v4057_v12, 8  ;;  %3538 = vmatpush1.bf16.msk.msra.mxu0 %vm5994_vm14, %v3536_v47  ;;  %v3542_v11 = vpack.c.bf16 %v2232_v38, %v2228_v42  ;;  %v4063_v38 = vpack.i.bf16 %v5628_v55, %v5724_v28 }
 0x4b8   : > { %vm2180_vm2 = vcmp.lt.s32.totalorder %v6496_v29, 600  ;;  %vm2181_vm7 = vcmp.lt.s32.totalorder %v6497_v58, 600  ;;  %v2241_v59 = vld [vmem:[%s4655_s28 + $0x128] sm:$0xff]  ;;  %v2239_v16 = vld [vmem:[%s4655_s28 + $0x118] sm:$0xff]  ;;  %3634 = vmatpush1.bf16.msk.msra.mxu1 %vm5994_vm14, %v3632_v37  ;;  %3541 = vmatprep.subr.msk.bf16.mxu0 %vm6013_vm1, %v3539_v30  ;;  %v3638_v52 = vpack.c.bf16 %v2234_v46, %v2230_v32  ;;  %v2236_v56 = vld [vmem:[%s4655_s28 + $0x100] sm:$0xff] }
 0x4b9   : > { %v2243_v6 = vld [vmem:[%s4655_s28 + $0x138] sm:$0xff]  ;;  %vm6037_vm4 = vmpackc.low %vm2181_vm7, %vm2180_vm2  ;;  %v3545_v50 = vpack.c.bf16 %v2241_v59, %v2237_v24  ;;  %v2240_v10 = vld [vmem:[%s4655_s28 + $0x120] sm:$0xff]  ;;  %3637 = vmatprep.subr.msk.bf16.mxu1 %vm6013_vm1, %v3635_v3  ;;  %4088 = vset.pattern.permute.xlu1 %v4346_v18 }
 0x4ba   : > { %v2238_v57 = vld [vmem:[%s4655_s28 + $0x110] sm:$0xff]  ;;  %v3641_v54 = vpack.c.bf16 %v2243_v6, %v2239_v16  ;;  %v2245_v34 = vld [vmem:[%s4655_s28 + $0x148] sm:$0xff]  ;;  %v2247_v61 = vld [vmem:[%s4655_s28 + $0x158] sm:$0xff]  ;;  %v3548_v62 = vpack.c.bf16 %v2240_v10, %v2236_v56  ;;  %2527 = vperm.xlu1 %4088, %v5771_v13  }
 0x4bb   : > { %v6500_v25 = vld [vmem:[#allocation38_spill] sm:$0xff]  ;;  %v6501_v14 = vld [vmem:[#allocation39_spill] sm:$0xff]  ;;  %4060 = vxpose.xlu0.b32.cont [5/16] (narrow) %v4059_v26, 8  ;;  %3544 = vmatpush1.bf16.msk.msra.mxu0 %vm6013_vm1, %v3542_v11  ;;  %v2244_v22 = vld [vmem:[%s4655_s28 + $0x140] sm:$0xff] }
 0x4bc   : > { %vm2182_vm5 = vcmp.lt.s32.totalorder %v6500_v25, 600  ;;  %vm2183_vm6 = vcmp.lt.s32.totalorder %v6501_v14, 600  ;;  %v2242_v4 = vld [vmem:[%s4655_s28 + $0x130] sm:$0xff]  ;;  %v2249_v2 = vld [vmem:[%s4655_s28 + $0x168] sm:$0xff]  ;;  %v2251_v0 = vld [vmem:[%s4655_s28 + $0x178] sm:$0xff]  ;;  %3640 = vmatpush1.bf16.msk.msra.mxu1 %vm6013_vm1, %v3638_v52  ;;  %3547 = vmatprep.subr.msk.bf16.mxu0 %vm6037_vm4, %v3545_v50  ;;  %v4065_v52 = vpack.i.bf16 %v5634_v43, %v5730_v9 }
 0x4bd   : > { %vm6061_vm8 = vmpackc.low %vm2183_vm6, %vm2182_vm5  ;;  %v3644_v21 = vpack.c.bf16 %v2242_v4, %v2238_v57  ;;  %v3551_v60 = vpack.c.bf16 %v2249_v2, %v2245_v34  ;;  %v2248_v12 = vld [vmem:[%s4655_s28 + $0x160] sm:$0xff]  ;;  %v2246_v39 = vld [vmem:[%s4655_s28 + $0x150] sm:$0xff]  ;;  %3643 = vmatprep.subr.msk.bf16.mxu1 %vm6037_vm4, %v3641_v54  ;;  %v3647_v37 = vpack.c.bf16 %v2251_v0, %v2247_v61 }
 0x4be   : > { %v6504_v8 = vld [vmem:[#allocation40_spill] sm:$0xff]  ;;  %v6505_v47 = vld [vmem:[#allocation41_spill] sm:$0xff]  ;;  %v2250_v15 = vld [vmem:[%s4655_s28 + $0x170] sm:$0xff]  ;;  %v3554_v58 = vpack.c.bf16 %v2248_v12, %v2244_v22 }
 0x4bf   : > { %vm2184_vm9 = vcmp.lt.s32.totalorder %v6504_v8, 600  ;;  %vm2185_vm10 = vcmp.lt.s32.totalorder %v6505_v47, 600  ;;  %v2253_v30 = vld [vmem:[%s4655_s28 + $0x188] sm:$0xff]  ;;  %4062 = vxpose.xlu0.b32.cont [6/16] (narrow) %v4061_v35, 8  ;;  %v2255_v32 = vld [vmem:[%s4655_s28 + $0x198] sm:$0xff]  ;;  %3550 = vmatpush1.bf16.msk.msra.mxu0 %vm6037_vm4, %v3548_v62  ;;  %v3650_v55 = vpack.c.bf16 %v2250_v15, %v2246_v39  ;;  %v2252_v13 = vld [vmem:[%s4655_s28 + $0x180] sm:$0xff]  ;;  %v4067_v62 = vpack.i.bf16 %v5640_v51, %v5734_v44 }
 0x4c0   : > { %v2257_v42 = vld [vmem:[%s4655_s28 + $0x1a8] sm:$0xff]  ;;  %v2259_v29 = vld [vmem:[%s4655_s28 + $0x1b8] sm:$0xff]  ;;  %vm6087_vm11 = vmpackc.low %vm2185_vm10, %vm2184_vm9  ;;  %3646 = vmatpush1.bf16.msk.msra.mxu1 %vm6037_vm4, %v3644_v21  ;;  %3553 = vmatprep.subr.msk.bf16.mxu0 %vm6061_vm8, %v3551_v60 }
 0x4c1   : > { %v3557_v28 = vpack.c.bf16 %v2257_v42, %v2253_v30  ;;  %v2256_v46 = vld [vmem:[%s4655_s28 + $0x1a0] sm:$0xff]  ;;  %v2254_v24 = vld [vmem:[%s4655_s28 + $0x190] sm:$0xff]  ;;  %3649 = vmatprep.subr.msk.bf16.mxu1 %vm6061_vm8, %v3647_v37  ;;  %v3653_v16 = vpack.c.bf16 %v2259_v29, %v2255_v32  ;;  %v2261_v11 = vld [vmem:[%s4655_s28 + $0x1c8] sm:$0xff]  ;;  %v4069_v32 = vpack.i.bf16 %v5646_v7, %v5738_v53 }
 0x4c2   : > { %v6508_v59 = vld [vmem:[#allocation42_spill] sm:$0xff]  ;;  %v6509_v26 = vld [vmem:[#allocation43_spill] sm:$0xff]  ;;  %v3560_v10 = vpack.c.bf16 %v2256_v46, %v2252_v13  ;;  %v2260_v25 = vld [vmem:[%s4655_s28 + $0x1c0] sm:$0xff] }
 0x4c3   : > { %vm2186_vm12 = vcmp.lt.s32.totalorder %v6508_v59, 600  ;;  %vm2187_vm13 = vcmp.lt.s32.totalorder %v6509_v26, 600  ;;  %v2258_v6 = vld [vmem:[%s4655_s28 + $0x1b0] sm:$0xff]  ;;  %v2265_v48 = vld [vmem:[%s4655_s28 + $0x1e8] sm:$0xff]  ;;  %4064 = vxpose.xlu0.b32.cont [7/16] (narrow) %v4063_v38, 8  ;;  %v2263_v50 = vld [vmem:[%s4655_s28 + $0x1d8] sm:$0xff]  ;;  %3556 = vmatpush1.bf16.msk.msra.mxu0 %vm6061_vm8, %v3554_v58 }
 0x4c4   : > { %v2267_v56 = vld [vmem:[%s4655_s28 + $0x1f8] sm:$0xff]  ;;  %vm6111_vm14 = vmpackc.low %vm2187_vm13, %vm2186_vm12  ;;  %3652 = vmatpush1.bf16.msk.msra.mxu1 %vm6061_vm8, %v3650_v55  ;;  %3559 = vmatprep.subr.msk.bf16.mxu0 %vm6087_vm11, %v3557_v28  ;;  %v3656_v43 = vpack.c.bf16 %v2258_v6, %v2254_v24  ;;  %v3563_v9 = vpack.c.bf16 %v2265_v48, %v2261_v11  ;;  %v2264_v14 = vld [vmem:[%s4655_s28 + $0x1e0] sm:$0xff]  ;;  %v4071_v48 = vpack.i.bf16 %v5652_v27, %v5742_v36 }
 0x4c5   : > { %v2262_v54 = vld [vmem:[%s4655_s28 + $0x1d0] sm:$0xff]  ;;  %v6512_v4 = vld [vmem:[#allocation44_spill] sm:$0xff]  ;;  %v6513_v34 = vld [vmem:[#allocation45_spill] sm:$0xff]  ;;  %3655 = vmatprep.subr.msk.bf16.mxu1 %vm6087_vm11, %v3653_v16  ;;  %v3659_v2 = vpack.c.bf16 %v2267_v56, %v2263_v50  ;;  %v3566_v60 = vpack.c.bf16 %v2264_v14, %v2260_v25 }
 0x4c6   : > { %vm2188_vm15 = vcmp.lt.s32.totalorder %v6512_v4, 600  ;;  %vm2189_vm0 = vcmp.lt.s32.totalorder %v6513_v34, 600  ;;  %v2266_v35 = vld [vmem:[%s4655_s28 + $0x1f0] sm:$0xff]  ;;  %v2269_v61 = vld [vmem:[%s4655_s28 + $0x208] sm:$0xff]  ;;  %v2271_v17 = vld [vmem:[%s4655_s28 + $0x218] sm:$0xff] }
 0x4c7   : > { %v2273_v0 = vld [vmem:[%s4655_s28 + $0x228] sm:$0xff]  ;;  %4066 = vxpose.xlu0.b32.cont [8/16] (narrow) %v4065_v52, 8  ;;  %v2275_v21 = vld [vmem:[%s4655_s28 + $0x238] sm:$0xff]  ;;  %3562 = vmatpush1.bf16.msk.msra.mxu0 %vm6087_vm11, %v3560_v10  ;;  %vm6135_vm1 = vmpackc.low %vm2189_vm0, %vm2188_vm15  ;;  %v3662_v51 = vpack.c.bf16 %v2266_v35, %v2262_v54  ;;  %v4073_v35 = vpack.i.bf16 %v5658_v1, %v5746_v49 }
 0x4c8   : > { %3658 = vmatpush1.bf16.msk.msra.mxu1 %vm6087_vm11, %v3656_v43  ;;  %3565 = vmatprep.subr.msk.bf16.mxu0 %vm6111_vm14, %v3563_v9  ;;  %v3569_v44 = vpack.c.bf16 %v2273_v0, %v2269_v61  ;;  %v2268_v12 = vld [vmem:[%s4655_s28 + $0x200] sm:$0xff]  ;;  %v2270_v8 = vld [vmem:[%s4655_s28 + $0x210] sm:$0xff]  ;;  %v3665_v15 = vpack.c.bf16 %v2275_v21, %v2271_v17  ;;  %v2277_v42 = vld [vmem:[%s4655_s28 + $0x248] sm:$0xff] }
 0x4c9   : > { %v2272_v39 = vld [vmem:[%s4655_s28 + $0x220] sm:$0xff]  ;;  %v6516_v47 = vld [vmem:[#allocation46_spill] sm:$0xff]  ;;  %v6517_v37 = vld [vmem:[#allocation47_spill] sm:$0xff]  ;;  %3661 = vmatprep.subr.msk.bf16.mxu1 %vm6111_vm14, %v3659_v2 }
 0x4ca   : > { %vm2190_vm2 = vcmp.lt.s32.totalorder %v6516_v47, 600  ;;  %vm2191_vm7 = vcmp.lt.s32.totalorder %v6517_v37, 600  ;;  %v2274_v30 = vld [vmem:[%s4655_s28 + $0x230] sm:$0xff]  ;;  %v2281_v38 = vld [vmem:[%s4655_s28 + $0x268] sm:$0xff]  ;;  %v2279_v29 = vld [vmem:[%s4655_s28 + $0x258] sm:$0xff]  ;;  %v3572_v3 = vpack.c.bf16 %v2272_v39, %v2268_v12  ;;  %v4075_v37 = vpack.i.bf16 %v5664_v63, %v5750_v23 }
 0x4cb   : > { %4068 = vxpose.xlu0.b32.cont [9/16] (narrow) %v4067_v62, 8  ;;  %v2283_v58 = vld [vmem:[%s4655_s28 + $0x278] sm:$0xff]  ;;  %3568 = vmatpush1.bf16.msk.msra.mxu0 %vm6111_vm14, %v3566_v60  ;;  %vm6159_vm4 = vmpackc.low %vm2191_vm7, %vm2190_vm2  ;;  %v3668_v7 = vpack.c.bf16 %v2274_v30, %v2270_v8  ;;  %v3575_v53 = vpack.c.bf16 %v2281_v38, %v2277_v42  ;;  %v2276_v28 = vld [vmem:[%s4655_s28 + $0x240] sm:$0xff] }
 0x4cc   : > { %3664 = vmatpush1.bf16.msk.msra.mxu1 %vm6111_vm14, %v3662_v51  ;;  %3571 = vmatprep.subr.msk.bf16.mxu0 %vm6135_vm1, %v3569_v44  ;;  %v2280_v13 = vld [vmem:[%s4655_s28 + $0x260] sm:$0xff]  ;;  %v2278_v46 = vld [vmem:[%s4655_s28 + $0x250] sm:$0xff]  ;;  %v3671_v26 = vpack.c.bf16 %v2283_v58, %v2279_v29  ;;  %v2285_v6 = vld [vmem:[%s4655_s28 + $0x288] sm:$0xff] }
 0x4cd   : > { %v6520_v24 = vld [vmem:[#allocation48_spill] sm:$0xff]  ;;  %v6521_v59 = vld [vmem:[#allocation49_spill] sm:$0xff]  ;;  %3667 = vmatprep.subr.msk.bf16.mxu1 %vm6135_vm1, %v3665_v15  ;;  %v2282_v16 = vld [vmem:[%s4655_s28 + $0x270] sm:$0xff]  ;;  %v3578_v56 = vpack.c.bf16 %v2280_v13, %v2276_v28 }
 0x4ce   : > { %vm2192_vm5 = vcmp.lt.s32.totalorder %v6520_v24, 600  ;;  %vm2193_vm6 = vcmp.lt.s32.totalorder %v6521_v59, 600  ;;  %v2289_v11 = vld [vmem:[%s4655_s28 + $0x2a8] sm:$0xff]  ;;  %v2287_v52 = vld [vmem:[%s4655_s28 + $0x298] sm:$0xff]  ;;  %v3674_v27 = vpack.c.bf16 %v2282_v16, %v2278_v46  ;;  %v2284_v57 = vld [vmem:[%s4655_s28 + $0x280] sm:$0xff]  ;;  %v4077_v46 = vpack.i.bf16 %v5670_v41, %v5754_v20 }
 0x4cf   : > { %4070 = vxpose.xlu0.b32.cont [10/16] (narrow) %v4069_v32, 8  ;;  %v2291_v50 = vld [vmem:[%s4655_s28 + $0x2b8] sm:$0xff]  ;;  %3574 = vmatpush1.bf16.msk.msra.mxu0 %vm6135_vm1, %v3572_v3  ;;  %vm6183_vm8 = vmpackc.low %vm2193_vm6, %vm2192_vm5  ;;  %v3581_v36 = vpack.c.bf16 %v2289_v11, %v2285_v6  ;;  %v2288_v43 = vld [vmem:[%s4655_s28 + $0x2a0] sm:$0xff]  ;;  %v6542_v16 = vlaneseq }
 0x4d0   : > { %3670 = vmatpush1.bf16.msk.msra.mxu1 %vm6135_vm1, %v3668_v7  ;;  %3577 = vmatprep.subr.msk.bf16.mxu0 %vm6159_vm4, %v3575_v53  ;;  %v2286_v9 = vld [vmem:[%s4655_s28 + $0x290] sm:$0xff]  ;;  %v3677_v54 = vpack.c.bf16 %v2291_v50, %v2287_v52  ;;  %v2293_v34 = vld [vmem:[%s4655_s28 + $0x2c8] sm:$0xff]  ;;  %v2295_v61 = vld [vmem:[%s4655_s28 + $0x2d8] sm:$0xff]  ;;  %v3584_v62 = vpack.c.bf16 %v2288_v43, %v2284_v57  ;;  %v4079_v57 = vpack.i.bf16 %v5676_v40, %v5758_v19 }
 0x4d1   : > { %v6524_v25 = vld [vmem:[#allocation50_spill] sm:$0xff]  ;;  %v6525_v14 = vld [vmem:[#allocation51_spill] sm:$0xff]  ;;  %3673 = vmatprep.subr.msk.bf16.mxu1 %vm6159_vm4, %v3671_v26  ;;  %v2292_v21 = vld [vmem:[%s4655_s28 + $0x2c0] sm:$0xff] }
 0x4d2   : > { %vm2194_vm9 = vcmp.lt.s32.totalorder %v6524_v25, 600  ;;  %vm2195_vm10 = vcmp.lt.s32.totalorder %v6525_v14, 600  ;;  %v2290_v4 = vld [vmem:[%s4655_s28 + $0x2b0] sm:$0xff]  ;;  %v2297_v2 = vld [vmem:[%s4655_s28 + $0x2e8] sm:$0xff]  ;;  %v2299_v0 = vld [vmem:[%s4655_s28 + $0x2f8] sm:$0xff] }
 0x4d3   : > { %4072 = vxpose.xlu0.b32.cont [11/16] (narrow) %v4071_v48, 8  ;;  %3580 = vmatpush1.bf16.msk.msra.mxu0 %vm6159_vm4, %v3578_v56  ;;  %vm6207_vm11 = vmpackc.low %vm2195_vm10, %vm2194_vm9  ;;  %v3680_v1 = vpack.c.bf16 %v2290_v4, %v2286_v9  ;;  %v3587_v49 = vpack.c.bf16 %v2297_v2, %v2293_v34  ;;  %v2296_v60 = vld [vmem:[%s4655_s28 + $0x2e0] sm:$0xff]  ;;  %v2294_v22 = vld [vmem:[%s4655_s28 + $0x2d0] sm:$0xff]  ;;  %v3683_v12 = vpack.c.bf16 %v2299_v0, %v2295_v61  ;;  %vm2773_vm9 = vcmp.lt.s32.totalorder %v6542_v16, 512 }
 0x4d4   : > { %3676 = vmatpush1.bf16.msk.msra.mxu1 %vm6159_vm4, %v3674_v27  ;;  %3583 = vmatprep.subr.msk.bf16.mxu0 %vm6183_vm8, %v3581_v36  ;;  %v6528_v51 = vld [vmem:[#allocation52_spill] sm:$0xff]  ;;  %v6529_v44 = vld [vmem:[#allocation53_spill] sm:$0xff]  ;;  %v2298_v39 = vld [vmem:[%s4655_s28 + $0x2f0] sm:$0xff]  ;;  %v3590_v42 = vpack.c.bf16 %v2296_v60, %v2292_v21 }
 0x4d5   : > { %vm2196_vm12 = vcmp.lt.s32.totalorder %v6528_v51, 600  ;;  %vm2197_vm13 = vcmp.lt.s32.totalorder %v6529_v44, 600  ;;  %3679 = vmatprep.subr.msk.bf16.mxu1 %vm6183_vm8, %v3677_v54  ;;  %v2301_v8 = vld [vmem:[%s4655_s28 + $0x308] sm:$0xff]  ;;  %v2303_v15 = vld [vmem:[%s4655_s28 + $0x318] sm:$0xff]  ;;  %v3686_v63 = vpack.c.bf16 %v2298_v39, %v2294_v22  ;;  %v2300_v32 = vld [vmem:[%s4655_s28 + $0x300] sm:$0xff] }
 0x4d6   : > { %v2305_v47 = vld [vmem:[%s4655_s28 + $0x328] sm:$0xff]  ;;  %v2307_v30 = vld [vmem:[%s4655_s28 + $0x338] sm:$0xff]  ;;  %vm6231_vm14 = vmpackc.low %vm2197_vm13, %vm2196_vm12 }
 0x4d7   : > { %4074 = vxpose.xlu0.b32.cont [12/16] (narrow) %v4073_v35, 8  ;;  %3586 = vmatpush1.bf16.msk.msra.mxu0 %vm6183_vm8, %v3584_v62  ;;  %v3593_v23 = vpack.c.bf16 %v2305_v47, %v2301_v8  ;;  %v2304_v29 = vld [vmem:[%s4655_s28 + $0x320] sm:$0xff]  ;;  %v2302_v58 = vld [vmem:[%s4655_s28 + $0x310] sm:$0xff]  ;;  %v3689_v7 = vpack.c.bf16 %v2307_v30, %v2303_v15  ;;  %v2309_v28 = vld [vmem:[%s4655_s28 + $0x348] sm:$0xff]  ;;  %v4081_v62 = vpack.i.bf16 %v5682_v31, %v5765_v33 }
 0x4d8   : > { %3682 = vmatpush1.bf16.msk.msra.mxu1 %vm6183_vm8, %v3680_v1  ;;  %3589 = vmatprep.subr.msk.bf16.mxu0 %vm6207_vm11, %v3587_v49  ;;  %v6532_v3 = vld [vmem:[#allocation54_spill] sm:$0xff]  ;;  %v6533_v55 = vld [vmem:[#allocation55_spill] sm:$0xff]  ;;  %v3596_v26 = vpack.c.bf16 %v2304_v29, %v2300_v32  ;;  %v2308_v6 = vld [vmem:[%s4655_s28 + $0x340] sm:$0xff] }
 0x4d9   : > { %vm2198_vm15 = vcmp.lt.s32.totalorder %v6532_v3, 600  ;;  %vm2199_vm0 = vcmp.lt.s32.totalorder %v6533_v55, 600  ;;  %3685 = vmatprep.subr.msk.bf16.mxu1 %vm6207_vm11, %v3683_v12  ;;  %v2306_v53 = vld [vmem:[%s4655_s28 + $0x330] sm:$0xff]  ;;  %v2313_v13 = vld [vmem:[%s4655_s28 + $0x368] sm:$0xff]  ;;  %v2311_v24 = vld [vmem:[%s4655_s28 + $0x358] sm:$0xff] }
 0x4da   : > { %v2315_v59 = vld [vmem:[%s4655_s28 + $0x378] sm:$0xff]  ;;  %vm6255_vm1 = vmpackc.low %vm2199_vm0, %vm2198_vm15  ;;  %v3692_v41 = vpack.c.bf16 %v2306_v53, %v2302_v58  ;;  %v3599_v20 = vpack.c.bf16 %v2313_v13, %v2309_v28  ;;  %v2312_v11 = vld [vmem:[%s4655_s28 + $0x360] sm:$0xff] }
 0x4db   : > { %4076 = vxpose.xlu0.b32.cont [13/16] (narrow) %v4075_v37, 8  ;;  %3592 = vmatpush1.bf16.msk.msra.mxu0 %vm6207_vm11, %v3590_v42  ;;  %v2310_v48 = vld [vmem:[%s4655_s28 + $0x350] sm:$0xff]  ;;  %v6536_v52 = vld [vmem:[#allocation56_spill] sm:$0xff]  ;;  %v6537_v50 = vld [vmem:[#allocation57_spill] sm:$0xff]  ;;  %v3695_v56 = vpack.c.bf16 %v2315_v59, %v2311_v24  ;;  %v3602_v25 = vpack.c.bf16 %v2312_v11, %v2308_v6  ;;  %v4347_v42 = vmov 1966171168  }
 0x4dc   : > { %3688 = vmatpush1.bf16.msk.msra.mxu1 %vm6207_vm11, %v3686_v63  ;;  %3595 = vmatprep.subr.msk.bf16.mxu0 %vm6231_vm14, %v3593_v23  ;;  %vm2200_vm2 = vcmp.lt.s32.totalorder %v6536_v52, 600  ;;  %vm2201_vm7 = vcmp.lt.s32.totalorder %v6537_v50, 600  ;;  %v2314_v10 = vld [vmem:[%s4655_s28 + $0x370] sm:$0xff]  ;;  %v2317_v27 = vld [vmem:[%s4655_s28 + $0x388] sm:$0xff]  ;;  %v2319_v43 = vld [vmem:[%s4655_s28 + $0x398] sm:$0xff]  ;;  %v2748_v38 = vunpack.c.l.s4 %v4347_v42 }
 0x4dd   : > { %3691 = vmatprep.subr.msk.bf16.mxu1 %vm6231_vm14, %v3689_v7  ;;  %v2321_v36 = vld [vmem:[%s4655_s28 + $0x3a8] sm:$0xff]  ;;  %v2323_v9 = vld [vmem:[%s4655_s28 + $0x3b8] sm:$0xff]  ;;  %vm6279_vm4 = vmpackc.low %vm2201_vm7, %vm2200_vm2  ;;  %v3698_v40 = vpack.c.bf16 %v2314_v10, %v2310_v48 }
 0x4de   : > { %v3605_v19 = vpack.c.bf16 %v2321_v36, %v2317_v27  ;;  %v2316_v54 = vld [vmem:[%s4655_s28 + $0x380] sm:$0xff]  ;;  %v2318_v34 = vld [vmem:[%s4655_s28 + $0x390] sm:$0xff]  ;;  %v3701_v2 = vpack.c.bf16 %v2323_v9, %v2319_v43  ;;  %v2325_v61 = vld [vmem:[%s4655_s28 + $0x3c8] sm:$0xff]  ;;  %v2749_v63 = vunpack.c.0.s8 %v2748_v38 }
 0x4df   : > { %4078 = vxpose.xlu0.b32.cont [14/16] (narrow) %v4077_v46, 8  ;;  %3598 = vmatpush1.bf16.msk.msra.mxu0 %vm6231_vm14, %v3596_v26  ;;  %v2320_v4 = vld [vmem:[%s4655_s28 + $0x3a0] sm:$0xff]  ;;  %v2322_v35 = vld [vmem:[%s4655_s28 + $0x3b0] sm:$0xff]  ;;  %v2329_v0 = vld [vmem:[%s4655_s28 + $0x3e8] sm:$0xff] }
 0x4e0   : > { %3694 = vmatpush1.bf16.msk.msra.mxu1 %vm6231_vm14, %v3692_v41  ;;  %3601 = vmatprep.subr.msk.bf16.mxu0 %vm6255_vm1, %v3599_v20  ;;  %v6540_v17 = vld [vmem:[#allocation58_spill] sm:$0xff]  ;;  %v6541_v1 = vld [vmem:[#allocation59_spill] sm:$0xff]  ;;  %v3608_v60 = vpack.c.bf16 %v2320_v4, %v2316_v54  ;;  %v3704_v22 = vpack.c.bf16 %v2322_v35, %v2318_v34  ;;  %v3611_v31 = vpack.c.bf16 %v2329_v0, %v2325_v61  ;;  %v2324_v33 = vld [vmem:[%s4655_s28 + $0x3c0] sm:$0xff] }
 0x4e1   : > { %3697 = vmatprep.subr.msk.bf16.mxu1 %vm6255_vm1, %v3695_v56  ;;  %vm2202_vm5 = vcmp.lt.s32.totalorder %v6540_v17, 600  ;;  %vm2203_vm6 = vcmp.lt.s32.totalorder %v6541_v1, 600  ;;  %v2327_v49 = vld [vmem:[%s4655_s28 + $0x3d8] sm:$0xff]  ;;  %v2328_v51 = vld [vmem:[%s4655_s28 + $0x3e0] sm:$0xff]  ;;  %v2326_v12 = vld [vmem:[%s4655_s28 + $0x3d0] sm:$0xff]  ;;  %v2752_v58 = vsub.s32 %v2749_v63, %v4842_v5 }
 0x4e2   : > { %v2331_v21 = vld [vmem:[%s4655_s28 + $0x3f8] sm:$0xff]  ;;  %vm3612_vm8 = vmpackc.low %vm2203_vm6, %vm2202_vm5  ;;  %v2330_v39 = vld [vmem:[%s4655_s28 + $0x3f0] sm:$0xff]  ;;  %v3614_v8 = vpack.c.bf16 %v2328_v51, %v2324_v33 }
 0x4e3   : > { %4080 = vxpose.xlu0.b32.cont [15/16] (narrow) %v4079_v57, 8  ;;  %3604 = vmatpush1.bf16.msk.msra.mxu0 %vm6255_vm1, %v3602_v25  ;;  %v3707_v44 = vpack.c.bf16 %v2331_v21, %v2327_v49  ;;  %v3710_v47 = vpack.c.bf16 %v2330_v39, %v2326_v12  ;;  %v2524_v28 = vld [vmem:[#allocation4] sm:$0xf] }
 0x4e4   : > { %3700 = vmatpush1.bf16.msk.msra.mxu1 %vm6255_vm1, %v3698_v40  ;;  %3607 = vmatprep.subr.msk.bf16.mxu0 %vm6279_vm4, %v3605_v19 }
 0x4e5   : > { %3703 = vmatprep.subr.msk.bf16.mxu1 %vm6279_vm4, %v3701_v2 }
 0x4e7   : > { %4082 = vxpose.xlu0.b32.end [16/16] (narrow) %v4081_v62, 8  ;;  %3610 = vmatpush1.bf16.msk.msra.mxu0 %vm6279_vm4, %v3608_v60 }
 0x4e8   : > { %3706 = vmatpush1.bf16.msk.msra.mxu1 %vm6279_vm4, %v3704_v22  ;;  %3613 = vmatprep.subr.msk.bf16.mxu0 %vm3612_vm8, %v3611_v31 }
 0x4e9   : > { %3709 = vmatprep.subr.msk.bf16.mxu1 %vm3612_vm8, %v3707_v44 }
 0x4eb   : > { %3616 = vmatpush1.bf16.msk.msra.mxu0 %vm3612_vm8, %v3614_v8 }
 0x4ec   : > { %3712 = vmatpush1.bf16.msk.msra.mxu1 %vm3612_vm8, %v3710_v47 }
 0x510   : > { %4089 = vset.pattern.permute.xlu0 %v4346_v18 }
 0x52b   : > { %v4083_v37 = vpop.trf.xlu0 }
 0x52c   : > { %v4087_v15 = vunpack.i.h.bf16 %v4083_v37  ;;  %v4084_v30 = vunpack.i.l.bf16 %v4083_v37 }
 0x52e   : > { %2663 = vmatprep.mubr.f32.mxu0 %v4084_v30  ;;  %2734 = vmatprep.mubr.f32.mxu1 %v4084_v30 }
 0x52f   : > { %2664 = vmatmul.mubr.f32.vlgmr.msra.gmra.mrb[0].mxu0 %v4087_v15  ;;  %2735 = vmatmul.mubr.f32.vlgmr.msra.gmra.mrb[0].mxu1 %v4087_v15 }
 0x539   : > { %v2528_v23 = vpop.permute.xlu1 %2527 }
 0x53a   : > { %v2533_v18 = vrot.slane %v2528_v23, %v5563_v45 }
 0x53c   : > { %v2534_v59 = vmul.f32 %v2533_v18, %v2524_v28 }
 0x602   : > { %v2665_v32 = vpop.f32.mrb[0].mxu0  ;;  %v2736_v29 = vpop.f32.mrb[0].mxu1 }
 0x603   : > { %v2667_v3 = vpop.f32.mrb[1].mxu0  ;;  %v2738_v55 = vpop.f32.mrb[1].mxu1 }
 0x604   : > { %v2745_v7 = vcombine.low %v2665_v32, %v2667_v3  ;;  %v2746_v53 = vcombine.low %v2736_v29, %v2738_v55 }
 0x606   : > { %v2753_v13 = vrot.slane %v2745_v7, %v2752_v58  ;;  %v2760_v46 = vrot.slane %v2746_v53, %v2752_v58 }
 0x608   : > { %v2761_v24 = vcombine.low %v2753_v13, %v2760_v46 }
 0x60a   : > { %v2768_v26 = vrot.slane %v2761_v24, %v2752_v58 }
 0x60c   : > { %v2770_v41 = vadd.f32 %v2768_v26, %v2534_v59 }
 0x60e   : > { %2775 = vst.msk [vmem:[#allocation4] sm:$0xf] %vm2773_vm9, %v2770_v41 }
 0x60f PF: > { %s6543_s21 = sld [smem:[#allocation21_spill]] }
 0x615   : > { %p3159_p3 = scmp.ne.s32.totalorder %s6543_s21, 1 }
 0x616   : > { %v2780_v5 = vld [vmem:[#allocation2] sm:$0x1] (!%p3159_p3)  ;;  %v2782_v20 = vld [vmem:[#allocation3] sm:$0x1] (!%p3159_p3)  ;;  %v2784_v45 = vld [vmem:[#allocation4] sm:$0xf] (!%p3159_p3)  ;;  %v6545_v6 = vlaneseq (!%p3159_p3) }
 0x617   : > { %2779 = sbr.rel (%p3159_p3) target bundleno = 1566 (0x61e), region = 72  ;;  %2781 = vst.msk [vmem:[%s394_s29] sm:$0x1] (!%p3159_p3), %vm1744_vm3, %v2780_v5  ;;  %2783 = vst.msk [vmem:[%s397_s4] sm:$0x1] (!%p3159_p3), %vm1744_vm3, %v2782_v20 }
 0x618   : > { %vm2787_vm10 = vcmp.lt.s32.totalorder (!%p3159_p3), %v6545_v6, 512 }
 0x619   : > { %2789 = vst.msk [vmem:[%s381_s26] sm:$0xf] (!%p3159_p3), %vm2787_vm10, %v2784_v45 }
 0x61e PF: > { %s6546_s18 = sld [smem:[#allocation28_spill]]  ;;  %s3168_s6 = sshll.u32 %s4320_s9, 6 }
 0x61f   : > { %s6547_s16 = sld [smem:[#allocation61_spill]]  ;;  %s2817_s10 = sshll.u32 %s381_s26, 4  ;;  %s2818_s10 = int_to_ptr.vmem [resolvable:$true] %s2817_s10 }
 0x620   : > { %s2797_s19 = scalar_lea.sflag [#allocation8], %s379_s23  ;;  %s4202_s4 = scalar_lea.vmem %s2818_s10, 64 }
 0x621   : > { %p4203_p1 = scmp.ne.s32.totalorder %s2818_s10, %s4202_s4  ;;  %s4348_s20 = smov [#allocation14]  }
 0x622   : > { %s4206_s24 = sshll.u32 %s4348_s20, 4  ;;  %s4207_s24 = int_to_ptr.vmem [resolvable:$false] %s4206_s24 }
 0x623   : > { %s4208_s13 = scalar_lea.vmem %s4207_s24, 128  ;;  %p4209_p10 = scmp.lt.s32.totalorder %s2818_s10, %s4207_s24 }
 0x624   : > { %p6548_p13 = scmp.ne.s32.totalorder %s6546_s18, 0  ;;  %p4210_p12 = scmp.lt.s32.totalorder %s4208_s13, %s4202_s4 }
 0x625   : > { %s6341_s29 = scalar_lea.hbm %s6547_s16, %s3168_s6 }
 0x626   : > { %p4204_p11 = pnand %p4203_p1, %p6548_p13  ;;  %p4211_p6 = por %p4210_p12, %p4209_p10 }
 0x628   : > { %p4205_p4 = pneg %p4204_p11 }
 0x62a   : > { %p4212_p0 = pnand %p4211_p6, %p4205_p4 }
 0x62c   : > { %4215 = shalt.err (!%p4212_p0)
}
 0x62d   : > { %s4216_s9 = scalar_lea.hbm %s6341_s29, 64  ;;  %s4220_s26 = scalar_lea.hbm %s6547_s16, 128 }
 0x62e   : > { %p4217_p8 = scmp.ne.s32.totalorder %s6341_s29, %s4216_s9  ;;  %p4221_p9 = scmp.lt.u32.totalorder %s6341_s29, %s6547_s16 }
 0x62f   : > { %p4222_p2 = scmp.lt.u32.totalorder %s4220_s26, %s4216_s9  ;;  %p4224_p1 = scmp.lt.u32.totalorder %s4216_s9, %s6341_s29 }
 0x630   : > { %p4218_p5 = pnand %p4217_p8, %p6548_p13 }
 0x631   : > { %p4223_p3 = por %p4222_p2, %p4221_p9 }
 0x632   : > { %p4219_p7 = pneg %p4218_p5 }
 0x633   : > { %p4225_p11 = por %p4224_p1, %p4223_p3 }
 0x635   : > { %p4226_p4 = pnand %p4225_p11, %p4219_p7 }
 0x637   : > { %4229 = shalt.err (!%p4226_p4)
}
 0x638   : > { %3726 = dma.vmem_to_hbm [thread:$0]  (%p6548_p13), %s2818_s10, 64, %s6341_s29, %s2797_s19  }
 0x639 PF: > { %s6549_s17 = sld [smem:[#allocation19_spill]]  ;;  %s6550_s11 = sld [smem:[#allocation29_spill]] }
 0x63a   : > { %p3748_p10 = scmp.ge.s32.totalorder %s4332_s12, 2 }
 0x63f   : > { %s2841_s22 = sand.u32 1, %s6549_s17   ;;  %p6551_p12 = scmp.ne.s32.totalorder %s6550_s11, 0 }
 0x640   : > { %s2842_s14 = scalar_lea.sflag [#allocation8], %s2841_s22 }
 0x641   : > { %p3739_p6 = pnand %p3748_p10, %p6551_p12 }
 0x643   : > { %4287 = dma.done.wait (!%p3739_p6), %s2842_s14, 64  }
 0x644   : > { %4289 = vsyncadd (!%p3739_p6), %s2842_s14, 4294967232  ;;  %s28_s12 = sadd.s32 1, %s4332_s12   ;;  %s6552_s6 = sld [smem:[#allocation20_spill]] }
 0x645   : > { %p25_p0 = scmp.ge.s32.totalorder %s28_s12, 6   ;;  %s6553_s28 = sld [smem:[#allocation26_spill]] }
 0x646   : > { %s6554_s18 = sld [smem:[#allocation27_spill]]  ;;  %s6555_s4 = sld [smem:[#allocation22_spill]] }
 0x647   : > { %s6556_s9 = sld [smem:[#allocation23_spill]]  ;;  %s6557_s10 = sld [smem:[#allocation24_spill]] }
 0x648   : > { %s6558_s11 = sld [smem:[#allocation25_spill]]  ;;  %s6559_s26 = smov %s4296_s27 }
 0x649   : > { %s6561_s29 = smov %s4308_s30  ;;  %s6562_s30 = smov %s4312_s8 }
 0x64a   : > { %s6560_s27 = smov %s6552_s6  ;;  %27 = sbr.rel (!%p25_p0) target bundleno = 14 (0xe), region = 137 }
 0x64c   : > { %s6563_s8 = smov %s6554_s18 }
 0x651   :  { %2847 = vsyncpa [#allocation7], 1 }
 0x652   :  { %2849 = vsyncpa [#allocation7 + $0x1], 1 }
 0x653   :  { %2850 = vsyncpa [#allocation10], 1 }
 0x654   :  { %2851 = vsyncpa [#allocation13], 1 }
 0x655   :  { %2852 = vsyncpa [#allocation8], 1 }
 0x656   :  { %2854 = vsyncpa [#allocation8 + $0x1], 1 }

</bundles_post_ra>
